<compile_context>
chip_gen: v7x
topology: tpu7x:2x2x1
jax: 0.10.0
libtpu: 0.0.40
codegen_flags: <defaults>
</compile_context>

<pallas_src>
import functools

import jax
import jax.numpy as jnp
from jax.experimental import pallas as pl
from jax.experimental.pallas import tpu as pltpu

BM_MAX = 256   # max M tile for the conv matmul kernel
CPAD = 128     # encoder conv output channels padded to this (lane-dense stores)


# ---------------------------------------------------------------------------
# Pallas kernels
# ---------------------------------------------------------------------------
def _mm_bias_act_kernel(x_ref, w_ref, b_ref, o_ref, *, relu):
    # bf16 MXU matmul, f32 accumulate, f32 epilogue (bias + optional ReLU).
    acc = jnp.dot(x_ref[...].astype(jnp.bfloat16), w_ref[...],
                  preferred_element_type=jnp.float32)
    acc = acc + b_ref[...]
    if relu:
        acc = jnp.maximum(acc, 0.0)
    o_ref[...] = acc.astype(o_ref.dtype)


def matmul_bias_act(x, w, b2, relu=True, out_dtype=jnp.bfloat16):
    """act(x @ w + b).  x: (M, K) bf16, w: (K, N) bf16, b2: (1, N) f32."""
    M, K = x.shape
    K2, N = w.shape
    assert K == K2 and b2.shape == (1, N)
    bm = M if M < BM_MAX else BM_MAX
    grid_m = pl.cdiv(M, bm)
    return pl.pallas_call(
        functools.partial(_mm_bias_act_kernel, relu=relu),
        out_shape=jax.ShapeDtypeStruct((M, N), out_dtype),
        grid_spec=pltpu.PrefetchScalarGridSpec(
            num_scalar_prefetch=0,
            grid=(grid_m,),
            in_specs=[
                pl.BlockSpec((bm, K), lambda i: (i, 0)),
                pl.BlockSpec((K, N), lambda i: (0, 0)),   # resident weight
                pl.BlockSpec((1, N), lambda i: (0, 0)),   # resident bias
            ],
            out_specs=pl.BlockSpec((bm, N), lambda i: (i, 0)),
        ),
        compiler_params=pltpu.CompilerParams(
            dimension_semantics=("parallel",)),
    )(x, w, b2)


def _fused_mid_kernel(p3_ref, w3_ref, b3_ref, w1_ref, b1_ref, wml_ref, bml_ref,
                      eps_ref, w2_ref, b2_ref, wd_ref, bd_ref,
                      ml_ref, d_ref):
    """conv3 -> flatten -> efc1 -> ReLU -> [mean|logvar] -> reparameterize
       -> dfc2 -> ReLU -> dfc1 -> ReLU, all in one VMEM-resident kernel."""
    B, L = eps_ref.shape
    n_pos = w1_ref.shape[0] // 128          # d3*d3 spatial positions of conv3

    # conv3 as an im2col matmul; rows of p3 are ordered (spatial, batch).
    h3 = jnp.dot(p3_ref[...], w3_ref[...], preferred_element_type=jnp.float32)
    h3 = jnp.maximum(h3 + b3_ref[...], 0.0).astype(jnp.bfloat16)

    # encode_fc1 on the NCHW-flatten order via per-spatial-position accumulation
    # (efc1_w rows are pre-permuted so block j holds spatial position j).
    acc = jnp.zeros((B, w1_ref.shape[1]), jnp.float32)
    for j in range(n_pos):
        acc = acc + jnp.dot(h3[j * B:(j + 1) * B, :],
                            w1_ref[j * 128:(j + 1) * 128, :],
                            preferred_element_type=jnp.float32)
    h1 = jnp.maximum(acc + b1_ref[...], 0.0).astype(jnp.bfloat16)

    # fc_mean | fc_logvar fused into one lane-dense matmul.
    ml = jnp.dot(h1, wml_ref[...], preferred_element_type=jnp.float32) + bml_ref[...]
    ml_ref[...] = ml
    mean = ml[:, :L]
    logvar = ml[:, L:]
    z = mean + eps_ref[...] * jnp.exp(0.5 * logvar)

    # decode_fc2 -> ReLU -> decode_fc1 -> ReLU  (dfc1 columns pre-permuted to NHWC).
    h2 = jnp.dot(z.astype(jnp.bfloat16), w2_ref[...], preferred_element_type=jnp.float32)
    h2 = jnp.maximum(h2 + b2_ref[...], 0.0).astype(jnp.bfloat16)
    d = jnp.dot(h2, wd_ref[...], preferred_element_type=jnp.float32)
    d_ref[...] = jnp.maximum(d + bd_ref[...], 0.0).astype(d_ref.dtype)


def fused_mid(p3, p, eps, flat):
    B, L = eps.shape
    ml, d = pl.pallas_call(
        _fused_mid_kernel,
        out_shape=(jax.ShapeDtypeStruct((B, 2 * L), jnp.float32),
                   jax.ShapeDtypeStruct((B, flat), jnp.bfloat16)),
    )(p3, p["conv3_w"], p["conv3_b"], p["efc1_w"], p["efc1_b"],
      p["fcml_w"], p["fcml_b"], eps, p["dfc2_w"], p["dfc2_b"],
      p["dfc1_w"], p["dfc1_b"])
    return ml[:, :L], ml[:, L:], d


# ---------------------------------------------------------------------------
# Conv lowering glue (NHWC; non-expanding slicing / reshapes in XLA)
# ---------------------------------------------------------------------------
def _im2col_s2(x, cin, batch_minor=False):
    """3x3 / stride-2 / pad-1 patches of NHWC x, using only the first cin channels."""
    B, H, W, _ = x.shape
    xp = jnp.pad(x[..., :cin], ((0, 0), (1, 1), (1, 1), (0, 0)))
    OH = (H + 2 - 3) // 2 + 1
    OW = (W + 2 - 3) // 2 + 1
    cols = [xp[:, ki:ki + 2 * (OH - 1) + 1:2, kj:kj + 2 * (OW - 1) + 1:2, :]
            for ki in range(3) for kj in range(3)]
    patches = jnp.stack(cols, axis=3)                    # (B, OH, OW, 9, cin)
    if batch_minor:                                      # rows ordered (oy, ox, b)
        patches = patches.transpose(1, 2, 0, 3, 4)
        return patches.reshape(OH * OW * B, 9 * cin), OH, OW
    return patches.reshape(B * OH * OW, 9 * cin), OH, OW


def conv2d_s2(x, w2, b2, cin):
    """3x3 stride-2 pad-1 conv + bias + ReLU; NHWC in/out, Cout padded to 128."""
    B = x.shape[0]
    patches, OH, OW = _im2col_s2(x, cin)
    y = matmul_bias_act(patches, w2, b2, relu=True, out_dtype=jnp.bfloat16)
    return y.reshape(B, OH, OW, w2.shape[1])


def _patches_2x2(x, cin):
    """2x2 high-side neighborhoods (K = 4*cin) for the sub-pixel transposed conv."""
    B, H, W, _ = x.shape
    xp = jnp.pad(x[..., :cin], ((0, 0), (0, 1), (0, 1), (0, 0)))
    cols = [xp[:, dy:dy + H, dx:dx + W, :] for dy in (0, 1) for dx in (0, 1)]
    patches = jnp.stack(cols, axis=3)                    # (B, H, W, 4, cin)
    return patches.reshape(B * H * W, 4 * cin)


def conv_transpose2d_s2(x, w2, b2, cin, cout_p, out_hw, relu, out_dtype=jnp.bfloat16):
    """3x3 stride-2 pad-1 transposed conv via the 2x2 sub-pixel decomposition.

    One matmul (M = B*H*W, K = 4*cin, N = 4*cout_p) produces all four output
    phases at once; an XLA pixel-shuffle interleaves them to (B, 2H, 2W, cout_p)
    and the result is cropped to out_hw (output_padding in {0, 1})."""
    B, H, W, _ = x.shape
    patches = _patches_2x2(x, cin)
    y = matmul_bias_act(patches, w2, b2, relu=relu, out_dtype=out_dtype)
    y = y.reshape(B, H, W, 2, 2, cout_p).transpose(0, 1, 3, 2, 4, 5)
    y = y.reshape(B, 2 * H, 2 * W, cout_p)
    return y[:, :out_hw, :out_hw, :]


# ---------------------------------------------------------------------------
# Parameter init (PyTorch layout) and conversion to kernel layout
# ---------------------------------------------------------------------------
def _conv_out_dim(d, k, s, p):
    return (d + 2 * p - k) // s + 1


def _convt_output_padding(in_size, target, k, s, p):
    return target - ((in_size - 1) * s - 2 * p + k)


def _uniform(key, shape, fan_in):
    bound = 1.0 / float(fan_in) ** 0.5
    return jax.random.uniform(key, shape, jnp.float32, -bound, bound)


def init_torch_params(key, in_channels, in_dim, latent_dim):
    d1 = _conv_out_dim(in_dim, 3, 2, 1)
    d2 = _conv_out_dim(d1, 3, 2, 1)
    d3 = _conv_out_dim(d2, 3, 2, 1)
    flat = 128 * d3 * d3
    keys = iter(jax.random.split(key, 22))
    tp = {}

    def conv(name, cout, cin):
        fan = cin * 9
        tp[name + "_w"] = _uniform(next(keys), (cout, cin, 3, 3), fan)
        tp[name + "_b"] = _uniform(next(keys), (cout,), fan)

    def convt(name, cin, cout):
        fan = cout * 9
        tp[name + "_w"] = _uniform(next(keys), (cin, cout, 3, 3), fan)
        tp[name + "_b"] = _uniform(next(keys), (cout,), fan)

    def lin(name, fin, fout):
        tp[name + "_w"] = _uniform(next(keys), (fout, fin), fin)   # torch (out, in)
        tp[name + "_b"] = _uniform(next(keys), (fout,), fin)

    conv("conv1", 32, in_channels)
    conv("conv2", 64, 32)
    conv("conv3", 128, 64)
    lin("efc1", flat, 1024)
    lin("fcm", 1024, latent_dim)
    lin("fcv", 1024, latent_dim)
    lin("dfc2", latent_dim, 1024)
    lin("dfc1", 1024, flat)
    convt("ct3", 128, 64)
    convt("ct2", 64, 32)
    convt("ct1", 32, in_channels)

    dims = dict(d1=d1, d2=d2, d3=d3, flat=flat, in_channels=in_channels,
                in_dim=in_dim, latent_dim=latent_dim)
    return tp, dims


def prepare_params(tp, dims):
    d1, d2, d3 = dims["d1"], dims["d2"], dims["d3"]
    flat, C = dims["flat"], dims["in_channels"]
    cfg = dict(dims)
    cfg["op3"] = _convt_output_padding(d3, d2, 3, 2, 1)
    cfg["op2"] = _convt_output_padding(d2, d1, 3, 2, 1)
    cfg["op1"] = _convt_output_padding(d1, dims["in_dim"], 3, 2, 1)
    assert cfg["op1"] in (0, 1) and cfg["op2"] in (0, 1) and cfg["op3"] in (0, 1)

    def conv_mat(w, cout_pad):               # torch (Cout, Cin, 3, 3) -> (9*Cin, cout_pad)
        cout, cin = w.shape[:2]
        m = w.transpose(2, 3, 1, 0).reshape(9 * cin, cout)
        return jnp.pad(m, ((0, 0), (0, cout_pad - cout))).astype(jnp.bfloat16)

    def conv_bias(b, cout_pad):
        return (jnp.pad(b, (0, cout_pad - b.shape[0]))
                .astype(jnp.float32).reshape(1, cout_pad))

    def convt_phase_mat(w, cout_pad):
        # torch ConvTranspose2d weight (Cin, Cout, 3, 3) -> (4*Cin, 4*cout_pad):
        # rows = (2x2 patch offset, ci), cols = (output sub-pixel phase, co).
        cin, cout = w.shape[:2]
        ky_of = {(0, 0): 1, (1, 0): 2, (1, 1): 0}   # (phase parity, patch offset) -> tap
        m = jnp.zeros((4, cin, 4, cout_pad), jnp.float32)
        for py in (0, 1):
            for px in (0, 1):
                for dy in (0, 1):
                    for dx in (0, 1):
                        ky = ky_of.get((py, dy))
                        kx = ky_of.get((px, dx))
                        if ky is None or kx is None:
                            continue
                        m = m.at[dy * 2 + dx, :, py * 2 + px, :cout].set(w[:, :, ky, kx])
        return m.reshape(4 * cin, 4 * cout_pad).astype(jnp.bfloat16)

    def convt_bias(b, cout_pad):
        bp = jnp.pad(b, (0, cout_pad - b.shape[0])).astype(jnp.float32)
        return jnp.tile(bp, 4).reshape(1, 4 * cout_pad)

    p = {}
    # Encoder convs: real Cin rows only, Cout padded to 128 for lane-dense stores.
    p["conv1_w"] = conv_mat(tp["conv1_w"], CPAD)
    p["conv1_b"] = conv_bias(tp["conv1_b"], CPAD)
    p["conv2_w"] = conv_mat(tp["conv2_w"], CPAD)
    p["conv2_b"] = conv_bias(tp["conv2_b"], CPAD)
    p["conv3_w"] = conv_mat(tp["conv3_w"], 128)
    p["conv3_b"] = conv_bias(tp["conv3_b"], 128)

    # Flatten-order permutation: torch flattens NCHW (c,h,w); kernel uses (h,w,c).
    idx = jnp.arange(flat).reshape(128, d3, d3).transpose(1, 2, 0).reshape(-1)
    p["efc1_w"] = tp["efc1_w"].T[idx, :].astype(jnp.bfloat16)          # rows permuted
    p["efc1_b"] = tp["efc1_b"].reshape(1, -1).astype(jnp.float32)
    p["fcml_w"] = jnp.concatenate([tp["fcm_w"].T, tp["fcv_w"].T], axis=1).astype(jnp.bfloat16)
    p["fcml_b"] = jnp.concatenate([tp["fcm_b"], tp["fcv_b"]]).reshape(1, -1).astype(jnp.float32)
    p["dfc2_w"] = tp["dfc2_w"].T.astype(jnp.bfloat16)
    p["dfc2_b"] = tp["dfc2_b"].reshape(1, -1).astype(jnp.float32)
    p["dfc1_w"] = tp["dfc1_w"].T[:, idx].astype(jnp.bfloat16)          # cols permuted
    p["dfc1_b"] = tp["dfc1_b"][idx].reshape(1, -1).astype(jnp.float32)

    # Decoder transposed convs (sub-pixel weights); pad the final per-phase Cout
    # so the last layer's 4*Cout output stays lane-dense (multiple of 128).
    cfg["ct1_cp"] = ((C + 31) // 32) * 32
    p["ct3_w"] = convt_phase_mat(tp["ct3_w"], 64)
    p["ct3_b"] = convt_bias(tp["ct3_b"], 64)
    p["ct2_w"] = convt_phase_mat(tp["ct2_w"], 32)
    p["ct2_b"] = convt_bias(tp["ct2_b"], 32)
    p["ct1_w"] = convt_phase_mat(tp["ct1_w"], cfg["ct1_cp"])
    p["ct1_b"] = convt_bias(tp["ct1_b"], cfg["ct1_cp"])
    return p, cfg


# ---------------------------------------------------------------------------
# Forward
# ---------------------------------------------------------------------------
def auto_vae_forward(params, x_nchw, eps, *, cfg):
    p = params
    C = cfg["in_channels"]
    d1, d2, d3 = cfg["d1"], cfg["d2"], cfg["d3"]
    B = x_nchw.shape[0]

    x = x_nchw.astype(jnp.bfloat16).transpose(0, 2, 3, 1)            # NHWC
    h = conv2d_s2(x, p["conv1_w"], p["conv1_b"], cin=C)              # (B,d1,d1,128[32])
    h = conv2d_s2(h, p["conv2_w"], p["conv2_b"], cin=32)             # (B,d2,d2,128[64])
    p3, _, _ = _im2col_s2(h, cin=64, batch_minor=True)               # conv3 patches

    # conv3 + full FC chain + reparameterize in one kernel.
    mean, logvar, d = fused_mid(p3, p, eps, cfg["flat"])

    h = d.reshape(B, d3, d3, 128)                                    # NHWC (cols permuted)
    h = conv_transpose2d_s2(h, p["ct3_w"], p["ct3_b"], cin=128, cout_p=64,
                            out_hw=d2, relu=True)
    h = conv_transpose2d_s2(h, p["ct2_w"], p["ct2_b"], cin=64, cout_p=32,
                            out_hw=d1, relu=True)
    h = conv_transpose2d_s2(h, p["ct1_w"], p["ct1_b"], cin=32, cout_p=cfg["ct1_cp"],
                            out_hw=cfg["in_dim"], relu=False, out_dtype=jnp.float32)
    x_rec = h[..., :C].transpose(0, 3, 1, 2)                         # back to NCHW
    return x_rec, mean, logvar


if __name__ == "__main__":
    B, C, H = 2, 4, 16
    latent_dim = 64

    tp, dims = init_torch_params(jax.random.PRNGKey(42), C, H, latent_dim)
    params, cfg = prepare_params(tp, dims)

    key = jax.random.PRNGKey(0)
    kx, keps = jax.random.split(key)
    x = jax.random.normal(kx, (B, C, H, H), jnp.float32)
    # eps plays the role of torch.randn_like(std) in reparameterize()
    eps = jax.random.normal(keps, (B, latent_dim), jnp.float32)

    fwd = jax.jit(functools.partial(auto_vae_forward, cfg=cfg))
    x_rec, mean, logvar = fwd(params, x, eps)
    jax.block_until_ready((x_rec, mean, logvar))

    assert x_rec.shape == (B, C, H, H)
    assert mean.shape == (B, latent_dim)
    assert logvar.shape == (B, latent_dim)
    assert bool(jnp.isfinite(x_rec).all())
    assert bool(jnp.isfinite(mean).all()) and bool(jnp.isfinite(logvar).all())
    print("KERNEL_OK")
</pallas_src>

<mosaic_0001>
module attributes {stable_mosaic.version = 11 : i64} {
  func.func @_mm_bias_act_kernel(%arg0: i32, %arg1: memref<128x36xbf16, #tpu.memory_space<vmem>>, %arg2: memref<36x128xbf16, #tpu.memory_space<vmem>>, %arg3: memref<1x128xf32, #tpu.memory_space<vmem>>, %arg4: memref<128x128xbf16, #tpu.memory_space<vmem>>) attributes {dimension_semantics = [#tpu.dimension_semantics<parallel>], iteration_bounds = array<i64: 1>, scalar_prefetch = 0 : i64, scratch_operands = 0 : i64, tpu.core_type = #tpu.core_type<tc>, window_params = [{transform_indices = @transform_0, window_bounds = array<i64: 128, 36>}, {pipeline_mode = #tpu.pipeline_mode<synchronous>, transform_indices = @transform_1, window_bounds = array<i64: 36, 128>}, {pipeline_mode = #tpu.pipeline_mode<synchronous>, transform_indices = @transform_2, window_bounds = array<i64: 1, 128>}, {transform_indices = @transform_3, window_bounds = array<i64: 128, 128>}]} {
    %c0 = arith.constant 0 : index
    %c0_0 = arith.constant 0 : index
    %0 = vector.load %arg1[%c0, %c0_0] : memref<128x36xbf16, #tpu.memory_space<vmem>>, vector<128x36xbf16>
    %c0_1 = arith.constant 0 : index
    %c0_2 = arith.constant 0 : index
    %1 = vector.load %arg2[%c0_1, %c0_2] : memref<36x128xbf16, #tpu.memory_space<vmem>>, vector<36x128xbf16>
    %cst = arith.constant dense<0.000000e+00> : vector<128x128xf32>
    %2 = tpu.matmul %0, %1, %cst {dimension_numbers = #tpu.dot_dimension_numbers<[1], [0], [0], [1], [0, 0, 1, 1], [], []>} : vector<128x36xbf16>, vector<36x128xbf16>, vector<128x128xf32> -> vector<128x128xf32>
    %c0_3 = arith.constant 0 : index
    %c0_4 = arith.constant 0 : index
    %3 = vector.load %arg3[%c0_3, %c0_4] : memref<1x128xf32, #tpu.memory_space<vmem>>, vector<1x128xf32>
    %4 = vector.broadcast %3 : vector<1x128xf32> to vector<128x128xf32>
    %5 = arith.addf %2, %4 : vector<128x128xf32>
    %cst_5 = arith.constant 0.000000e+00 : f32
    %6 = vector.broadcast %cst_5 : f32 to vector<128x128xf32>
    %7 = arith.maximumf %5, %6 : vector<128x128xf32>
    %8 = arith.truncf %7 : vector<128x128xf32> to vector<128x128xbf16>
    %c0_6 = arith.constant 0 : index
    %c0_7 = arith.constant 0 : index
    %9 = vector.load %arg4[%c0_6, %c0_7] : memref<128x128xbf16, #tpu.memory_space<vmem>>, vector<128x128xbf16>
    tpu.vector_store %arg4[%c0_6, %c0_7], %8 {strides = array<i32>} : memref<128x128xbf16, #tpu.memory_space<vmem>>, vector<128x128xbf16>,
    return
  }
  func.func @transform_0(%arg0: i32) -> (i32, i32) {
    %c0_i32 = arith.constant 0 : i32
    %c0_i32_0 = arith.constant 0 : i32
    return %arg0, %c0_i32 : i32, i32
  }
  func.func @transform_1(%arg0: i32) -> (i32, i32) {
    %c0_i32 = arith.constant 0 : i32
    %c0_i32_0 = arith.constant 0 : i32
    %c0_i32_1 = arith.constant 0 : i32
    return %c0_i32, %c0_i32_0 : i32, i32
  }
  func.func @transform_2(%arg0: i32) -> (i32, i32) {
    %c0_i32 = arith.constant 0 : i32
    %c0_i32_0 = arith.constant 0 : i32
    %c0_i32_1 = arith.constant 0 : i32
    return %c0_i32, %c0_i32_0 : i32, i32
  }
  func.func @transform_3(%arg0: i32) -> (i32, i32) {
    %c0_i32 = arith.constant 0 : i32
    %c0_i32_0 = arith.constant 0 : i32
    return %arg0, %c0_i32 : i32, i32
  }
}

module attributes {stable_mosaic.version = 11 : i64} {
  func.func @_mm_bias_act_kernel(%arg0: i32, %arg1: memref<32x288xbf16, #tpu.memory_space<vmem>>, %arg2: memref<288x128xbf16, #tpu.memory_space<vmem>>, %arg3: memref<1x128xf32, #tpu.memory_space<vmem>>, %arg4: memref<32x128xbf16, #tpu.memory_space<vmem>>) attributes {dimension_semantics = [#tpu.dimension_semantics<parallel>], iteration_bounds = array<i64: 1>, scalar_prefetch = 0 : i64, scratch_operands = 0 : i64, tpu.core_type = #tpu.core_type<tc>, window_params = [{transform_indices = @transform_0, window_bounds = array<i64: 32, 288>}, {pipeline_mode = #tpu.pipeline_mode<synchronous>, transform_indices = @transform_1, window_bounds = array<i64: 288, 128>}, {pipeline_mode = #tpu.pipeline_mode<synchronous>, transform_indices = @transform_2, window_bounds = array<i64: 1, 128>}, {transform_indices = @transform_3, window_bounds = array<i64: 32, 128>}]} {
    %c0 = arith.constant 0 : index
    %c0_0 = arith.constant 0 : index
    %0 = vector.load %arg1[%c0, %c0_0] : memref<32x288xbf16, #tpu.memory_space<vmem>>, vector<32x288xbf16>
    %c0_1 = arith.constant 0 : index
    %c0_2 = arith.constant 0 : index
    %1 = vector.load %arg2[%c0_1, %c0_2] : memref<288x128xbf16, #tpu.memory_space<vmem>>, vector<288x128xbf16>
    %cst = arith.constant dense<0.000000e+00> : vector<32x128xf32>
    %2 = tpu.matmul %0, %1, %cst {dimension_numbers = #tpu.dot_dimension_numbers<[1], [0], [0], [1], [0, 0, 1, 1], [], []>} : vector<32x288xbf16>, vector<288x128xbf16>, vector<32x128xf32> -> vector<32x128xf32>
    %c0_3 = arith.constant 0 : index
    %c0_4 = arith.constant 0 : index
    %3 = vector.load %arg3[%c0_3, %c0_4] : memref<1x128xf32, #tpu.memory_space<vmem>>, vector<1x128xf32>
    %4 = vector.broadcast %3 : vector<1x128xf32> to vector<32x128xf32>
    %5 = arith.addf %2, %4 : vector<32x128xf32>
    %cst_5 = arith.constant 0.000000e+00 : f32
    %6 = vector.broadcast %cst_5 : f32 to vector<32x128xf32>
    %7 = arith.maximumf %5, %6 : vector<32x128xf32>
    %8 = arith.truncf %7 : vector<32x128xf32> to vector<32x128xbf16>
    %c0_6 = arith.constant 0 : index
    %c0_7 = arith.constant 0 : index
    %9 = vector.load %arg4[%c0_6, %c0_7] : memref<32x128xbf16, #tpu.memory_space<vmem>>, vector<32x128xbf16>
    tpu.vector_store %arg4[%c0_6, %c0_7], %8 {strides = array<i32>} : memref<32x128xbf16, #tpu.memory_space<vmem>>, vector<32x128xbf16>,
    return
  }
  func.func @transform_0(%arg0: i32) -> (i32, i32) {
    %c0_i32 = arith.constant 0 : i32
    %c0_i32_0 = arith.constant 0 : i32
    return %arg0, %c0_i32 : i32, i32
  }
  func.func @transform_1(%arg0: i32) -> (i32, i32) {
    %c0_i32 = arith.constant 0 : i32
    %c0_i32_0 = arith.constant 0 : i32
    %c0_i32_1 = arith.constant 0 : i32
    return %c0_i32, %c0_i32_0 : i32, i32
  }
  func.func @transform_2(%arg0: i32) -> (i32, i32) {
    %c0_i32 = arith.constant 0 : i32
    %c0_i32_0 = arith.constant 0 : i32
    %c0_i32_1 = arith.constant 0 : i32
    return %c0_i32, %c0_i32_0 : i32, i32
  }
  func.func @transform_3(%arg0: i32) -> (i32, i32) {
    %c0_i32 = arith.constant 0 : i32
    %c0_i32_0 = arith.constant 0 : i32
    return %arg0, %c0_i32 : i32, i32
  }
}

module attributes {stable_mosaic.version = 11 : i64} {
  func.func @_fused_mid_kernel(%arg0: memref<8x576xbf16, #tpu.memory_space<vmem>>, %arg1: memref<576x128xbf16, #tpu.memory_space<vmem>>, %arg2: memref<1x128xf32, #tpu.memory_space<vmem>>, %arg3: memref<512x1024xbf16, #tpu.memory_space<vmem>>, %arg4: memref<1x1024xf32, #tpu.memory_space<vmem>>, %arg5: memref<1024x128xbf16, #tpu.memory_space<vmem>>, %arg6: memref<1x128xf32, #tpu.memory_space<vmem>>, %arg7: memref<2x64xf32, #tpu.memory_space<vmem>>, %arg8: memref<64x1024xbf16, #tpu.memory_space<vmem>>, %arg9: memref<1x1024xf32, #tpu.memory_space<vmem>>, %arg10: memref<1024x512xbf16, #tpu.memory_space<vmem>>, %arg11: memref<1x512xf32, #tpu.memory_space<vmem>>, %arg12: memref<2x128xf32, #tpu.memory_space<vmem>>, %arg13: memref<2x512xbf16, #tpu.memory_space<vmem>>) attributes {dimension_semantics = [], scalar_prefetch = 0 : i64, scratch_operands = 0 : i64, tpu.core_type = #tpu.core_type<tc>} {
    %c0 = arith.constant 0 : index
    %c0_0 = arith.constant 0 : index
    %0 = vector.load %arg0[%c0, %c0_0] : memref<8x576xbf16, #tpu.memory_space<vmem>>, vector<8x576xbf16>
    %c0_1 = arith.constant 0 : index
    %c0_2 = arith.constant 0 : index
    %1 = vector.load %arg1[%c0_1, %c0_2] : memref<576x128xbf16, #tpu.memory_space<vmem>>, vector<576x128xbf16>
    %cst = arith.constant dense<0.000000e+00> : vector<8x128xf32>
    %2 = tpu.matmul %0, %1, %cst {dimension_numbers = #tpu.dot_dimension_numbers<[1], [0], [0], [1], [0, 0, 1, 1], [], []>} : vector<8x576xbf16>, vector<576x128xbf16>, vector<8x128xf32> -> vector<8x128xf32>
    %c0_3 = arith.constant 0 : index
    %c0_4 = arith.constant 0 : index
    %3 = vector.load %arg2[%c0_3, %c0_4] : memref<1x128xf32, #tpu.memory_space<vmem>>, vector<1x128xf32>
    %4 = vector.broadcast %3 : vector<1x128xf32> to vector<8x128xf32>
    %5 = arith.addf %2, %4 : vector<8x128xf32>
    %cst_5 = arith.constant 0.000000e+00 : f32
    %6 = vector.broadcast %cst_5 : f32 to vector<8x128xf32>
    %7 = arith.maximumf %5, %6 : vector<8x128xf32>
    %8 = arith.truncf %7 : vector<8x128xf32> to vector<8x128xbf16>
    %cst_6 = arith.constant 0.000000e+00 : f32
    %9 = vector.broadcast %cst_6 : f32 to vector<2x1024xf32>
    %10 = vector.extract_strided_slice %8 {offsets = [0, 0], sizes = [2, 128], strides = [1, 1]} : vector<8x128xbf16> to vector<2x128xbf16>
    %c0_7 = arith.constant 0 : index
    %c0_8 = arith.constant 0 : index
    %11 = vector.load %arg3[%c0_7, %c0_8] : memref<512x1024xbf16, #tpu.memory_space<vmem>>, vector<128x1024xbf16>
    %cst_9 = arith.constant dense<0.000000e+00> : vector<2x1024xf32>
    %12 = tpu.matmul %10, %11, %cst_9 {dimension_numbers = #tpu.dot_dimension_numbers<[1], [0], [0], [1], [0, 0, 1, 1], [], []>} : vector<2x128xbf16>, vector<128x1024xbf16>, vector<2x1024xf32> -> vector<2x1024xf32>
    %13 = arith.addf %9, %12 : vector<2x1024xf32>
    %14 = vector.extract_strided_slice %8 {offsets = [2, 0], sizes = [2, 128], strides = [1, 1]} : vector<8x128xbf16> to vector<2x128xbf16>
    %c128 = arith.constant 128 : index
    %c0_10 = arith.constant 0 : index
    %15 = vector.load %arg3[%c128, %c0_10] : memref<512x1024xbf16, #tpu.memory_space<vmem>>, vector<128x1024xbf16>
    %cst_11 = arith.constant dense<0.000000e+00> : vector<2x1024xf32>
    %16 = tpu.matmul %14, %15, %cst_11 {dimension_numbers = #tpu.dot_dimension_numbers<[1], [0], [0], [1], [0, 0, 1, 1], [], []>} : vector<2x128xbf16>, vector<128x1024xbf16>, vector<2x1024xf32> -> vector<2x1024xf32>
    %17 = arith.addf %13, %16 : vector<2x1024xf32>
    %18 = vector.extract_strided_slice %8 {offsets = [4, 0], sizes = [2, 128], strides = [1, 1]} : vector<8x128xbf16> to vector<2x128xbf16>
    %c256 = arith.constant 256 : index
    %c0_12 = arith.constant 0 : index
    %19 = vector.load %arg3[%c256, %c0_12] : memref<512x1024xbf16, #tpu.memory_space<vmem>>, vector<128x1024xbf16>
    %cst_13 = arith.constant dense<0.000000e+00> : vector<2x1024xf32>
    %20 = tpu.matmul %18, %19, %cst_13 {dimension_numbers = #tpu.dot_dimension_numbers<[1], [0], [0], [1], [0, 0, 1, 1], [], []>} : vector<2x128xbf16>, vector<128x1024xbf16>, vector<2x1024xf32> -> vector<2x1024xf32>
    %21 = arith.addf %17, %20 : vector<2x1024xf32>
    %22 = vector.extract_strided_slice %8 {offsets = [6, 0], sizes = [2, 128], strides = [1, 1]} : vector<8x128xbf16> to vector<2x128xbf16>
    %c384 = arith.constant 384 : index
    %c0_14 = arith.constant 0 : index
    %23 = vector.load %arg3[%c384, %c0_14] : memref<512x1024xbf16, #tpu.memory_space<vmem>>, vector<128x1024xbf16>
    %cst_15 = arith.constant dense<0.000000e+00> : vector<2x1024xf32>
    %24 = tpu.matmul %22, %23, %cst_15 {dimension_numbers = #tpu.dot_dimension_numbers<[1], [0], [0], [1], [0, 0, 1, 1], [], []>} : vector<2x128xbf16>, vector<128x1024xbf16>, vector<2x1024xf32> -> vector<2x1024xf32>
    %25 = arith.addf %21, %24 : vector<2x1024xf32>
    %c0_16 = arith.constant 0 : index
    %c0_17 = arith.constant 0 : index
    %26 = vector.load %arg4[%c0_16, %c0_17] : memref<1x1024xf32, #tpu.memory_space<vmem>>, vector<1x1024xf32>
    %27 = vector.broadcast %26 : vector<1x1024xf32> to vector<2x1024xf32>
    %28 = arith.addf %25, %27 : vector<2x1024xf32>
    %cst_18 = arith.constant 0.000000e+00 : f32
    %29 = vector.broadcast %cst_18 : f32 to vector<2x1024xf32>
    %30 = arith.maximumf %28, %29 : vector<2x1024xf32>
    %31 = arith.truncf %30 : vector<2x1024xf32> to vector<2x1024xbf16>
    %c0_19 = arith.constant 0 : index
    %c0_20 = arith.constant 0 : index
    %32 = vector.load %arg5[%c0_19, %c0_20] : memref<1024x128xbf16, #tpu.memory_space<vmem>>, vector<1024x128xbf16>
    %cst_21 = arith.constant dense<0.000000e+00> : vector<2x128xf32>
    %33 = tpu.matmul %31, %32, %cst_21 {dimension_numbers = #tpu.dot_dimension_numbers<[1], [0], [0], [1], [0, 0, 1, 1], [], []>} : vector<2x1024xbf16>, vector<1024x128xbf16>, vector<2x128xf32> -> vector<2x128xf32>
    %c0_22 = arith.constant 0 : index
    %c0_23 = arith.constant 0 : index
    %34 = vector.load %arg6[%c0_22, %c0_23] : memref<1x128xf32, #tpu.memory_space<vmem>>, vector<1x128xf32>
    %35 = vector.broadcast %34 : vector<1x128xf32> to vector<2x128xf32>
    %36 = arith.addf %33, %35 : vector<2x128xf32>
    %c0_24 = arith.constant 0 : index
    %c0_25 = arith.constant 0 : index
    %37 = vector.load %arg12[%c0_24, %c0_25] : memref<2x128xf32, #tpu.memory_space<vmem>>, vector<2x128xf32>
    tpu.vector_store %arg12[%c0_24, %c0_25], %36 {strides = array<i32>} : memref<2x128xf32, #tpu.memory_space<vmem>>, vector<2x128xf32>,
    %38 = vector.extract_strided_slice %36 {offsets = [0, 0], sizes = [2, 64], strides = [1, 1]} : vector<2x128xf32> to vector<2x64xf32>
    %39 = vector.extract_strided_slice %36 {offsets = [0, 64], sizes = [2, 64], strides = [1, 1]} : vector<2x128xf32> to vector<2x64xf32>
    %c0_26 = arith.constant 0 : index
    %c0_27 = arith.constant 0 : index
    %40 = vector.load %arg7[%c0_26, %c0_27] : memref<2x64xf32, #tpu.memory_space<vmem>>, vector<2x64xf32>
    %cst_28 = arith.constant 5.000000e-01 : f32
    %41 = vector.broadcast %cst_28 : f32 to vector<2x64xf32>
    %42 = arith.mulf %41, %39 : vector<2x64xf32>
    %43 = math.exp %42 : vector<2x64xf32>
    %44 = arith.mulf %40, %43 : vector<2x64xf32>
    %45 = arith.addf %38, %44 : vector<2x64xf32>
    %46 = arith.truncf %45 : vector<2x64xf32> to vector<2x64xbf16>
    %c0_29 = arith.constant 0 : index
    %c0_30 = arith.constant 0 : index
    %47 = vector.load %arg8[%c0_29, %c0_30] : memref<64x1024xbf16, #tpu.memory_space<vmem>>, vector<64x1024xbf16>
    %cst_31 = arith.constant dense<0.000000e+00> : vector<2x1024xf32>
    %48 = tpu.matmul %46, %47, %cst_31 {dimension_numbers = #tpu.dot_dimension_numbers<[1], [0], [0], [1], [0, 0, 1, 1], [], []>} : vector<2x64xbf16>, vector<64x1024xbf16>, vector<2x1024xf32> -> vector<2x1024xf32>
    %c0_32 = arith.constant 0 : index
    %c0_33 = arith.constant 0 : index
    %49 = vector.load %arg9[%c0_32, %c0_33] : memref<1x1024xf32, #tpu.memory_space<vmem>>, vector<1x1024xf32>
    %50 = vector.broadcast %49 : vector<1x1024xf32> to vector<2x1024xf32>
    %51 = arith.addf %48, %50 : vector<2x1024xf32>
    %cst_34 = arith.constant 0.000000e+00 : f32
    %52 = vector.broadcast %cst_34 : f32 to vector<2x1024xf32>
    %53 = arith.maximumf %51, %52 : vector<2x1024xf32>
    %54 = arith.truncf %53 : vector<2x1024xf32> to vector<2x1024xbf16>
    %c0_35 = arith.constant 0 : index
    %c0_36 = arith.constant 0 : index
    %55 = vector.load %arg10[%c0_35, %c0_36] : memref<1024x512xbf16, #tpu.memory_space<vmem>>, vector<1024x512xbf16>
    %cst_37 = arith.constant dense<0.000000e+00> : vector<2x512xf32>
    %56 = tpu.matmul %54, %55, %cst_37 {dimension_numbers = #tpu.dot_dimension_numbers<[1], [0], [0], [1], [0, 0, 1, 1], [], []>} : vector<2x1024xbf16>, vector<1024x512xbf16>, vector<2x512xf32> -> vector<2x512xf32>
    %c0_38 = arith.constant 0 : index
    %c0_39 = arith.constant 0 : index
    %57 = vector.load %arg11[%c0_38, %c0_39] : memref<1x512xf32, #tpu.memory_space<vmem>>, vector<1x512xf32>
    %58 = vector.broadcast %57 : vector<1x512xf32> to vector<2x512xf32>
    %59 = arith.addf %56, %58 : vector<2x512xf32>
    %cst_40 = arith.constant 0.000000e+00 : f32
    %60 = vector.broadcast %cst_40 : f32 to vector<2x512xf32>
    %61 = arith.maximumf %59, %60 : vector<2x512xf32>
    %62 = arith.truncf %61 : vector<2x512xf32> to vector<2x512xbf16>
    %c0_41 = arith.constant 0 : index
    %c0_42 = arith.constant 0 : index
    %63 = vector.load %arg13[%c0_41, %c0_42] : memref<2x512xbf16, #tpu.memory_space<vmem>>, vector<2x512xbf16>
    tpu.vector_store %arg13[%c0_41, %c0_42], %62 {strides = array<i32>} : memref<2x512xbf16, #tpu.memory_space<vmem>>, vector<2x512xbf16>,
    return
  }
}

module attributes {stable_mosaic.version = 11 : i64} {
  func.func @_mm_bias_act_kernel(%arg0: i32, %arg1: memref<8x512xbf16, #tpu.memory_space<vmem>>, %arg2: memref<512x256xbf16, #tpu.memory_space<vmem>>, %arg3: memref<1x256xf32, #tpu.memory_space<vmem>>, %arg4: memref<8x256xbf16, #tpu.memory_space<vmem>>) attributes {dimension_semantics = [#tpu.dimension_semantics<parallel>], iteration_bounds = array<i64: 1>, scalar_prefetch = 0 : i64, scratch_operands = 0 : i64, tpu.core_type = #tpu.core_type<tc>, window_params = [{transform_indices = @transform_0, window_bounds = array<i64: 8, 512>}, {pipeline_mode = #tpu.pipeline_mode<synchronous>, transform_indices = @transform_1, window_bounds = array<i64: 512, 256>}, {pipeline_mode = #tpu.pipeline_mode<synchronous>, transform_indices = @transform_2, window_bounds = array<i64: 1, 256>}, {transform_indices = @transform_3, window_bounds = array<i64: 8, 256>}]} {
    %c0 = arith.constant 0 : index
    %c0_0 = arith.constant 0 : index
    %0 = vector.load %arg1[%c0, %c0_0] : memref<8x512xbf16, #tpu.memory_space<vmem>>, vector<8x512xbf16>
    %c0_1 = arith.constant 0 : index
    %c0_2 = arith.constant 0 : index
    %1 = vector.load %arg2[%c0_1, %c0_2] : memref<512x256xbf16, #tpu.memory_space<vmem>>, vector<512x256xbf16>
    %cst = arith.constant dense<0.000000e+00> : vector<8x256xf32>
    %2 = tpu.matmul %0, %1, %cst {dimension_numbers = #tpu.dot_dimension_numbers<[1], [0], [0], [1], [0, 0, 1, 1], [], []>} : vector<8x512xbf16>, vector<512x256xbf16>, vector<8x256xf32> -> vector<8x256xf32>
    %c0_3 = arith.constant 0 : index
    %c0_4 = arith.constant 0 : index
    %3 = vector.load %arg3[%c0_3, %c0_4] : memref<1x256xf32, #tpu.memory_space<vmem>>, vector<1x256xf32>
    %4 = vector.broadcast %3 : vector<1x256xf32> to vector<8x256xf32>
    %5 = arith.addf %2, %4 : vector<8x256xf32>
    %cst_5 = arith.constant 0.000000e+00 : f32
    %6 = vector.broadcast %cst_5 : f32 to vector<8x256xf32>
    %7 = arith.maximumf %5, %6 : vector<8x256xf32>
    %8 = arith.truncf %7 : vector<8x256xf32> to vector<8x256xbf16>
    %c0_6 = arith.constant 0 : index
    %c0_7 = arith.constant 0 : index
    %9 = vector.load %arg4[%c0_6, %c0_7] : memref<8x256xbf16, #tpu.memory_space<vmem>>, vector<8x256xbf16>
    tpu.vector_store %arg4[%c0_6, %c0_7], %8 {strides = array<i32>} : memref<8x256xbf16, #tpu.memory_space<vmem>>, vector<8x256xbf16>,
    return
  }
  func.func @transform_0(%arg0: i32) -> (i32, i32) {
    %c0_i32 = arith.constant 0 : i32
    %c0_i32_0 = arith.constant 0 : i32
    return %arg0, %c0_i32 : i32, i32
  }
  func.func @transform_1(%arg0: i32) -> (i32, i32) {
    %c0_i32 = arith.constant 0 : i32
    %c0_i32_0 = arith.constant 0 : i32
    %c0_i32_1 = arith.constant 0 : i32
    return %c0_i32, %c0_i32_0 : i32, i32
  }
  func.func @transform_2(%arg0: i32) -> (i32, i32) {
    %c0_i32 = arith.constant 0 : i32
    %c0_i32_0 = arith.constant 0 : i32
    %c0_i32_1 = arith.constant 0 : i32
    return %c0_i32, %c0_i32_0 : i32, i32
  }
  func.func @transform_3(%arg0: i32) -> (i32, i32) {
    %c0_i32 = arith.constant 0 : i32
    %c0_i32_0 = arith.constant 0 : i32
    return %arg0, %c0_i32 : i32, i32
  }
}

module attributes {stable_mosaic.version = 11 : i64} {
  func.func @_mm_bias_act_kernel(%arg0: i32, %arg1: memref<32x256xbf16, #tpu.memory_space<vmem>>, %arg2: memref<256x128xbf16, #tpu.memory_space<vmem>>, %arg3: memref<1x128xf32, #tpu.memory_space<vmem>>, %arg4: memref<32x128xbf16, #tpu.memory_space<vmem>>) attributes {dimension_semantics = [#tpu.dimension_semantics<parallel>], iteration_bounds = array<i64: 1>, scalar_prefetch = 0 : i64, scratch_operands = 0 : i64, tpu.core_type = #tpu.core_type<tc>, window_params = [{transform_indices = @transform_0, window_bounds = array<i64: 32, 256>}, {pipeline_mode = #tpu.pipeline_mode<synchronous>, transform_indices = @transform_1, window_bounds = array<i64: 256, 128>}, {pipeline_mode = #tpu.pipeline_mode<synchronous>, transform_indices = @transform_2, window_bounds = array<i64: 1, 128>}, {transform_indices = @transform_3, window_bounds = array<i64: 32, 128>}]} {
    %c0 = arith.constant 0 : index
    %c0_0 = arith.constant 0 : index
    %0 = vector.load %arg1[%c0, %c0_0] : memref<32x256xbf16, #tpu.memory_space<vmem>>, vector<32x256xbf16>
    %c0_1 = arith.constant 0 : index
    %c0_2 = arith.constant 0 : index
    %1 = vector.load %arg2[%c0_1, %c0_2] : memref<256x128xbf16, #tpu.memory_space<vmem>>, vector<256x128xbf16>
    %cst = arith.constant dense<0.000000e+00> : vector<32x128xf32>
    %2 = tpu.matmul %0, %1, %cst {dimension_numbers = #tpu.dot_dimension_numbers<[1], [0], [0], [1], [0, 0, 1, 1], [], []>} : vector<32x256xbf16>, vector<256x128xbf16>, vector<32x128xf32> -> vector<32x128xf32>
    %c0_3 = arith.constant 0 : index
    %c0_4 = arith.constant 0 : index
    %3 = vector.load %arg3[%c0_3, %c0_4] : memref<1x128xf32, #tpu.memory_space<vmem>>, vector<1x128xf32>
    %4 = vector.broadcast %3 : vector<1x128xf32> to vector<32x128xf32>
    %5 = arith.addf %2, %4 : vector<32x128xf32>
    %cst_5 = arith.constant 0.000000e+00 : f32
    %6 = vector.broadcast %cst_5 : f32 to vector<32x128xf32>
    %7 = arith.maximumf %5, %6 : vector<32x128xf32>
    %8 = arith.truncf %7 : vector<32x128xf32> to vector<32x128xbf16>
    %c0_6 = arith.constant 0 : index
    %c0_7 = arith.constant 0 : index
    %9 = vector.load %arg4[%c0_6, %c0_7] : memref<32x128xbf16, #tpu.memory_space<vmem>>, vector<32x128xbf16>
    tpu.vector_store %arg4[%c0_6, %c0_7], %8 {strides = array<i32>} : memref<32x128xbf16, #tpu.memory_space<vmem>>, vector<32x128xbf16>,
    return
  }
  func.func @transform_0(%arg0: i32) -> (i32, i32) {
    %c0_i32 = arith.constant 0 : i32
    %c0_i32_0 = arith.constant 0 : i32
    return %arg0, %c0_i32 : i32, i32
  }
  func.func @transform_1(%arg0: i32) -> (i32, i32) {
    %c0_i32 = arith.constant 0 : i32
    %c0_i32_0 = arith.constant 0 : i32
    %c0_i32_1 = arith.constant 0 : i32
    return %c0_i32, %c0_i32_0 : i32, i32
  }
  func.func @transform_2(%arg0: i32) -> (i32, i32) {
    %c0_i32 = arith.constant 0 : i32
    %c0_i32_0 = arith.constant 0 : i32
    %c0_i32_1 = arith.constant 0 : i32
    return %c0_i32, %c0_i32_0 : i32, i32
  }
  func.func @transform_3(%arg0: i32) -> (i32, i32) {
    %c0_i32 = arith.constant 0 : i32
    %c0_i32_0 = arith.constant 0 : i32
    return %arg0, %c0_i32 : i32, i32
  }
}

module attributes {stable_mosaic.version = 11 : i64} {
  func.func @_mm_bias_act_kernel(%arg0: i32, %arg1: memref<128x128xbf16, #tpu.memory_space<vmem>>, %arg2: memref<128x128xbf16, #tpu.memory_space<vmem>>, %arg3: memref<1x128xf32, #tpu.memory_space<vmem>>, %arg4: memref<128x128xf32, #tpu.memory_space<vmem>>) attributes {dimension_semantics = [#tpu.dimension_semantics<parallel>], iteration_bounds = array<i64: 1>, scalar_prefetch = 0 : i64, scratch_operands = 0 : i64, tpu.core_type = #tpu.core_type<tc>, window_params = [{transform_indices = @transform_0, window_bounds = array<i64: 128, 128>}, {pipeline_mode = #tpu.pipeline_mode<synchronous>, transform_indices = @transform_1, window_bounds = array<i64: 128, 128>}, {pipeline_mode = #tpu.pipeline_mode<synchronous>, transform_indices = @transform_2, window_bounds = array<i64: 1, 128>}, {transform_indices = @transform_3, window_bounds = array<i64: 128, 128>}]} {
    %c0 = arith.constant 0 : index
    %c0_0 = arith.constant 0 : index
    %0 = vector.load %arg1[%c0, %c0_0] : memref<128x128xbf16, #tpu.memory_space<vmem>>, vector<128x128xbf16>
    %c0_1 = arith.constant 0 : index
    %c0_2 = arith.constant 0 : index
    %1 = vector.load %arg2[%c0_1, %c0_2] : memref<128x128xbf16, #tpu.memory_space<vmem>>, vector<128x128xbf16>
    %cst = arith.constant dense<0.000000e+00> : vector<128x128xf32>
    %2 = tpu.matmul %0, %1, %cst {dimension_numbers = #tpu.dot_dimension_numbers<[1], [0], [0], [1], [0, 0, 1, 1], [], []>} : vector<128x128xbf16>, vector<128x128xbf16>, vector<128x128xf32> -> vector<128x128xf32>
    %c0_3 = arith.constant 0 : index
    %c0_4 = arith.constant 0 : index
    %3 = vector.load %arg3[%c0_3, %c0_4] : memref<1x128xf32, #tpu.memory_space<vmem>>, vector<1x128xf32>
    %4 = vector.broadcast %3 : vector<1x128xf32> to vector<128x128xf32>
    %5 = arith.addf %2, %4 : vector<128x128xf32>
    %c0_5 = arith.constant 0 : index
    %c0_6 = arith.constant 0 : index
    %6 = vector.load %arg4[%c0_5, %c0_6] : memref<128x128xf32, #tpu.memory_space<vmem>>, vector<128x128xf32>
    tpu.vector_store %arg4[%c0_5, %c0_6], %5 {strides = array<i32>} : memref<128x128xf32, #tpu.memory_space<vmem>>, vector<128x128xf32>,
    return
  }
  func.func @transform_0(%arg0: i32) -> (i32, i32) {
    %c0_i32 = arith.constant 0 : i32
    %c0_i32_0 = arith.constant 0 : i32
    return %arg0, %c0_i32 : i32, i32
  }
  func.func @transform_1(%arg0: i32) -> (i32, i32) {
    %c0_i32 = arith.constant 0 : i32
    %c0_i32_0 = arith.constant 0 : i32
    %c0_i32_1 = arith.constant 0 : i32
    return %c0_i32, %c0_i32_0 : i32, i32
  }
  func.func @transform_2(%arg0: i32) -> (i32, i32) {
    %c0_i32 = arith.constant 0 : i32
    %c0_i32_0 = arith.constant 0 : i32
    %c0_i32_1 = arith.constant 0 : i32
    return %c0_i32, %c0_i32_0 : i32, i32
  }
  func.func @transform_3(%arg0: i32) -> (i32, i32) {
    %c0_i32 = arith.constant 0 : i32
    %c0_i32_0 = arith.constant 0 : i32
    return %arg0, %c0_i32 : i32, i32
  }
}

</mosaic_0001>

<bundles_post_ra>
// kernel: auto_vae_forward.6
= control target key start
LH: loop header
LB: loop body
LE: loop exit
PB: predicated region body
PF: predicated region fallthrough
CT: control target
= control target key end

     0   :  { %vm98_vm0 = vcmask 293888   ;;  %vm123_vm1 = vcmask 1041408   ;;  %s563_s1 = inlined_call_operand.vmem [shape: bf16[36,128], index: 1, kind: input, shape index: {}]   ;;  %s564_s0 = inlined_call_operand.vmem [shape: bf16[128,36], index: 0, kind: input, shape index: {}]   ;;  %s565_s2 = inlined_call_operand.vmem [shape: f32[1,128], index: 2, kind: input, shape index: {}]   ;;  %s566_s3 = inlined_call_operand.vmem [shape: bf16[128,128], index: 3, kind: output, shape index: {}]  }
   0x1   :  { %v464_v0 = vld [vmem:[%s563_s1] sm:$0xff]   ;;  %v465_v1 = vld [vmem:[%s563_s1 + $0x8] sm:$0xff]   ;;  %v466_v2 = vld [vmem:[%s563_s1 + $0x10] ss:$0 sps:$4 sm:$0x33]  }
   0x2   :  { %434 = vmatprep.subr.bf16.mxu0 %v464_v0  ;;  %456 = vmatprep.subr.bf16.mxu1 %v464_v0  ;;  %v467_v3 = vld [vmem:[%s564_s0] sm:$0xff]   ;;  %v125_v5 = vsel %vm123_vm1, %v466_v2, 0  ;;  %v469_v6 = vld [vmem:[%s564_s0 + $0x8] sm:$0xff]   ;;  %v471_v8 = vld [vmem:[%s564_s0 + $0x10] sm:$0xff]  }
   0x3   :  { %435 = vmatpush3.bf16.msra.mxu0 %v464_v0  ;;  %459 = vmatpush3.bf16.msra.mxu1 %v464_v0  ;;  %v468_v4 = vld [vmem:[%s564_s0 + $0x20] sm:$0xff]   ;;  %v470_v7 = vld [vmem:[%s564_s0 + $0x28] sm:$0xff]   ;;  %v472_v9 = vld [vmem:[%s564_s0 + $0x30] sm:$0xff]  }
   0x4   :  { %436 = vmatprep.subr.bf16.mxu0 %v465_v1  ;;  %457 = vmatprep.subr.bf16.mxu1 %v465_v1  ;;  %v473_v10 = vld [vmem:[%s564_s0 + $0x18] sm:$0xff]   ;;  %v324_v12 = vld [vmem:[%s565_s2] ss:$0 sm:$0xff] }
   0x5   :  { %440 = vmatprep.mubr.msk.bf16.mxu0 %vm98_vm0, %v467_v3  ;;  %448 = vmatprep.mubr.msk.bf16.mxu1 %vm98_vm0, %v468_v4  ;;  %v474_v11 = vld [vmem:[%s564_s0 + $0x38] sm:$0xff]  }
   0x7   :  { %437 = vmatpush3.bf16.msra.mxu0 %v465_v1  ;;  %460 = vmatpush3.bf16.msra.mxu1 %v465_v1 }
   0x8   :  { %462 = vmatprep.subr.msk.bf16.mxu0 %vm123_vm1, %v466_v2  ;;  %463 = vmatprep.subr.msk.bf16.mxu1 %vm123_vm1, %v466_v2 }
   0xb   :  { %439 = vmatpush3.bf16.msra.mxu0 %v125_v5  ;;  %461 = vmatpush3.bf16.msra.mxu1 %v125_v5 }
   0xe   :  { %441 = vmatmul.mubr.msk.bf16.vlgmr.msra.gmra.mrb[0].mxu0 %vm98_vm0, %v469_v6  ;;  %449 = vmatmul.mubr.msk.bf16.vlgmr.msra.gmra.mrb[0].mxu1 %vm98_vm0, %v470_v7 }
   0xf   :  { %444 = vmatprep.mubr.msk.bf16.mxu0 %vm98_vm0, %v471_v8  ;;  %452 = vmatprep.mubr.msk.bf16.mxu1 %vm98_vm0, %v472_v9 }
  0x16   :  { %445 = vmatmul.mubr.msk.bf16.gmra.mrb[4].mxu0 %vm98_vm0, %v473_v10  ;;  %453 = vmatmul.mubr.msk.bf16.gmra.mrb[4].mxu1 %vm98_vm0, %v474_v11 }
  0xe1   :  { %v442_v13 = vpop.f32.mrb[0].mxu0  ;;  %v450_v14 = vpop.f32.mrb[0].mxu1 }
  0xe2   :  { %v170_v15 = vadd.f32 %v442_v13, %v324_v12  ;;  %v202_v16 = vadd.f32 %v450_v14, %v324_v12  ;;  %v161_v17 = vpop.f32.mrb[1].mxu0  ;;  %v193_v18 = vpop.f32.mrb[1].mxu1 }
  0xe3   :  { %v162_v19 = vadd.f32 %v324_v12, %v161_v17  ;;  %v194_v20 = vadd.f32 %v324_v12, %v193_v18  ;;  %v443_v21 = vpop.f32.mrb[2].mxu0  ;;  %v451_v22 = vpop.f32.mrb[2].mxu1 }
  0xe4   :  { %v173_v23 = vadd.f32 %v443_v21, %v324_v12  ;;  %v205_v24 = vadd.f32 %v451_v22, %v324_v12  ;;  %v164_v25 = vpop.f32.mrb[3].mxu0  ;;  %v196_v26 = vpop.f32.mrb[3].mxu1  ;;  %v226_v29 = vmax.f32 %v170_v15, 0.0  ;;  %v234_v30 = vmax.f32 %v202_v16, 0.0 }
  0xe5   :  { %v165_v27 = vadd.f32 %v324_v12, %v164_v25  ;;  %v197_v28 = vadd.f32 %v324_v12, %v196_v26  ;;  %v224_v33 = vmax.f32 %v162_v19, 0.0  ;;  %v232_v34 = vmax.f32 %v194_v20, 0.0 }
  0xe6   :  { %v227_v31 = vmax.f32 %v173_v23, 0.0  ;;  %v235_v32 = vmax.f32 %v205_v24, 0.0 }
  0xe7   :  { %v225_v35 = vmax.f32 %v165_v27, 0.0  ;;  %v233_v36 = vmax.f32 %v197_v28, 0.0 }
  0xe8   :  { %v384_v37 = vpack.c.bf16 %v227_v31, %v226_v29  ;;  %v404_v38 = vpack.c.bf16 %v235_v32, %v234_v30 }
  0xe9   :  { %v379_v39 = vpack.c.bf16 %v225_v35, %v224_v33  ;;  %v399_v40 = vpack.c.bf16 %v233_v36, %v232_v34  ;;  %v446_v41 = vpop.f32.mrb[4].mxu0  ;;  %v454_v42 = vpop.f32.mrb[4].mxu1 }
  0xea   :  { %416 = vst [vmem:[%s566_s3 + $0x8] sm:$0xff] %v384_v37   ;;  %420 = vst [vmem:[%s566_s3 + $0x28] sm:$0xff] %v404_v38   ;;  %v186_v43 = vadd.f32 %v446_v41, %v324_v12  ;;  %v218_v44 = vadd.f32 %v454_v42, %v324_v12  ;;  %v177_v45 = vpop.f32.mrb[5].mxu0  ;;  %v209_v46 = vpop.f32.mrb[5].mxu1 }
  0xeb   :  { %380 = vst [vmem:[%s566_s3] sm:$0xff] %v379_v39   ;;  %419 = vst [vmem:[%s566_s3 + $0x20] sm:$0xff] %v399_v40   ;;  %v178_v47 = vadd.f32 %v324_v12, %v177_v45  ;;  %v210_v48 = vadd.f32 %v324_v12, %v209_v46  ;;  %v447_v49 = vpop.f32.mrb[6].mxu0  ;;  %v455_v50 = vpop.f32.mrb[6].mxu1 }
  0xec   :  { %v189_v51 = vadd.f32 %v447_v49, %v324_v12  ;;  %v221_v52 = vadd.f32 %v455_v50, %v324_v12  ;;  %v180_v53 = vpop.f32.mrb[7].mxu0  ;;  %v212_v54 = vpop.f32.mrb[7].mxu1  ;;  %v230_v57 = vmax.f32 %v186_v43, 0.0  ;;  %v238_v58 = vmax.f32 %v218_v44, 0.0 }
  0xed   :  { %v181_v55 = vadd.f32 %v324_v12, %v180_v53  ;;  %v213_v56 = vadd.f32 %v324_v12, %v212_v54  ;;  %v228_v61 = vmax.f32 %v178_v47, 0.0  ;;  %v236_v62 = vmax.f32 %v210_v48, 0.0 }
  0xee   :  { %v231_v59 = vmax.f32 %v189_v51, 0.0  ;;  %v239_v60 = vmax.f32 %v221_v52, 0.0 }
  0xef   :  { %v229_v63 = vmax.f32 %v181_v55, 0.0  ;;  %v237_v0 = vmax.f32 %v213_v56, 0.0 }
  0xf0   :  { %v394_v1 = vpack.c.bf16 %v231_v59, %v230_v57  ;;  %v414_v2 = vpack.c.bf16 %v239_v60, %v238_v58 }
  0xf1   :  { %v389_v3 = vpack.c.bf16 %v229_v63, %v228_v61  ;;  %v409_v4 = vpack.c.bf16 %v237_v0, %v236_v62 }
  0xf2   :  { %418 = vst [vmem:[%s566_s3 + $0x18] sm:$0xff] %v394_v1   ;;  %422 = vst [vmem:[%s566_s3 + $0x38] sm:$0xff] %v414_v2  }
  0xf3   :  { %417 = vst [vmem:[%s566_s3 + $0x10] sm:$0xff] %v389_v3   ;;  %421 = vst [vmem:[%s566_s3 + $0x30] sm:$0xff] %v409_v4  }

// kernel: auto_vae_forward.7
= control target key start
LH: loop header
LB: loop body
LE: loop exit
PB: predicated region body
PF: predicated region fallthrough
CT: control target
= control target key end

     0   :  { %8 = vsyncpa [#allocation3], 0  ;;  %s487_s12 = smov [#allocation2]   ;;  %s598_s0 = inlined_call_operand.vmem [shape: bf16[32,288], index: 0, kind: input, shape index: {}]   ;;  %s599_s1 = inlined_call_operand.vmem [shape: bf16[288,128], index: 1, kind: input, shape index: {}]   ;;  %s600_s2 = inlined_call_operand.hbm [shape: f32[1,128], index: 2, kind: input, shape index: {}]   ;;  %s601_s3 = inlined_call_operand.vmem [shape: bf16[32,128], index: 3, kind: output, shape index: {}]  }
   0x1   :  { %s19_s13 = sshll.u32 %s487_s12, 4  ;;  %s463_s16 = scalar_lea.hbm %s600_s2, 16  ;;  %s20_s13 = int_to_ptr.vmem [resolvable:$true] %s19_s13 }
   0x2   :  { %p464_p0 = scmp.ne.s32.totalorder %s600_s2, %s463_s16  ;;  %p467_p1 = scmp.lt.u32.totalorder %s463_s16, %s600_s2 }
   0x4   :  { %p469_p2 = pnand %p467_p1, %p464_p0 }
   0x6   :  { %472 = shalt.err (!%p469_p2)
}
   0x7   :  { %s473_s21 = scalar_lea.vmem %s20_s13, 16  ;;  %s477_s22 = scalar_lea.vmem %s20_s13, 32 }
   0x8   :  { %p474_p3 = scmp.ne.s32.totalorder %s20_s13, %s473_s21  ;;  %p478_p4 = scmp.lt.s32.totalorder %s20_s13, %s20_s13 }
   0x9   :  { %p479_p5 = scmp.lt.s32.totalorder %s477_s22, %s473_s21 }
   0xb   :  { %p480_p6 = por %p479_p5, %p478_p4 }
   0xd   :  { %p481_p7 = pnand %p480_p6, %p474_p3 }
   0xf   :  { %484 = shalt.err (!%p481_p7)
}
  0x10   :  { %22 = dma.hbm_to_vmem [thread:$0]  %s600_s2, 16, %s20_s13, [#allocation3]  }
  0x11   :  { %485 = dma.done.wait [#allocation3], 16  }
  0x12   :  { %486 = vsyncadd [#allocation3], 4294967280  ;;  %v437_v0 = vld [vmem:[%s599_s1 + $0x40] sm:$0xff]   ;;  %v439_v2 = vld [vmem:[%s599_s1 + $0x48] sm:$0xff]   ;;  %vm216_vm0 = vcmask 261120  }
  0x13   :  { %v438_v1 = vld [vmem:[%s599_s1] sm:$0xff]   ;;  %396 = vmatprep.subr.bf16.mxu0 %v437_v0  ;;  %v440_v3 = vld [vmem:[%s599_s1 + $0x8] sm:$0xff]   ;;  %v441_v4 = vld [vmem:[%s599_s1 + $0x50] sm:$0xff]  }
  0x14   :  { %397 = vmatpush3.bf16.msra.mxu0 %v438_v1  ;;  %v442_v5 = vld [vmem:[%s599_s1 + $0x10] sm:$0xff]   ;;  %v443_v6 = vld [vmem:[%s599_s1 + $0x58] sm:$0xff]   ;;  %v445_v8 = vld [vmem:[%s599_s1 + $0x60] sm:$0xff]  }
  0x15   :  { %398 = vmatprep.subr.bf16.mxu0 %v439_v2  ;;  %v444_v7 = vld [vmem:[%s599_s1 + $0x18] sm:$0xff]   ;;  %v446_v9 = vld [vmem:[%s599_s1 + $0x20] sm:$0xff]   ;;  %v447_v11 = vld [vmem:[%s599_s1 + $0x68] sm:$0xff]  }
  0x16   :  { %v452_v10 = vld [vmem:[%s599_s1 + $0x80] sm:$0xff]   ;;  %v448_v12 = vld [vmem:[%s599_s1 + $0x28] sm:$0xff]   ;;  %v449_v13 = vld [vmem:[%s599_s1 + $0x70] sm:$0xff]  }
  0x17   :  { %428 = vmatprep.subr.bf16.mxu1 %v452_v10  ;;  %v456_v14 = vld [vmem:[%s598_s0 + $0x4] ss:$12 sps:$4 sm:$0xff]   ;;  %v457_v15 = vld [vmem:[%s599_s1 + $0x88] sm:$0xff]   ;;  %v451_v19 = vld [vmem:[%s599_s1 + $0x78] sm:$0xff]  }
  0x18   :  { %399 = vmatpush3.bf16.msra.mxu0 %v440_v3  ;;  %429 = vmatpush3.bf16.msra.mxu1 %v452_v10  ;;  %v458_v16 = vld [vmem:[%s598_s0 + $0x8] ss:$12 sps:$4 sm:$0xff]   ;;  %v459_v17 = vld [vmem:[%s598_s0 + $0x20] ss:$12 sps:$4 sm:$0xff]   ;;  %v453_v20 = vld [vmem:[%s599_s1 + $0x38] sm:$0xff]  }
  0x19   :  { %400 = vmatprep.subr.bf16.mxu0 %v441_v4  ;;  %255 = vmatprep.mubr.bf16.mxu0 %v456_v14  ;;  %v450_v18 = vld [vmem:[%s599_s1 + $0x30] sm:$0xff]   ;;  %v454_v21 = vld [vmem:[%s598_s0] ss:$12 sps:$4 sm:$0xff]   ;;  %v460_v22 = vld [vmem:[%s598_s0 + $0x1c] ss:$12 sps:$4 sm:$0xff]  }
  0x1a   :  { %430 = vmatprep.subr.bf16.mxu1 %v457_v15  ;;  %432 = vmatprep.mubr.msk.bf16.mxu1 %vm216_vm0, %v458_v16  ;;  %v462_v23 = vld [vmem:[%s598_s0 + $0x18] ss:$12 sps:$4 sm:$0xff]   ;;  %v350_v30 = vld [vmem:[#allocation2] ss:$0 sm:$0xff] }
  0x1c   :  { %401 = vmatpush3.bf16.msra.mxu0 %v442_v5  ;;  %431 = vmatpush3.bf16.msra.mxu1 %v457_v15 }
  0x1d   :  { %402 = vmatprep.subr.bf16.mxu0 %v443_v6 }
  0x1f   :  { %433 = vmatmul.mubr.msk.bf16.vlgmr.msra.gmra.mrb[0].mxu1 %vm216_vm0, %v459_v17 }
  0x20   :  { %403 = vmatpush3.bf16.msra.mxu0 %v444_v7 }
  0x21   :  { %404 = vmatprep.subr.bf16.mxu0 %v445_v8 }
  0x24   :  { %405 = vmatpush3.bf16.msra.mxu0 %v446_v9 }
  0x25   :  { %406 = vmatprep.subr.bf16.mxu0 %v447_v11 }
  0x28   :  { %407 = vmatpush3.bf16.msra.mxu0 %v448_v12 }
  0x29   :  { %408 = vmatprep.subr.bf16.mxu0 %v449_v13 }
  0x2c   :  { %409 = vmatpush3.bf16.msra.mxu0 %v450_v18 }
  0x2d   :  { %410 = vmatprep.subr.bf16.mxu0 %v451_v19 }
  0x30   :  { %411 = vmatpush3.bf16.msra.mxu0 %v453_v20 }
  0x33   :  { %256 = vmatmul.mubr.bf16.vlgmr.msra.gmra.mrb[0].mxu0 %v454_v21 }
  0x34   :  { %263 = vmatprep.mubr.bf16.mxu0 %v460_v22 }
  0x3b   :  { %264 = vmatmul.mubr.bf16.gmra.mrb[4].mxu0 %v462_v23 }
  0xf2   :  { %v434_v24 = vpop.f32.mrb[0].mxu1 }
  0xf3   :  { %v306_v25 = vpop.f32.mrb[1].mxu1 }
  0xf4   :  { %v435_v26 = vpop.f32.mrb[2].mxu1 }
  0xf5   :  { %v309_v27 = vpop.f32.mrb[3].mxu1 }
 0x106   :  { %v412_v28 = vpop.f32.mrb[0].mxu0 }
 0x107   :  { %v413_v29 = vpop.f32.mrb[1].mxu0 }
 0x108   :  { %v414_v31 = vadd.f32 %v413_v29, %v412_v28  ;;  %v415_v32 = vpop.f32.mrb[2].mxu0 }
 0x109   :  { %v416_v33 = vpop.f32.mrb[3].mxu0 }
 0x10a   :  { %v417_v34 = vadd.f32 %v416_v33, %v415_v32  ;;  %v258_v35 = vadd.f32 %v414_v31, %v350_v30 }
 0x10c   :  { %v307_v36 = vadd.f32 %v306_v25, %v258_v35  ;;  %v261_v37 = vadd.f32 %v417_v34, %v350_v30 }
 0x10e   :  { %v310_v38 = vadd.f32 %v309_v27, %v261_v37  ;;  %v418_v39 = vpop.f32.mrb[4].mxu0  ;;  %v321_v41 = vmax.f32 %v307_v36, 0.0 }
 0x10f   :  { %v419_v40 = vpop.f32.mrb[5].mxu0 }
 0x110   :  { %v322_v42 = vmax.f32 %v310_v38, 0.0  ;;  %v420_v43 = vadd.f32 %v419_v40, %v418_v39  ;;  %v421_v44 = vpop.f32.mrb[6].mxu0 }
 0x111   :  { %v422_v45 = vpop.f32.mrb[7].mxu0 }
 0x112   :  { %v388_v46 = vpack.c.bf16 %v322_v42, %v321_v41  ;;  %v266_v47 = vadd.f32 %v420_v43, %v350_v30  ;;  %v423_v48 = vadd.f32 %v422_v45, %v421_v44 }
 0x114   :  { %389 = vst [vmem:[%s601_s3] sm:$0xff] %v388_v46   ;;  %v315_v49 = vadd.f32 %v434_v24, %v266_v47  ;;  %v269_v50 = vadd.f32 %v423_v48, %v350_v30 }
 0x116   :  { %v318_v51 = vadd.f32 %v435_v26, %v269_v50  ;;  %v323_v52 = vmax.f32 %v315_v49, 0.0 }
 0x118   :  { %v324_v53 = vmax.f32 %v318_v51, 0.0 }
 0x11a   :  { %v393_v54 = vpack.c.bf16 %v324_v53, %v323_v52 }
 0x11c   :  { %395 = vst [vmem:[%s601_s3 + $0x8] sm:$0xff] %v393_v54  }
 0x11d   :  { %349 = vsyncpa [#allocation3], 1 }

// kernel: auto_vae_forward.9
= control target key start
LH: loop header
LB: loop body
LE: loop exit
PB: predicated region body
PF: predicated region fallthrough
CT: control target
= control target key end

     0   :  { %s921_s1 = inlined_call_operand.vmem [shape: bf16[512,256], index: 1, kind: input, shape index: {}]   ;;  %s922_s0 = inlined_call_operand.vmem [shape: bf16[8,512], index: 0, kind: input, shape index: {}]   ;;  %s923_s2 = inlined_call_operand.vmem [shape: f32[1,256], index: 2, kind: input, shape index: {}]   ;;  %s924_s3 = inlined_call_operand.vmem [shape: bf16[8,256], index: 3, kind: output, shape index: {}]  }
   0x1   :  { %v597_v0 = vld [vmem:[%s921_s1 + $0x4] ss:$8 sps:$4 sm:$0xff]   ;;  %v601_v2 = vld [vmem:[%s921_s1] ss:$8 sps:$4 sm:$0xff]   ;;  %v603_v4 = vld [vmem:[%s921_s1 + $0x14] ss:$8 sps:$4 sm:$0xff]  }
   0x2   :  { %v599_v1 = vld [vmem:[%s921_s1 + $0x104] ss:$8 sps:$4 sm:$0xff]   ;;  %426 = vmatprep.subr.bf16.mxu1 %v597_v0  ;;  %v602_v3 = vld [vmem:[%s921_s1 + $0x100] ss:$8 sps:$4 sm:$0xff]   ;;  %v605_v5 = vld [vmem:[%s921_s1 + $0x114] ss:$8 sps:$4 sm:$0xff]  }
   0x3   :  { %467 = vmatprep.subr.bf16.mxu0 %v599_v1  ;;  %427 = vmatpush1.bf16.msra.mxu1 %v601_v2  ;;  %v607_v6 = vld [vmem:[%s921_s1 + $0x10] ss:$8 sps:$4 sm:$0xff]   ;;  %v609_v8 = vld [vmem:[%s921_s1 + $0x24] ss:$8 sps:$4 sm:$0xff]   ;;  %v613_v10 = vld [vmem:[%s921_s1 + $0x20] ss:$8 sps:$4 sm:$0xff]  }
   0x4   :  { %468 = vmatpush1.bf16.msra.mxu0 %v602_v3  ;;  %428 = vmatprep.subr.bf16.mxu1 %v603_v4  ;;  %v608_v7 = vld [vmem:[%s921_s1 + $0x110] ss:$8 sps:$4 sm:$0xff]   ;;  %v611_v9 = vld [vmem:[%s921_s1 + $0x124] ss:$8 sps:$4 sm:$0xff]   ;;  %v614_v11 = vld [vmem:[%s921_s1 + $0x120] ss:$8 sps:$4 sm:$0xff]  }
   0x5   :  { %469 = vmatprep.subr.bf16.mxu0 %v605_v5  ;;  %v615_v12 = vld [vmem:[%s921_s1 + $0x34] ss:$8 sps:$4 sm:$0xff]   ;;  %v619_v14 = vld [vmem:[%s921_s1 + $0x30] ss:$8 sps:$4 sm:$0xff]   ;;  %v621_v16 = vld [vmem:[%s921_s1 + $0x44] ss:$8 sps:$4 sm:$0xff]  }
   0x6   :  { %v617_v13 = vld [vmem:[%s921_s1 + $0x134] ss:$8 sps:$4 sm:$0xff]   ;;  %v620_v15 = vld [vmem:[%s921_s1 + $0x130] ss:$8 sps:$4 sm:$0xff]   ;;  %v623_v17 = vld [vmem:[%s921_s1 + $0x144] ss:$8 sps:$4 sm:$0xff]  }
   0x7   :  { %429 = vmatpush1.bf16.msra.mxu1 %v607_v6  ;;  %v625_v18 = vld [vmem:[%s921_s1 + $0x40] ss:$8 sps:$4 sm:$0xff]   ;;  %v627_v20 = vld [vmem:[%s921_s1 + $0x54] ss:$8 sps:$4 sm:$0xff]   ;;  %v631_v22 = vld [vmem:[%s921_s1 + $0x50] ss:$8 sps:$4 sm:$0xff]   ;;  %v82_v6 = vlaneseq }
   0x8   :  { %470 = vmatpush1.bf16.msra.mxu0 %v608_v7  ;;  %430 = vmatprep.subr.bf16.mxu1 %v609_v8  ;;  %v626_v19 = vld [vmem:[%s921_s1 + $0x140] ss:$8 sps:$4 sm:$0xff]   ;;  %v629_v21 = vld [vmem:[%s921_s1 + $0x154] ss:$8 sps:$4 sm:$0xff]   ;;  %v632_v23 = vld [vmem:[%s921_s1 + $0x150] ss:$8 sps:$4 sm:$0xff]  }
   0x9   :  { %471 = vmatprep.subr.bf16.mxu0 %v611_v9  ;;  %v633_v24 = vld [vmem:[%s921_s1 + $0x64] ss:$8 sps:$4 sm:$0xff]   ;;  %v637_v26 = vld [vmem:[%s921_s1 + $0x60] ss:$8 sps:$4 sm:$0xff]   ;;  %v639_v28 = vld [vmem:[%s921_s1 + $0x74] ss:$8 sps:$4 sm:$0xff]  }
   0xa   :  { %v635_v25 = vld [vmem:[%s921_s1 + $0x164] ss:$8 sps:$4 sm:$0xff]   ;;  %v638_v27 = vld [vmem:[%s921_s1 + $0x160] ss:$8 sps:$4 sm:$0xff]   ;;  %v641_v29 = vld [vmem:[%s921_s1 + $0x174] ss:$8 sps:$4 sm:$0xff]  }
   0xb   :  { %431 = vmatpush1.bf16.msra.mxu1 %v613_v10  ;;  %v643_v30 = vld [vmem:[%s921_s1 + $0x70] ss:$8 sps:$4 sm:$0xff]   ;;  %v645_v32 = vld [vmem:[%s921_s1 + $0x84] ss:$8 sps:$4 sm:$0xff]   ;;  %v649_v34 = vld [vmem:[%s921_s1 + $0x80] ss:$8 sps:$4 sm:$0xff]  }
   0xc   :  { %472 = vmatpush1.bf16.msra.mxu0 %v614_v11  ;;  %432 = vmatprep.subr.bf16.mxu1 %v615_v12  ;;  %v644_v31 = vld [vmem:[%s921_s1 + $0x170] ss:$8 sps:$4 sm:$0xff]   ;;  %v647_v33 = vld [vmem:[%s921_s1 + $0x184] ss:$8 sps:$4 sm:$0xff]   ;;  %v650_v35 = vld [vmem:[%s921_s1 + $0x180] ss:$8 sps:$4 sm:$0xff]  }
   0xd   :  { %473 = vmatprep.subr.bf16.mxu0 %v617_v13  ;;  %v651_v36 = vld [vmem:[%s921_s1 + $0x94] ss:$8 sps:$4 sm:$0xff]   ;;  %v655_v38 = vld [vmem:[%s921_s1 + $0x90] ss:$8 sps:$4 sm:$0xff]   ;;  %v657_v40 = vld [vmem:[%s921_s1 + $0xa4] ss:$8 sps:$4 sm:$0xff]  }
   0xe   :  { %v653_v37 = vld [vmem:[%s921_s1 + $0x194] ss:$8 sps:$4 sm:$0xff]   ;;  %v656_v39 = vld [vmem:[%s921_s1 + $0x190] ss:$8 sps:$4 sm:$0xff]   ;;  %v659_v41 = vld [vmem:[%s921_s1 + $0x1a4] ss:$8 sps:$4 sm:$0xff]  }
   0xf   :  { %433 = vmatpush1.bf16.msra.mxu1 %v619_v14  ;;  %v661_v42 = vld [vmem:[%s921_s1 + $0xa0] ss:$8 sps:$4 sm:$0xff]   ;;  %v663_v44 = vld [vmem:[%s921_s1 + $0xb4] ss:$8 sps:$4 sm:$0xff]   ;;  %v667_v49 = vld [vmem:[%s921_s1 + $0xb0] ss:$8 sps:$4 sm:$0xff]  }
  0x10   :  { %474 = vmatpush1.bf16.msra.mxu0 %v620_v15  ;;  %434 = vmatprep.subr.bf16.mxu1 %v621_v16  ;;  %v662_v43 = vld [vmem:[%s921_s1 + $0x1a0] ss:$8 sps:$4 sm:$0xff]   ;;  %v665_v45 = vld [vmem:[%s921_s1 + $0x1b4] ss:$8 sps:$4 sm:$0xff]   ;;  %v668_v50 = vld [vmem:[%s921_s1 + $0x1b0] ss:$8 sps:$4 sm:$0xff]  }
  0x11   :  { %475 = vmatprep.subr.bf16.mxu0 %v623_v17  ;;  %v14_v46 = vld [vmem:[%s922_s0] sm:$0xff]  ;;  %v15_v48 = vld [vmem:[%s922_s0 + $0x8] sm:$0xff]  ;;  %v675_v56 = vld [vmem:[%s921_s1 + $0xd4] ss:$8 sps:$4 sm:$0xff]   ;;  %v83_v7 = vshrl.u32 %v82_v6, 7 }
  0x12   :  { %v524_v47 = vcombine.high %v14_v46, %v14_v46  ;;  %v526_v51 = vcombine.high %v15_v48, %v15_v48  ;;  %v669_v52 = vld [vmem:[%s921_s1 + $0xc4] ss:$8 sps:$4 sm:$0xff]   ;;  %v673_v54 = vld [vmem:[%s921_s1 + $0xc0] ss:$8 sps:$4 sm:$0xff]   ;;  %v677_v57 = vld [vmem:[%s921_s1 + $0x1d4] ss:$8 sps:$4 sm:$0xff]   ;;  %v523_v4 = vcombine.low %v14_v46, %v14_v46  ;;  %v525_v5 = vcombine.low %v15_v48, %v15_v48 }
  0x13   :  { %435 = vmatpush1.bf16.msra.mxu1 %v625_v18  ;;  %v671_v53 = vld [vmem:[%s921_s1 + $0x1c4] ss:$8 sps:$4 sm:$0xff]   ;;  %v674_v55 = vld [vmem:[%s921_s1 + $0x1c0] ss:$8 sps:$4 sm:$0xff]   ;;  %v679_v58 = vld [vmem:[%s921_s1 + $0xd0] ss:$8 sps:$4 sm:$0xff]  }
  0x14   :  { %476 = vmatpush1.bf16.msra.mxu0 %v626_v19  ;;  %436 = vmatprep.subr.bf16.mxu1 %v627_v20  ;;  %v680_v59 = vld [vmem:[%s921_s1 + $0x1d0] ss:$8 sps:$4 sm:$0xff]   ;;  %v681_v60 = vld [vmem:[%s921_s1 + $0xe4] ss:$8 sps:$4 sm:$0xff]   ;;  %v685_v62 = vld [vmem:[%s921_s1 + $0xe0] ss:$8 sps:$4 sm:$0xff]  }
  0x15   :  { %477 = vmatprep.subr.bf16.mxu0 %v629_v21  ;;  %458 = vmatprep.mubr.bf16.mxu1 %v524_v47  ;;  %v683_v61 = vld [vmem:[%s921_s1 + $0x1e4] ss:$8 sps:$4 sm:$0xff]   ;;  %v686_v63 = vld [vmem:[%s921_s1 + $0x1e0] ss:$8 sps:$4 sm:$0xff]   ;;  %v687_v0 = vld [vmem:[%s921_s1 + $0xf4] ss:$8 sps:$4 sm:$0xff]  }
  0x16   :  { %499 = vmatprep.mubr.bf16.mxu0 %v526_v51  ;;  %v689_v1 = vld [vmem:[%s921_s1 + $0x1f4] ss:$8 sps:$4 sm:$0xff]   ;;  %v691_v2 = vld [vmem:[%s921_s1 + $0xf0] ss:$8 sps:$4 sm:$0xff]   ;;  %v84_v8 = vsub.s32 0, %v83_v7  ;;  %v88_v10 = vsub.s32 1, %v83_v7 }
  0x17   :  { %437 = vmatpush1.bf16.msra.mxu1 %v631_v22  ;;  %v692_v3 = vld [vmem:[%s921_s1 + $0x1f0] ss:$8 sps:$4 sm:$0xff]   ;;  %v80_v9 = vld [vmem:[%s923_s2] sm:$0x3] }
  0x18   :  { %478 = vmatpush1.bf16.msra.mxu0 %v632_v23  ;;  %438 = vmatprep.subr.bf16.mxu1 %v633_v24  ;;  %v85_v11 = vrot.slane %v80_v9, %v84_v8  ;;  %v89_v12 = vrot.slane %v80_v9, %v88_v10 }
  0x19   :  { %479 = vmatprep.subr.bf16.mxu0 %v635_v25 }
  0x1b   :  { %439 = vmatpush1.bf16.msra.mxu1 %v637_v26 }
  0x1c   :  { %480 = vmatpush1.bf16.msra.mxu0 %v638_v27  ;;  %440 = vmatprep.subr.bf16.mxu1 %v639_v28 }
  0x1d   :  { %481 = vmatprep.subr.bf16.mxu0 %v641_v29 }
  0x1f   :  { %441 = vmatpush1.bf16.msra.mxu1 %v643_v30 }
  0x20   :  { %482 = vmatpush1.bf16.msra.mxu0 %v644_v31  ;;  %442 = vmatprep.subr.bf16.mxu1 %v645_v32 }
  0x21   :  { %483 = vmatprep.subr.bf16.mxu0 %v647_v33 }
  0x23   :  { %443 = vmatpush1.bf16.msra.mxu1 %v649_v34 }
  0x24   :  { %484 = vmatpush1.bf16.msra.mxu0 %v650_v35  ;;  %444 = vmatprep.subr.bf16.mxu1 %v651_v36 }
  0x25   :  { %485 = vmatprep.subr.bf16.mxu0 %v653_v37 }
  0x27   :  { %445 = vmatpush1.bf16.msra.mxu1 %v655_v38 }
  0x28   :  { %486 = vmatpush1.bf16.msra.mxu0 %v656_v39  ;;  %446 = vmatprep.subr.bf16.mxu1 %v657_v40 }
  0x29   :  { %487 = vmatprep.subr.bf16.mxu0 %v659_v41 }
  0x2b   :  { %447 = vmatpush1.bf16.msra.mxu1 %v661_v42 }
  0x2c   :  { %488 = vmatpush1.bf16.msra.mxu0 %v662_v43  ;;  %448 = vmatprep.subr.bf16.mxu1 %v663_v44 }
  0x2d   :  { %489 = vmatprep.subr.bf16.mxu0 %v665_v45 }
  0x2f   :  { %449 = vmatpush1.bf16.msra.mxu1 %v667_v49 }
  0x30   :  { %490 = vmatpush1.bf16.msra.mxu0 %v668_v50  ;;  %450 = vmatprep.subr.bf16.mxu1 %v669_v52 }
  0x31   :  { %491 = vmatprep.subr.bf16.mxu0 %v671_v53 }
  0x33   :  { %451 = vmatpush1.bf16.msra.mxu1 %v673_v54 }
  0x34   :  { %492 = vmatpush1.bf16.msra.mxu0 %v674_v55  ;;  %452 = vmatprep.subr.bf16.mxu1 %v675_v56 }
  0x35   :  { %493 = vmatprep.subr.bf16.mxu0 %v677_v57 }
  0x37   :  { %453 = vmatpush1.bf16.msra.mxu1 %v679_v58 }
  0x38   :  { %494 = vmatpush1.bf16.msra.mxu0 %v680_v59  ;;  %454 = vmatprep.subr.bf16.mxu1 %v681_v60 }
  0x39   :  { %495 = vmatprep.subr.bf16.mxu0 %v683_v61 }
  0x3b   :  { %455 = vmatpush1.bf16.msra.mxu1 %v685_v62 }
  0x3c   :  { %496 = vmatpush1.bf16.msra.mxu0 %v686_v63  ;;  %456 = vmatprep.subr.bf16.mxu1 %v687_v0 }
  0x3d   :  { %497 = vmatprep.subr.bf16.mxu0 %v689_v1 }
  0x3f   :  { %457 = vmatpush1.bf16.msra.mxu1 %v691_v2 }
  0x40   :  { %498 = vmatpush1.bf16.msra.mxu0 %v692_v3 }
  0x42   :  { %459 = vmatmul.mubr.bf16.vlgmr.msra.gmra.mrb[0].mxu1 %v523_v4 }
  0x43   :  { %500 = vmatmul.mubr.bf16.vlgmr.msra.gmra.mrb[0].mxu0 %v525_v5 }
 0x115   :  { %v460_v13 = vpop.f32.mrb[0].mxu1 }
 0x116   :  { %v501_v14 = vpop.f32.mrb[0].mxu0  ;;  %v461_v15 = vadd.f32 %v460_v13, %v85_v11  ;;  %v462_v16 = vpop.f32.mrb[1].mxu1 }
 0x117   :  { %v503_v17 = vpop.f32.mrb[1].mxu0  ;;  %v463_v18 = vadd.f32 %v462_v16, %v89_v12  ;;  %v464_v19 = vpop.f32.mrb[2].mxu1 }
 0x118   :  { %v505_v20 = vpop.f32.mrb[2].mxu0  ;;  %v502_v21 = vadd.f32 %v501_v14, %v461_v15  ;;  %v465_v22 = vpop.f32.mrb[3].mxu1 }
 0x119   :  { %v506_v23 = vpop.f32.mrb[3].mxu0  ;;  %v504_v24 = vadd.f32 %v503_v17, %v463_v18 }
 0x11a   :  { %v508_v25 = vmax.f32 %v502_v21, 0.0 }
 0x11b   :  { %v509_v26 = vmax.f32 %v504_v24, 0.0 }
 0x11d   :  { %v592_v27 = vpack.c.bf16 %v509_v26, %v508_v25 }
 0x11f   :  { %518 = vst [vmem:[%s924_s3] sm:$0xff] %v592_v27 }

// kernel: auto_vae_forward.10
= control target key start
LH: loop header
LB: loop body
LE: loop exit
PB: predicated region body
PF: predicated region fallthrough
CT: control target
= control target key end

     0   :  { %s446_s1 = inlined_call_operand.vmem [shape: bf16[256,128], index: 1, kind: input, shape index: {}]   ;;  %s447_s0 = inlined_call_operand.vmem [shape: bf16[32,256], index: 0, kind: input, shape index: {}]   ;;  %s448_s2 = inlined_call_operand.vmem [shape: f32[1,128], index: 2, kind: input, shape index: {}]   ;;  %s449_s3 = inlined_call_operand.vmem [shape: bf16[32,128], index: 3, kind: output, shape index: {}]  }
   0x1   :  { %v335_v0 = vld [vmem:[%s446_s1 + $0x40] sm:$0xff]   ;;  %v337_v2 = vld [vmem:[%s446_s1 + $0x48] sm:$0xff]   ;;  %v339_v4 = vld [vmem:[%s446_s1 + $0x50] sm:$0xff]  }
   0x2   :  { %v336_v1 = vld [vmem:[%s446_s1] sm:$0xff]   ;;  %291 = vmatprep.subr.bf16.mxu0 %v335_v0  ;;  %319 = vmatprep.subr.bf16.mxu1 %v335_v0  ;;  %v338_v3 = vld [vmem:[%s446_s1 + $0x8] sm:$0xff]   ;;  %v340_v5 = vld [vmem:[%s446_s1 + $0x10] sm:$0xff]  }
   0x3   :  { %292 = vmatpush3.bf16.msra.mxu0 %v336_v1  ;;  %327 = vmatpush3.bf16.msra.mxu1 %v336_v1  ;;  %v341_v6 = vld [vmem:[%s446_s1 + $0x58] sm:$0xff]   ;;  %v343_v8 = vld [vmem:[%s446_s1 + $0x60] sm:$0xff]   ;;  %v345_v10 = vld [vmem:[%s446_s1 + $0x68] sm:$0xff]  }
   0x4   :  { %293 = vmatprep.subr.bf16.mxu0 %v337_v2  ;;  %320 = vmatprep.subr.bf16.mxu1 %v337_v2  ;;  %v342_v7 = vld [vmem:[%s446_s1 + $0x18] sm:$0xff]   ;;  %v344_v9 = vld [vmem:[%s446_s1 + $0x20] sm:$0xff]   ;;  %v346_v13 = vld [vmem:[%s446_s1 + $0x28] sm:$0xff]  }
   0x5   :  { %v353_v11 = vld [vmem:[%s447_s0 + $0x4] ss:$8 sps:$4 sm:$0xff]   ;;  %v356_v12 = vld [vmem:[%s447_s0 + $0x14] ss:$8 sps:$4 sm:$0xff]   ;;  %v351_v18 = vld [vmem:[%s447_s0] ss:$8 sps:$4 sm:$0xff]  }
   0x6   :  { %v347_v14 = vld [vmem:[%s446_s1 + $0x70] sm:$0xff]   ;;  %206 = vmatprep.mubr.bf16.mxu0 %v353_v11  ;;  %214 = vmatprep.mubr.bf16.mxu1 %v356_v12  ;;  %v349_v16 = vld [vmem:[%s446_s1 + $0x78] sm:$0xff]   ;;  %v251_v22 = vld [vmem:[%s448_s2] ss:$0 sm:$0xff] }
   0x7   :  { %294 = vmatpush3.bf16.msra.mxu0 %v338_v3  ;;  %328 = vmatpush3.bf16.msra.mxu1 %v338_v3  ;;  %v348_v15 = vld [vmem:[%s446_s1 + $0x30] sm:$0xff]   ;;  %v350_v17 = vld [vmem:[%s446_s1 + $0x38] sm:$0xff]  }
   0x8   :  { %295 = vmatprep.subr.bf16.mxu0 %v339_v4  ;;  %321 = vmatprep.subr.bf16.mxu1 %v339_v4  ;;  %v354_v19 = vld [vmem:[%s447_s0 + $0x10] ss:$8 sps:$4 sm:$0xff]  }
   0xb   :  { %296 = vmatpush3.bf16.msra.mxu0 %v340_v5  ;;  %329 = vmatpush3.bf16.msra.mxu1 %v340_v5 }
   0xc   :  { %297 = vmatprep.subr.bf16.mxu0 %v341_v6  ;;  %322 = vmatprep.subr.bf16.mxu1 %v341_v6 }
   0xf   :  { %298 = vmatpush3.bf16.msra.mxu0 %v342_v7  ;;  %330 = vmatpush3.bf16.msra.mxu1 %v342_v7 }
  0x10   :  { %299 = vmatprep.subr.bf16.mxu0 %v343_v8  ;;  %323 = vmatprep.subr.bf16.mxu1 %v343_v8 }
  0x13   :  { %300 = vmatpush3.bf16.msra.mxu0 %v344_v9  ;;  %331 = vmatpush3.bf16.msra.mxu1 %v344_v9 }
  0x14   :  { %301 = vmatprep.subr.bf16.mxu0 %v345_v10  ;;  %324 = vmatprep.subr.bf16.mxu1 %v345_v10 }
  0x17   :  { %302 = vmatpush3.bf16.msra.mxu0 %v346_v13  ;;  %332 = vmatpush3.bf16.msra.mxu1 %v346_v13 }
  0x18   :  { %303 = vmatprep.subr.bf16.mxu0 %v347_v14  ;;  %325 = vmatprep.subr.bf16.mxu1 %v347_v14 }
  0x1b   :  { %304 = vmatpush3.bf16.msra.mxu0 %v348_v15  ;;  %333 = vmatpush3.bf16.msra.mxu1 %v348_v15 }
  0x1c   :  { %305 = vmatprep.subr.bf16.mxu0 %v349_v16  ;;  %326 = vmatprep.subr.bf16.mxu1 %v349_v16 }
  0x1f   :  { %306 = vmatpush3.bf16.msra.mxu0 %v350_v17  ;;  %334 = vmatpush3.bf16.msra.mxu1 %v350_v17 }
  0x22   :  { %207 = vmatmul.mubr.bf16.vlgmr.msra.gmra.mrb[0].mxu0 %v351_v18  ;;  %215 = vmatmul.mubr.bf16.vlgmr.msra.gmra.mrb[0].mxu1 %v354_v19 }
  0xf5   :  { %v307_v20 = vpop.f32.mrb[0].mxu0  ;;  %v313_v21 = vpop.f32.mrb[0].mxu1 }
  0xf6   :  { %v308_v23 = vpop.f32.mrb[1].mxu0  ;;  %v314_v24 = vpop.f32.mrb[1].mxu1 }
  0xf7   :  { %v309_v25 = vadd.f32 %v308_v23, %v307_v20  ;;  %v315_v26 = vadd.f32 %v314_v24, %v313_v21  ;;  %v310_v27 = vpop.f32.mrb[2].mxu0  ;;  %v316_v28 = vpop.f32.mrb[2].mxu1 }
  0xf8   :  { %v311_v29 = vpop.f32.mrb[3].mxu0  ;;  %v317_v30 = vpop.f32.mrb[3].mxu1 }
  0xf9   :  { %v209_v31 = vadd.f32 %v309_v25, %v251_v22  ;;  %v217_v32 = vadd.f32 %v315_v26, %v251_v22  ;;  %v312_v33 = vadd.f32 %v311_v29, %v310_v27  ;;  %v318_v34 = vadd.f32 %v317_v30, %v316_v28 }
  0xfb   :  { %v212_v35 = vadd.f32 %v312_v33, %v251_v22  ;;  %v220_v36 = vadd.f32 %v318_v34, %v251_v22  ;;  %v223_v37 = vmax.f32 %v209_v31, 0.0  ;;  %v225_v38 = vmax.f32 %v217_v32, 0.0 }
  0xfd   :  { %v224_v39 = vmax.f32 %v212_v35, 0.0  ;;  %v226_v40 = vmax.f32 %v220_v36, 0.0 }
  0xff   :  { %v283_v41 = vpack.c.bf16 %v224_v39, %v223_v37  ;;  %v288_v42 = vpack.c.bf16 %v226_v40, %v225_v38 }
 0x101   :  { %284 = vst [vmem:[%s449_s3] sm:$0xff] %v283_v41   ;;  %290 = vst [vmem:[%s449_s3 + $0x8] sm:$0xff] %v288_v42  }

// kernel: auto_vae_forward.11
= control target key start
LH: loop header
LB: loop body
LE: loop exit
PB: predicated region body
PF: predicated region fallthrough
CT: control target
= control target key end

     0   :  { %s483_s1 = inlined_call_operand.vmem [shape: bf16[128,128], index: 1, kind: input, shape index: {}]   ;;  %s484_s0 = inlined_call_operand.vmem [shape: bf16[128,128], index: 0, kind: input, shape index: {}]   ;;  %s485_s2 = inlined_call_operand.vmem [shape: f32[1,128], index: 2, kind: input, shape index: {}]   ;;  %s486_s3 = inlined_call_operand.vmem [shape: f32[128,128], index: 3, kind: output, shape index: {}]  }
   0x1   :  { %v348_v0 = vld [vmem:[%s483_s1] sm:$0xff]   ;;  %v349_v1 = vld [vmem:[%s483_s1 + $0x8] sm:$0xff]   ;;  %v350_v2 = vld [vmem:[%s483_s1 + $0x10] sm:$0xff]  }
   0x2   :  { %300 = vmatprep.subr.bf16.mxu0 %v348_v0  ;;  %332 = vmatprep.subr.bf16.mxu1 %v348_v0  ;;  %v351_v3 = vld [vmem:[%s483_s1 + $0x18] sm:$0xff]   ;;  %v356_v4 = vld [vmem:[%s484_s0] sm:$0xff]   ;;  %v353_v7 = vld [vmem:[%s483_s1 + $0x28] sm:$0xff]  }
   0x3   :  { %301 = vmatpush3.bf16.msra.mxu0 %v348_v0  ;;  %340 = vmatpush3.bf16.msra.mxu1 %v348_v0  ;;  %v357_v5 = vld [vmem:[%s484_s0 + $0x20] sm:$0xff]   ;;  %v354_v8 = vld [vmem:[%s483_s1 + $0x30] sm:$0xff]   ;;  %v355_v9 = vld [vmem:[%s483_s1 + $0x38] sm:$0xff]  }
   0x4   :  { %302 = vmatprep.subr.bf16.mxu0 %v349_v1  ;;  %333 = vmatprep.subr.bf16.mxu1 %v349_v1  ;;  %v352_v6 = vld [vmem:[%s483_s1 + $0x20] sm:$0xff]   ;;  %v358_v10 = vld [vmem:[%s484_s0 + $0x8] sm:$0xff]   ;;  %v360_v12 = vld [vmem:[%s484_s0 + $0x10] sm:$0xff]  }
   0x5   :  { %316 = vmatprep.mubr.bf16.mxu0 %v356_v4  ;;  %324 = vmatprep.mubr.bf16.mxu1 %v357_v5  ;;  %v359_v11 = vld [vmem:[%s484_s0 + $0x28] sm:$0xff]   ;;  %v361_v13 = vld [vmem:[%s484_s0 + $0x30] sm:$0xff]   ;;  %v362_v14 = vld [vmem:[%s484_s0 + $0x18] sm:$0xff]  }
   0x6   :  { %v363_v15 = vld [vmem:[%s484_s0 + $0x38] sm:$0xff]   ;;  %v267_v16 = vld [vmem:[%s485_s2] ss:$0 sm:$0xff] }
   0x7   :  { %303 = vmatpush3.bf16.msra.mxu0 %v349_v1  ;;  %341 = vmatpush3.bf16.msra.mxu1 %v349_v1 }
   0x8   :  { %304 = vmatprep.subr.bf16.mxu0 %v350_v2  ;;  %334 = vmatprep.subr.bf16.mxu1 %v350_v2 }
   0xb   :  { %305 = vmatpush3.bf16.msra.mxu0 %v350_v2  ;;  %342 = vmatpush3.bf16.msra.mxu1 %v350_v2 }
   0xc   :  { %306 = vmatprep.subr.bf16.mxu0 %v351_v3  ;;  %335 = vmatprep.subr.bf16.mxu1 %v351_v3 }
   0xf   :  { %307 = vmatpush3.bf16.msra.mxu0 %v351_v3  ;;  %343 = vmatpush3.bf16.msra.mxu1 %v351_v3 }
  0x10   :  { %308 = vmatprep.subr.bf16.mxu0 %v352_v6  ;;  %336 = vmatprep.subr.bf16.mxu1 %v352_v6 }
  0x13   :  { %309 = vmatpush3.bf16.msra.mxu0 %v352_v6  ;;  %344 = vmatpush3.bf16.msra.mxu1 %v352_v6 }
  0x14   :  { %310 = vmatprep.subr.bf16.mxu0 %v353_v7  ;;  %337 = vmatprep.subr.bf16.mxu1 %v353_v7 }
  0x17   :  { %311 = vmatpush3.bf16.msra.mxu0 %v353_v7  ;;  %345 = vmatpush3.bf16.msra.mxu1 %v353_v7 }
  0x18   :  { %312 = vmatprep.subr.bf16.mxu0 %v354_v8  ;;  %338 = vmatprep.subr.bf16.mxu1 %v354_v8 }
  0x1b   :  { %313 = vmatpush3.bf16.msra.mxu0 %v354_v8  ;;  %346 = vmatpush3.bf16.msra.mxu1 %v354_v8 }
  0x1c   :  { %314 = vmatprep.subr.bf16.mxu0 %v355_v9  ;;  %339 = vmatprep.subr.bf16.mxu1 %v355_v9 }
  0x1f   :  { %315 = vmatpush3.bf16.msra.mxu0 %v355_v9  ;;  %347 = vmatpush3.bf16.msra.mxu1 %v355_v9 }
  0x22   :  { %317 = vmatmul.mubr.bf16.vlgmr.msra.gmra.mrb[0].mxu0 %v358_v10  ;;  %325 = vmatmul.mubr.bf16.vlgmr.msra.gmra.mrb[0].mxu1 %v359_v11 }
  0x23   :  { %320 = vmatprep.mubr.bf16.mxu0 %v360_v12  ;;  %328 = vmatprep.mubr.bf16.mxu1 %v361_v13 }
  0x2a   :  { %321 = vmatmul.mubr.bf16.gmra.mrb[4].mxu0 %v362_v14  ;;  %329 = vmatmul.mubr.bf16.gmra.mrb[4].mxu1 %v363_v15 }
  0xf5   :  { %v318_v17 = vpop.f32.mrb[0].mxu0  ;;  %v326_v18 = vpop.f32.mrb[0].mxu1 }
  0xf6   :  { %v193_v19 = vadd.f32 %v318_v17, %v267_v16  ;;  %v225_v20 = vadd.f32 %v326_v18, %v267_v16  ;;  %v184_v21 = vpop.f32.mrb[1].mxu0  ;;  %v216_v22 = vpop.f32.mrb[1].mxu1 }
  0xf7   :  { %v185_v23 = vadd.f32 %v267_v16, %v184_v21  ;;  %v217_v24 = vadd.f32 %v267_v16, %v216_v22  ;;  %v319_v25 = vpop.f32.mrb[2].mxu0  ;;  %v327_v26 = vpop.f32.mrb[2].mxu1 }
  0xf8   :  { %249 = vst [vmem:[%s486_s3 + $0x10] sm:$0xff] %v193_v19  ;;  %257 = vst [vmem:[%s486_s3 + $0x50] sm:$0xff] %v225_v20  ;;  %v196_v27 = vadd.f32 %v319_v25, %v267_v16  ;;  %v228_v28 = vadd.f32 %v327_v26, %v267_v16  ;;  %v187_v29 = vpop.f32.mrb[3].mxu0  ;;  %v219_v30 = vpop.f32.mrb[3].mxu1 }
  0xf9   :  { %247 = vst [vmem:[%s486_s3] sm:$0xff] %v185_v23  ;;  %255 = vst [vmem:[%s486_s3 + $0x40] sm:$0xff] %v217_v24  ;;  %v188_v31 = vadd.f32 %v267_v16, %v187_v29  ;;  %v220_v32 = vadd.f32 %v267_v16, %v219_v30 }
  0xfa   :  { %250 = vst [vmem:[%s486_s3 + $0x18] sm:$0xff] %v196_v27  ;;  %258 = vst [vmem:[%s486_s3 + $0x58] sm:$0xff] %v228_v28 }
  0xfb   :  { %248 = vst [vmem:[%s486_s3 + $0x8] sm:$0xff] %v188_v31  ;;  %256 = vst [vmem:[%s486_s3 + $0x48] sm:$0xff] %v220_v32 }
  0xfd   :  { %v322_v33 = vpop.f32.mrb[4].mxu0  ;;  %v330_v34 = vpop.f32.mrb[4].mxu1 }
  0xfe   :  { %v209_v35 = vadd.f32 %v322_v33, %v267_v16  ;;  %v241_v36 = vadd.f32 %v330_v34, %v267_v16  ;;  %v200_v37 = vpop.f32.mrb[5].mxu0  ;;  %v232_v38 = vpop.f32.mrb[5].mxu1 }
  0xff   :  { %v201_v39 = vadd.f32 %v267_v16, %v200_v37  ;;  %v233_v40 = vadd.f32 %v267_v16, %v232_v38  ;;  %v323_v41 = vpop.f32.mrb[6].mxu0  ;;  %v331_v42 = vpop.f32.mrb[6].mxu1 }
 0x100   :  { %253 = vst [vmem:[%s486_s3 + $0x30] sm:$0xff] %v209_v35  ;;  %261 = vst [vmem:[%s486_s3 + $0x70] sm:$0xff] %v241_v36  ;;  %v212_v43 = vadd.f32 %v323_v41, %v267_v16  ;;  %v244_v44 = vadd.f32 %v331_v42, %v267_v16  ;;  %v203_v45 = vpop.f32.mrb[7].mxu0  ;;  %v235_v46 = vpop.f32.mrb[7].mxu1 }
 0x101   :  { %251 = vst [vmem:[%s486_s3 + $0x20] sm:$0xff] %v201_v39  ;;  %259 = vst [vmem:[%s486_s3 + $0x60] sm:$0xff] %v233_v40  ;;  %v204_v47 = vadd.f32 %v267_v16, %v203_v45  ;;  %v236_v48 = vadd.f32 %v267_v16, %v235_v46 }
 0x102   :  { %254 = vst [vmem:[%s486_s3 + $0x38] sm:$0xff] %v212_v43  ;;  %262 = vst [vmem:[%s486_s3 + $0x78] sm:$0xff] %v244_v44 }
 0x103   :  { %252 = vst [vmem:[%s486_s3 + $0x28] sm:$0xff] %v204_v47  ;;  %260 = vst [vmem:[%s486_s3 + $0x68] sm:$0xff] %v236_v48 }

// kernel: auto_vae_forward.8
= control target key start
LH: loop header
LB: loop body
LE: loop exit
PB: predicated region body
PF: predicated region fallthrough
CT: control target
= control target key end

     0   :  { %19 = vsyncpa [#allocation3], 0  ;;  %s9310_s0 = inlined_call_operand.vmem [shape: bf16[8,576], index: 0, kind: input, shape index: {}]   ;;  %s9311_s1 = inlined_call_operand.hbm [shape: bf16[576,128], index: 1, kind: input, shape index: {}]   ;;  %s9312_s2 = inlined_call_operand.vmem [shape: f32[1,128], index: 2, kind: input, shape index: {}]   ;;  %s9313_s3 = inlined_call_operand.vmem [shape: bf16[512,1024], index: 3, kind: input, shape index: {}]   ;;  %s9314_s4 = inlined_call_operand.vmem [shape: f32[1,1024], index: 4, kind: input, shape index: {}]   ;;  %s9315_s5 = inlined_call_operand.vmem [shape: bf16[1024,128], index: 5, kind: input, shape index: {}]   ;;  %s9316_s6 = inlined_call_operand.hbm [shape: f32[1,128], index: 6, kind: input, shape index: {}]   ;;  %s9317_s7 = inlined_call_operand.vmem [shape: f32[2,64], index: 7, kind: input, shape index: {}]   ;;  %s9318_s8 = inlined_call_operand.hbm [shape: bf16[64,1024], index: 8, kind: input, shape index: {}]   ;;  %s9319_s9 = inlined_call_operand.vmem [shape: f32[1,1024], index: 9, kind: input, shape index: {}]   ;;  %s9320_s10 = inlined_call_operand.vmem [shape: bf16[1024,512], index: 10, kind: input, shape index: {}]   ;;  %s9321_s11 = inlined_call_operand.vmem [shape: f32[1,512], index: 11, kind: input, shape index: {}]   ;;  %s9322_s12 = inlined_call_operand.vmem [shape: f32[2,128], index: 12, kind: output, shape index: {0}]   ;;  %s9323_s13 = inlined_call_operand.vmem [shape: bf16[2,512], index: 13, kind: output, shape index: {1}]  }
   0x1   :  { %20 = vsyncpa [#allocation5], 0  ;;  %s7255_s25 = smov [#allocation4]   ;;  %s7256_s27 = smov [#allocation2]  }
   0x2   :  { %s49_s26 = sshll.u32 %s7255_s25, 4  ;;  %s28_s28 = sshll.u32 %s7256_s27, 4  ;;  %s50_s26 = int_to_ptr.vmem [resolvable:$true] %s49_s26  ;;  %s7336_s28 = int_to_ptr.vmem [resolvable:$true] %s28_s28 }
   0x3   :  { %s7185_s14 = scalar_lea.hbm %s9316_s6, 16 }
   0x4   :  { %p7186_p0 = scmp.ne.s32.totalorder %s9316_s6, %s7185_s14  ;;  %p7189_p1 = scmp.lt.u32.totalorder %s7185_s14, %s9316_s6 }
   0x6   :  { %p7191_p2 = pnand %p7189_p1, %p7186_p0 }
   0x8   :  { %7194 = shalt.err (!%p7191_p2)
}
   0x9   :  { %s7195_s19 = scalar_lea.vmem %s50_s26, 16  ;;  %s7199_s20 = scalar_lea.vmem %s50_s26, 32 }
   0xa   :  { %p7196_p3 = scmp.ne.s32.totalorder %s50_s26, %s7195_s19  ;;  %p7200_p4 = scmp.lt.s32.totalorder %s50_s26, %s50_s26 }
   0xb   :  { %p7201_p5 = scmp.lt.s32.totalorder %s7199_s20, %s7195_s19 }
   0xd   :  { %p7202_p6 = por %p7201_p5, %p7200_p4 }
   0xf   :  { %p7203_p7 = pnand %p7202_p6, %p7196_p3 }
  0x11   :  { %7206 = shalt.err (!%p7203_p7)
}
  0x12   :  { %52 = dma.hbm_to_vmem [thread:$0]  %s9316_s6, 16, %s50_s26, [#allocation5]  }
  0x13   :  { %s7207_s25 = scalar_lea.hbm %s9311_s1, 4608 }
  0x14   :  { %p7208_p8 = scmp.ne.s32.totalorder %s9311_s1, %s7207_s25  ;;  %p7211_p9 = scmp.lt.u32.totalorder %s7207_s25, %s9311_s1 }
  0x16   :  { %p7213_p10 = pnand %p7211_p9, %p7208_p8 }
  0x18   :  { %7216 = shalt.err (!%p7213_p10)
}
  0x19   :  { %s7217_s15 = scalar_lea.vmem %s7336_s28, 4608  ;;  %p7222_p12 = scmp.lt.s32.totalorder %s7336_s28, %s7336_s28 }
  0x1a   :  { %p7218_p11 = scmp.ne.s32.totalorder %s7336_s28, %s7217_s15  ;;  %p7223_p13 = scmp.lt.s32.totalorder %s7217_s15, %s7217_s15 }
  0x1c   :  { %p7224_p0 = por %p7223_p13, %p7222_p12 }
  0x1e   :  { %p7225_p1 = pnand %p7224_p0, %p7218_p11 }
  0x20   :  { %7228 = shalt.err (!%p7225_p1)
}
  0x21   :  { %s7257_s6 = smov 64   ;;  %s7258_s26 = smov 4  }
  0x22   :  { %34 = dma.hbm_to_vmem [thread:$0]  %s9311_s1, 4608, %s7336_s28, [#allocation3], %s7257_s6, %s7257_s6, %s7258_s26  }
  0x23   :  { %s7259_s18 = smov [#allocation6]   ;;  %s7229_s22 = scalar_lea.hbm %s9318_s8, 4096 }
  0x24   :  { %s60_s19 = sshll.u32 %s7259_s18, 4  ;;  %p7230_p2 = scmp.ne.s32.totalorder %s9318_s8, %s7229_s22  ;;  %s61_s19 = int_to_ptr.vmem [resolvable:$true] %s60_s19 }
  0x25   :  { %p7233_p3 = scmp.lt.u32.totalorder %s7229_s22, %s9318_s8 }
  0x27   :  { %p7235_p4 = pnand %p7233_p3, %p7230_p2 }
  0x29   :  { %7238 = shalt.err (!%p7235_p4)
}
  0x2a   :  { %s7239_s29 = scalar_lea.vmem %s61_s19, 4096  ;;  %p7244_p6 = scmp.lt.s32.totalorder %s61_s19, %s61_s19 }
  0x2b   :  { %p7240_p5 = scmp.ne.s32.totalorder %s61_s19, %s7239_s29  ;;  %p7245_p7 = scmp.lt.s32.totalorder %s7239_s29, %s7239_s29 }
  0x2d   :  { %p7246_p8 = por %p7245_p7, %p7244_p6 }
  0x2f   :  { %p7247_p9 = pnand %p7246_p8, %p7240_p5 }
  0x31   :  { %7250 = shalt.err (!%p7247_p9)
}
  0x32   :  { %s7260_s1 = smov 512   ;;  %s7261_s28 = smov 32  }
  0x33   :  { %66 = dma.hbm_to_vmem [thread:$0]  %s9318_s8, 4096, %s61_s19, [#allocation5], %s7260_s1, %s7260_s1, %s7261_s28  }
  0x34   :  { %7251 = dma.done.wait [#allocation3], 4608  }
  0x35   :  { %7252 = vsyncadd [#allocation3], 4294962688 }
  0x36   :  { %7253 = dma.done.wait [#allocation5], 4112  }
  0x37   :  { %7254 = vsyncadd [#allocation5], 4294963184  ;;  %v6694_v0 = vld [vmem:[#allocation2 + $0x40] sm:$0xff]   ;;  %v6698_v4 = vld [vmem:[#allocation2 + $0x48] sm:$0xff]   ;;  %v7262_v35 = vmov 0.0   ;;  %vm7263_vm0 = vmmov 0  }
  0x38   :  { %v6695_v1 = vld [vmem:[#allocation2] sm:$0xff]   ;;  %6506 = vmatprep.subr.bf16.mxu0 %v6694_v0  ;;  %v6699_v5 = vld [vmem:[#allocation2 + $0x8] sm:$0xff]   ;;  %v6702_v8 = vld [vmem:[#allocation2 + $0x50] sm:$0xff]   ;;  %vm398_vm1 = vcmask 523264  }
  0x39   :  { %v6696_v2 = vld [vmem:[#allocation2 + $0xc0] sm:$0xff]   ;;  %6507 = vmatpush3.bf16.msra.mxu0 %v6695_v1  ;;  %v6700_v6 = vld [vmem:[#allocation2 + $0xc8] sm:$0xff]   ;;  %v6703_v9 = vld [vmem:[#allocation2 + $0x10] sm:$0xff]  }
  0x3a   :  { %v6697_v3 = vld [vmem:[#allocation2 + $0x80] sm:$0xff]   ;;  %6528 = vmatprep.subr.bf16.mxu1 %v6696_v2  ;;  %6508 = vmatprep.subr.bf16.mxu0 %v6698_v4  ;;  %v6701_v7 = vld [vmem:[#allocation2 + $0x88] sm:$0xff]   ;;  %v6704_v10 = vld [vmem:[#allocation2 + $0xd0] sm:$0xff]  }
  0x3b   :  { %6529 = vmatpush3.bf16.msra.mxu1 %v6697_v3  ;;  %v6705_v11 = vld [vmem:[#allocation2 + $0x90] sm:$0xff]   ;;  %v6706_v12 = vld [vmem:[#allocation2 + $0x58] sm:$0xff]   ;;  %v6710_v16 = vld [vmem:[#allocation2 + $0x60] sm:$0xff]  }
  0x3c   :  { %6530 = vmatprep.subr.bf16.mxu1 %v6700_v6  ;;  %v6707_v13 = vld [vmem:[#allocation2 + $0x18] sm:$0xff]   ;;  %v6711_v17 = vld [vmem:[#allocation2 + $0x20] sm:$0xff]   ;;  %v6714_v20 = vld [vmem:[#allocation2 + $0x68] sm:$0xff]  }
  0x3d   :  { %6509 = vmatpush3.bf16.msra.mxu0 %v6699_v5  ;;  %v6708_v14 = vld [vmem:[#allocation2 + $0xd8] sm:$0xff]   ;;  %v6712_v18 = vld [vmem:[#allocation2 + $0xe0] sm:$0xff]   ;;  %v6715_v21 = vld [vmem:[#allocation2 + $0x28] sm:$0xff]  }
  0x3e   :  { %6510 = vmatprep.subr.bf16.mxu0 %v6702_v8  ;;  %v6709_v15 = vld [vmem:[#allocation2 + $0x98] sm:$0xff]   ;;  %v6713_v19 = vld [vmem:[#allocation2 + $0xa0] sm:$0xff]   ;;  %v6716_v22 = vld [vmem:[#allocation2 + $0xe8] sm:$0xff]  }
  0x3f   :  { %6531 = vmatpush3.bf16.msra.mxu1 %v6701_v7  ;;  %v6717_v23 = vld [vmem:[#allocation2 + $0xa8] sm:$0xff]   ;;  %v6718_v24 = vld [vmem:[#allocation2 + $0x70] sm:$0xff]   ;;  %v6722_v28 = vld [vmem:[#allocation2 + $0x78] sm:$0xff]  }
  0x40   :  { %6532 = vmatprep.subr.bf16.mxu1 %v6704_v10  ;;  %v6719_v25 = vld [vmem:[#allocation2 + $0x30] sm:$0xff]   ;;  %v6723_v29 = vld [vmem:[#allocation2 + $0x38] sm:$0xff]   ;;  %v83_v31 = vld [vmem:[%s9310_s0] sm:$0xff] }
  0x41   :  { %6511 = vmatpush3.bf16.msra.mxu0 %v6703_v9  ;;  %v6720_v26 = vld [vmem:[#allocation2 + $0xf0] sm:$0xff]   ;;  %v6724_v30 = vld [vmem:[#allocation2 + $0xf8] sm:$0xff]   ;;  %v5848_v32 = vcombine.low %v83_v31, %v83_v31  ;;  %v5849_v33 = vcombine.high %v83_v31, %v83_v31  ;;  %v84_v36 = vld [vmem:[%s9310_s0 + $0x8] sm:$0xff] }
  0x42   :  { %6512 = vmatprep.subr.bf16.mxu0 %v6706_v12  ;;  %v6721_v27 = vld [vmem:[#allocation2 + $0xb0] sm:$0xff]   ;;  %v6727_v34 = vld [vmem:[#allocation2 + $0xb8] sm:$0xff]   ;;  %v5850_v37 = vcombine.low %v84_v36, %v84_v36  ;;  %v5851_v38 = vcombine.high %v84_v36, %v84_v36  ;;  %v6730_v39 = vld [vmem:[#allocation2 + $0x100] sm:$0xff]  }
  0x43   :  { %6533 = vmatpush3.bf16.msra.mxu1 %v6705_v11  ;;  %434 = vmatprep.mubr.bf16.mxu0 %v5849_v33  ;;  %v6731_v40 = vld [vmem:[#allocation2 + $0x108] sm:$0xff]   ;;  %v588_v41 = vld [vmem:[%s9313_s3 + $0x200] sm:$0xff]  ;;  %v6732_v46 = vld [vmem:[#allocation2 + $0x110] sm:$0xff]  }
  0x44   :  { %6534 = vmatprep.subr.bf16.mxu1 %v6708_v14  ;;  %474 = vmatprep.mubr.bf16.mxu1 %v5851_v38  ;;  %v592_v42 = vld [vmem:[%s9313_s3 + $0x220] sm:$0xff]  ;;  %v589_v48 = vld [vmem:[%s9313_s3 + $0x208] sm:$0xff]  ;;  %v6733_v52 = vld [vmem:[#allocation2 + $0x118] sm:$0xff]  }
  0x45   :  { %6513 = vmatpush3.bf16.msra.mxu0 %v6707_v13  ;;  %v5890_v43 = vcombine.low %v588_v41, %v592_v42  ;;  %v5891_v44 = vcombine.high %v588_v41, %v592_v42  ;;  %v596_v45 = vld [vmem:[%s9313_s3 + $0x240] sm:$0xff]  ;;  %v593_v49 = vld [vmem:[%s9313_s3 + $0x228] sm:$0xff]  ;;  %v6734_v55 = vld [vmem:[%s9310_s0 + $0x10] ss:$0 sps:$4 sm:$0xff]  }
  0x46   :  { %6514 = vmatprep.subr.bf16.mxu0 %v6710_v16  ;;  %v600_v47 = vld [vmem:[%s9313_s3 + $0x260] sm:$0xff]  ;;  %v597_v53 = vld [vmem:[%s9313_s3 + $0x248] sm:$0xff]  ;;  %v5893_v56 = vcombine.high %v589_v48, %v593_v49  ;;  %v5892_v57 = vcombine.low %v589_v48, %v593_v49 }
  0x47   :  { %6535 = vmatpush3.bf16.msra.mxu1 %v6709_v15  ;;  %v5899_v50 = vcombine.high %v596_v45, %v600_v47  ;;  %v5898_v51 = vcombine.low %v596_v45, %v600_v47  ;;  %v601_v54 = vld [vmem:[%s9313_s3 + $0x268] sm:$0xff]  ;;  %v604_v60 = vld [vmem:[%s9313_s3 + $0x280] sm:$0xff]  ;;  %v594_v45 = vld [vmem:[%s9313_s3 + $0x230] sm:$0xff]  ;;  %v7264_v47 = vmov 0  }
  0x48   :  { %6536 = vmatprep.subr.bf16.mxu1 %v6712_v18  ;;  %v5901_v58 = vcombine.high %v597_v53, %v601_v54  ;;  %v5900_v59 = vcombine.low %v597_v53, %v601_v54  ;;  %v608_v61 = vld [vmem:[%s9313_s3 + $0x2a0] sm:$0xff]  ;;  %v605_v62 = vld [vmem:[%s9313_s3 + $0x288] sm:$0xff] }
  0x49   :  { %6515 = vmatpush3.bf16.msra.mxu0 %v6711_v17  ;;  %v5907_v63 = vcombine.high %v604_v60, %v608_v61  ;;  %v609_v0 = vld [vmem:[%s9313_s3 + $0x2a8] sm:$0xff]  ;;  %v5906_v1 = vcombine.low %v604_v60, %v608_v61  ;;  %v612_v4 = vld [vmem:[%s9313_s3 + $0x2c0] sm:$0xff] }
  0x4a   :  { %6516 = vmatprep.subr.bf16.mxu0 %v6714_v20  ;;  %v5908_v2 = vcombine.low %v605_v62, %v609_v0  ;;  %v5909_v3 = vcombine.high %v605_v62, %v609_v0  ;;  %v616_v5 = vld [vmem:[%s9313_s3 + $0x2e0] sm:$0xff]  ;;  %v613_v6 = vld [vmem:[%s9313_s3 + $0x2c8] sm:$0xff] }
  0x4b   :  { %6537 = vmatpush3.bf16.msra.mxu1 %v6713_v19  ;;  %v5915_v7 = vcombine.high %v612_v4, %v616_v5  ;;  %v617_v8 = vld [vmem:[%s9313_s3 + $0x2e8] sm:$0xff]  ;;  %v5914_v9 = vcombine.low %v612_v4, %v616_v5  ;;  %v620_v12 = vld [vmem:[%s9313_s3 + $0x300] sm:$0xff] }
  0x4c   :  { %6538 = vmatprep.subr.bf16.mxu1 %v6716_v22  ;;  %v5916_v10 = vcombine.low %v613_v6, %v617_v8  ;;  %v5917_v11 = vcombine.high %v613_v6, %v617_v8  ;;  %v624_v13 = vld [vmem:[%s9313_s3 + $0x320] sm:$0xff]  ;;  %v621_v14 = vld [vmem:[%s9313_s3 + $0x308] sm:$0xff]  ;;  %v598_v8 = vld [vmem:[%s9313_s3 + $0x250] sm:$0xff] }
  0x4d   :  { %6517 = vmatpush3.bf16.msra.mxu0 %v6715_v21  ;;  %v5922_v15 = vcombine.low %v620_v12, %v624_v13  ;;  %v5923_v16 = vcombine.high %v620_v12, %v624_v13  ;;  %v625_v17 = vld [vmem:[%s9313_s3 + $0x328] sm:$0xff]  ;;  %v628_v18 = vld [vmem:[%s9313_s3 + $0x340] sm:$0xff] }
  0x4e   :  { %6518 = vmatprep.subr.bf16.mxu0 %v6718_v24  ;;  %v632_v19 = vld [vmem:[%s9313_s3 + $0x360] sm:$0xff]  ;;  %v5924_v20 = vcombine.low %v621_v14, %v625_v17  ;;  %v5925_v21 = vcombine.high %v621_v14, %v625_v17  ;;  %v633_v24 = vld [vmem:[%s9313_s3 + $0x368] sm:$0xff]  ;;  %v610_v17 = vld [vmem:[%s9313_s3 + $0x2b0] sm:$0xff] }
  0x4f   :  { %6539 = vmatpush3.bf16.msra.mxu1 %v6717_v23  ;;  %v5931_v22 = vcombine.high %v628_v18, %v632_v19  ;;  %v629_v23 = vld [vmem:[%s9313_s3 + $0x348] sm:$0xff]  ;;  %v644_v36 = vld [vmem:[%s9313_s3 + $0x3c0] sm:$0xff] }
  0x50   :  { %6540 = vmatprep.subr.bf16.mxu1 %v6720_v26  ;;  %v5930_v26 = vcombine.low %v628_v18, %v632_v19  ;;  %v645_v38 = vld [vmem:[%s9313_s3 + $0x3c8] sm:$0xff]  ;;  %v5847_v54 = vld [vmem:[%s9312_s2] ss:$0 sm:$0xff]  ;;  %v607_v18 = vld [vmem:[%s9313_s3 + $0x298] sm:$0xff] }
  0x51   :  { %6519 = vmatpush3.bf16.msra.mxu0 %v6719_v25  ;;  %v5933_v25 = vcombine.high %v629_v23, %v633_v24  ;;  %v611_v19 = vld [vmem:[%s9313_s3 + $0x2b8] sm:$0xff] }
  0x52   :  { %6520 = vmatprep.subr.bf16.mxu0 %v6722_v28  ;;  %v636_v28 = vld [vmem:[%s9313_s3 + $0x380] sm:$0xff] }
  0x53   :  { %6541 = vmatpush3.bf16.msra.mxu1 %v6721_v27  ;;  %v5932_v27 = vcombine.low %v629_v23, %v633_v24  ;;  %v5913_v23 = vcombine.high %v607_v18, %v611_v19  ;;  %v614_v24 = vld [vmem:[%s9313_s3 + $0x2d0] sm:$0xff] }
  0x54   :  { %6542 = vmatprep.subr.bf16.mxu1 %v6724_v30  ;;  %v637_v30 = vld [vmem:[%s9313_s3 + $0x388] sm:$0xff] }
  0x55   :  { %6521 = vmatpush3.bf16.msra.mxu0 %v6723_v29  ;;  %v640_v29 = vld [vmem:[%s9313_s3 + $0x3a0] sm:$0xff] }
  0x56   :  { %6643 = vmatprep.subr.bf16.mxu0 %v7262_v35  ;;  %v5939_v31 = vcombine.high %v636_v28, %v640_v29  ;;  %v5938_v33 = vcombine.low %v636_v28, %v640_v29  ;;  %v5912_v29 = vcombine.low %v607_v18, %v611_v19  ;;  %v540_v19 = vld [vmem:[%s9313_s3 + $0x80] sm:$0xff] }
  0x57   :  { %6543 = vmatpush3.bf16.msra.mxu1 %v6727_v34 }
  0x58   :  { %435 = vmatmul.mubr.bf16.vlgmr.msra.gmra.mrb[0].mxu0 %v5848_v32  ;;  %975 = vmatprep.subr.bf16.mxu1 %v5891_v44  ;;  %v641_v32 = vld [vmem:[%s9313_s3 + $0x3a8] sm:$0xff]  ;;  %v590_v44 = vld [vmem:[%s9313_s3 + $0x210] sm:$0xff] }
  0x59   :  { %6644 = vmatpush3.bf16.msra.mxu0 %v6730_v39  ;;  %6651 = vmatprep.mubr.msk.bf16.mxu0 %vm7263_vm0, %v7262_v35  ;;  %v5940_v34 = vcombine.low %v637_v30, %v641_v32  ;;  %v5894_v48 = vcombine.low %v590_v44, %v594_v45  ;;  %v5895_v49 = vcombine.high %v590_v44, %v594_v45 }
  0x5a   :  { %475 = vmatmul.mubr.bf16.vlgmr.msra.gmra.mrb[0].mxu1 %v5850_v37  ;;  %6645 = vmatprep.subr.bf16.mxu0 %v7262_v35  ;;  %v648_v37 = vld [vmem:[%s9313_s3 + $0x3e0] sm:$0xff] }
  0x5b   :  { %976 = vmatpush1.bf16.msra.mxu1 %v5890_v43  ;;  %v5947_v39 = vcombine.high %v644_v36, %v648_v37  ;;  %v5946_v41 = vcombine.low %v644_v36, %v648_v37  ;;  %1007 = vmatprep.mubr.bf16.mxu1 %v7264_v47 }
  0x5c   :  { %977 = vmatprep.subr.bf16.mxu1 %v5899_v50  ;;  %v595_v50 = vld [vmem:[%s9313_s3 + $0x238] sm:$0xff] }
  0x5d   :  { %6646 = vmatpush3.bf16.msra.mxu0 %v6731_v40  ;;  %v649_v40 = vld [vmem:[%s9313_s3 + $0x3e8] sm:$0xff] }
  0x5e   :  { %6647 = vmatprep.subr.bf16.mxu0 %v7262_v35  ;;  %v5948_v42 = vcombine.low %v645_v38, %v649_v40  ;;  %v5949_v43 = vcombine.high %v645_v38, %v649_v40  ;;  %v630_v40 = vld [vmem:[%s9313_s3 + $0x350] sm:$0xff] }
  0x5f   :  { %978 = vmatpush1.bf16.msra.mxu1 %v5898_v51 }
  0x60   :  { %979 = vmatprep.subr.bf16.mxu1 %v5907_v63 }
  0x61   :  { %6648 = vmatpush3.bf16.msra.mxu0 %v6732_v46  ;;  %v591_v46 = vld [vmem:[%s9313_s3 + $0x218] sm:$0xff] }
  0x62   :  { %6649 = vmatprep.subr.bf16.mxu0 %v7262_v35  ;;  %v5941_v35 = vcombine.high %v637_v30, %v641_v32  ;;  %v5896_v51 = vcombine.low %v591_v46, %v595_v50  ;;  %v622_v32 = vld [vmem:[%s9313_s3 + $0x310] sm:$0xff] }
  0x63   :  { %980 = vmatpush1.bf16.msra.mxu1 %v5906_v1 }
  0x64   :  { %981 = vmatprep.subr.bf16.mxu1 %v5915_v7 }
  0x65   :  { %6650 = vmatpush3.bf16.msra.mxu0 %v6733_v52  ;;  %v5897_v52 = vcombine.high %v591_v46, %v595_v50  ;;  %v642_v50 = vld [vmem:[%s9313_s3 + $0x3b0] sm:$0xff] }
  0x66   :  { %1016 = vmatprep.subr.bf16.mxu0 %v5893_v56 }
  0x67   :  { %982 = vmatpush1.bf16.msra.mxu1 %v5914_v9  ;;  %v602_v9 = vld [vmem:[%s9313_s3 + $0x270] sm:$0xff] }
  0x68   :  { %6652 = vmatmul.mubr.msk.bf16.vlgmr.msra.gmra.mrb[4].mxu0 %vm398_vm1, %v6734_v55  ;;  %983 = vmatprep.subr.bf16.mxu1 %v5923_v16  ;;  %v5903_v14 = vcombine.high %v598_v8, %v602_v9  ;;  %v606_v16 = vld [vmem:[%s9313_s3 + $0x290] sm:$0xff] }
  0x69   :  { %1017 = vmatpush1.bf16.msra.mxu0 %v5892_v57  ;;  %1048 = vmatprep.mubr.bf16.mxu0 %v7264_v47  ;;  %v5910_v28 = vcombine.low %v606_v16, %v610_v17 }
  0x6a   :  { %1018 = vmatprep.subr.bf16.mxu0 %v5901_v58 }
  0x6b   :  { %984 = vmatpush1.bf16.msra.mxu1 %v5922_v15 }
  0x6c   :  { %985 = vmatprep.subr.bf16.mxu1 %v5931_v22  ;;  %v5911_v22 = vcombine.high %v606_v16, %v610_v17 }
  0x6d   :  { %1019 = vmatpush1.bf16.msra.mxu0 %v5900_v59 }
  0x6e   :  { %1020 = vmatprep.subr.bf16.mxu0 %v5909_v3 }
  0x6f   :  { %986 = vmatpush1.bf16.msra.mxu1 %v5930_v26  ;;  %v615_v26 = vld [vmem:[%s9313_s3 + $0x2d8] sm:$0xff] }
  0x70   :  { %987 = vmatprep.subr.bf16.mxu1 %v5939_v31 }
  0x71   :  { %1021 = vmatpush1.bf16.msra.mxu0 %v5908_v2 }
  0x72   :  { %1022 = vmatprep.subr.bf16.mxu0 %v5917_v11  ;;  %v603_v11 = vld [vmem:[%s9313_s3 + $0x278] sm:$0xff] }
  0x73   :  { %988 = vmatpush1.bf16.msra.mxu1 %v5938_v33  ;;  %v626_v33 = vld [vmem:[%s9313_s3 + $0x330] sm:$0xff] }
  0x74   :  { %989 = vmatprep.subr.bf16.mxu1 %v5947_v39  ;;  %v5927_v38 = vcombine.high %v622_v32, %v626_v33  ;;  %v5926_v44 = vcombine.low %v622_v32, %v626_v33 }
  0x75   :  { %1023 = vmatpush1.bf16.msra.mxu0 %v5916_v10  ;;  %v599_v10 = vld [vmem:[%s9313_s3 + $0x258] sm:$0xff] }
  0x76   :  { %1024 = vmatprep.subr.bf16.mxu0 %v5925_v21  ;;  %v5905_v15 = vcombine.high %v599_v10, %v603_v11  ;;  %v5904_v21 = vcombine.low %v599_v10, %v603_v11  ;;  %v536_v10 = vld [vmem:[%s9313_s3 + $0x60] sm:$0xff]  ;;  %v533_v11 = vld [vmem:[%s9313_s3 + $0x48] sm:$0xff] }
  0x77   :  { %990 = vmatpush1.bf16.msra.mxu1 %v5946_v41  ;;  %v634_v41 = vld [vmem:[%s9313_s3 + $0x370] sm:$0xff] }
  0x78   :  { %1057 = vmatprep.subr.bf16.mxu1 %v5895_v49  ;;  %v5935_v46 = vcombine.high %v630_v40, %v634_v41  ;;  %v638_v49 = vld [vmem:[%s9313_s3 + $0x390] sm:$0xff] }
  0x79   :  { %1025 = vmatpush1.bf16.msra.mxu0 %v5924_v20  ;;  %v5902_v20 = vcombine.low %v598_v8, %v602_v9  ;;  %v532_v9 = vld [vmem:[%s9313_s3 + $0x40] sm:$0xff] }
  0x7a   :  { %1026 = vmatprep.subr.bf16.mxu0 %v5933_v25  ;;  %v618_v25 = vld [vmem:[%s9313_s3 + $0x2f0] sm:$0xff]  ;;  %v5963_v17 = vcombine.high %v532_v9, %v536_v10 }
  0x7b   :  { %v5919_v30 = vcombine.high %v614_v24, %v618_v25  ;;  %v5918_v36 = vcombine.low %v614_v24, %v618_v25 }
  0x7d   :  { %1027 = vmatpush1.bf16.msra.mxu0 %v5932_v27  ;;  %v619_v27 = vld [vmem:[%s9313_s3 + $0x2f8] sm:$0xff] }
  0x7e   :  { %1028 = vmatprep.subr.bf16.mxu0 %v5941_v35  ;;  %v5921_v31 = vcombine.high %v615_v26, %v619_v27  ;;  %v627_v35 = vld [vmem:[%s9313_s3 + $0x338] sm:$0xff]  ;;  %v5920_v37 = vcombine.low %v615_v26, %v619_v27  ;;  %v548_v27 = vld [vmem:[%s9313_s3 + $0xc0] sm:$0xff] }
  0x81   :  { %1029 = vmatpush1.bf16.msra.mxu0 %v5940_v34  ;;  %v623_v34 = vld [vmem:[%s9313_s3 + $0x318] sm:$0xff] }
  0x82   :  { %1030 = vmatprep.subr.bf16.mxu0 %v5949_v43  ;;  %v5929_v39 = vcombine.high %v623_v34, %v627_v35  ;;  %v635_v43 = vld [vmem:[%s9313_s3 + $0x378] sm:$0xff]  ;;  %v5928_v45 = vcombine.low %v623_v34, %v627_v35  ;;  %v556_v34 = vld [vmem:[%s9313_s3 + $0x100] sm:$0xff] }
  0x83   :  { %v560_v35 = vld [vmem:[%s9313_s3 + $0x120] sm:$0xff] }
  0x85   :  { %1031 = vmatpush1.bf16.msra.mxu0 %v5948_v42  ;;  %v631_v42 = vld [vmem:[%s9313_s3 + $0x358] sm:$0xff] }
  0x86   :  { %1098 = vmatprep.subr.bf16.mxu0 %v5897_v52  ;;  %v643_v52 = vld [vmem:[%s9313_s3 + $0x3b8] sm:$0xff] }
 0x12b   :  { %v6522_v53 = vpop.f32.mrb[0].mxu0 }
 0x12c   :  { %v6523_v55 = vpop.f32.mrb[1].mxu0 }
 0x12d   :  { %v6524_v56 = vadd.f32 %v6523_v55, %v6522_v53  ;;  %v6525_v57 = vpop.f32.mrb[2].mxu0  ;;  %v6544_v58 = vpop.f32.mrb[0].mxu1  ;;  %v5934_v53 = vcombine.low %v630_v40, %v634_v41  ;;  %v5943_v55 = vcombine.high %v638_v49, %v642_v50  ;;  %v5987_v40 = vcombine.high %v556_v34, %v560_v35 }
 0x12e   :  { %v6526_v59 = vpop.f32.mrb[3].mxu0  ;;  %v6545_v60 = vpop.f32.mrb[1].mxu1  ;;  %v646_v57 = vld [vmem:[%s9313_s3 + $0x3d0] sm:$0xff] }
 0x12f   :  { %v437_v61 = vadd.f32 %v6524_v56, %v5847_v54  ;;  %v6546_v62 = vadd.f32 %v6545_v60, %v6544_v58  ;;  %v6547_v63 = vpop.f32.mrb[2].mxu1  ;;  %v5936_v54 = vcombine.low %v631_v42, %v635_v43  ;;  %v650_v58 = vld [vmem:[%s9313_s3 + $0x3f0] sm:$0xff]  ;;  %v647_v59 = vld [vmem:[%s9313_s3 + $0x3d8] sm:$0xff] }
 0x130   :  { %v6548_v0 = vpop.f32.mrb[3].mxu1  ;;  %v651_v60 = vld [vmem:[%s9313_s3 + $0x3f8] sm:$0xff]  ;;  %v5951_v63 = vcombine.high %v646_v57, %v650_v58 }
 0x131   :  { %v477_v1 = vadd.f32 %v6546_v62, %v437_v61  ;;  %v5942_v61 = vcombine.low %v638_v49, %v642_v50  ;;  %v5953_v0 = vcombine.high %v647_v59, %v651_v60 }
 0x13b   :  { %v516_v2 = vpop.f32.mrb[4].mxu0 }
 0x13c   :  { %v517_v3 = vadd.f32 %v516_v2, %v477_v1  ;;  %v6653_v4 = vpop.f32.mrb[5].mxu0  ;;  %v524_v1 = vld [vmem:[%s9313_s3] sm:$0xff] }
 0x13d   :  { %v519_v5 = vpop.f32.mrb[6].mxu0  ;;  %v528_v2 = vld [vmem:[%s9313_s3 + $0x20] sm:$0xff]  ;;  %v529_v4 = vld [vmem:[%s9313_s3 + $0x28] sm:$0xff] }
 0x13e   :  { %v522_v6 = vmax.f32 %v517_v3, 0.0  ;;  %v6654_v7 = vpop.f32.mrb[7].mxu0  ;;  %v525_v3 = vld [vmem:[%s9313_s3 + $0x8] sm:$0xff]  ;;  %v5950_v5 = vcombine.low %v646_v57, %v650_v58 }
 0x13f   :  { %v5955_v7 = vcombine.high %v524_v1, %v528_v2  ;;  %v5957_v8 = vcombine.high %v525_v3, %v529_v4  ;;  %v5956_v16 = vcombine.low %v525_v3, %v529_v4  ;;  %v526_v3 = vld [vmem:[%s9313_s3 + $0x10] sm:$0xff] }
 0x140   :  { %v7516_v12 = vpack.c.bf16 %v522_v6, %v522_v6  ;;  %v5952_v6 = vcombine.low %v647_v59, %v651_v60  ;;  %v580_v59 = vld [vmem:[%s9313_s3 + $0x1c0] sm:$0xff]  ;;  %v530_v4 = vld [vmem:[%s9313_s3 + $0x30] sm:$0xff] }
 0x141   :  { %v584_v60 = vld [vmem:[%s9313_s3 + $0x1e0] sm:$0xff] }
 0x142   :  { %v7519_v13 = vrot.slane %v7516_v12, 1 }
 0x144   :  { %1008 = vmatmul.mubr.bf16.vlgmr.msra.gmra.mrb[4].mxu1 %v7519_v13  ;;  %1049 = vmatmul.mubr.bf16.vlgmr.msra.gmra.mrb[8].mxu0 %v7519_v13 }
 0x145   :  { %1058 = vmatpush1.bf16.msra.mxu1 %v5894_v48  ;;  %1099 = vmatpush1.bf16.msra.mxu0 %v5896_v51  ;;  %v5937_v48 = vcombine.high %v631_v42, %v635_v43  ;;  %v639_v51 = vld [vmem:[%s9313_s3 + $0x398] sm:$0xff]  ;;  %v564_v42 = vld [vmem:[%s9313_s3 + $0x140] sm:$0xff] }
 0x146   :  { %1059 = vmatprep.subr.bf16.mxu1 %v5903_v14  ;;  %1100 = vmatprep.subr.bf16.mxu0 %v5905_v15  ;;  %v5945_v56 = vcombine.high %v639_v51, %v643_v52  ;;  %v5944_v62 = vcombine.low %v639_v51, %v643_v52  ;;  %v537_v14 = vld [vmem:[%s9313_s3 + $0x68] sm:$0xff]  ;;  %v5954_v15 = vcombine.low %v524_v1, %v528_v2  ;;  %v568_v43 = vld [vmem:[%s9313_s3 + $0x160] sm:$0xff] }
 0x147   :  { %1089 = vmatprep.mubr.bf16.mxu1 %v7264_v47  ;;  %1130 = vmatprep.mubr.bf16.mxu0 %v7264_v47  ;;  %v5965_v18 = vcombine.high %v533_v11, %v537_v14  ;;  %v5964_v24 = vcombine.low %v533_v11, %v537_v14  ;;  %v5995_v49 = vcombine.high %v564_v42, %v568_v43  ;;  %v572_v51 = vld [vmem:[%s9313_s3 + $0x180] sm:$0xff]  ;;  %v534_v11 = vld [vmem:[%s9313_s3 + $0x50] sm:$0xff] }
 0x148   :  { %v576_v52 = vld [vmem:[%s9313_s3 + $0x1a0] sm:$0xff]  ;;  %v6011_v1 = vcombine.high %v580_v59, %v584_v60  ;;  %v538_v14 = vld [vmem:[%s9313_s3 + $0x70] sm:$0xff] }
 0x149   :  { %1060 = vmatpush1.bf16.msra.mxu1 %v5902_v20  ;;  %1101 = vmatpush1.bf16.msra.mxu0 %v5904_v21  ;;  %v544_v20 = vld [vmem:[%s9313_s3 + $0xa0] sm:$0xff]  ;;  %v541_v21 = vld [vmem:[%s9313_s3 + $0x88] sm:$0xff]  ;;  %v6003_v57 = vcombine.high %v572_v51, %v576_v52 }
 0x14a   :  { %1061 = vmatprep.subr.bf16.mxu1 %v5911_v22  ;;  %1102 = vmatprep.subr.bf16.mxu0 %v5913_v23  ;;  %v545_v22 = vld [vmem:[%s9313_s3 + $0xa8] sm:$0xff]  ;;  %v5962_v23 = vcombine.low %v532_v9, %v536_v10  ;;  %v5971_v25 = vcombine.high %v540_v19, %v544_v20  ;;  %v5959_v9 = vcombine.high %v526_v3, %v530_v4 }
 0x14b   :  { %v5973_v26 = vcombine.high %v541_v21, %v545_v22 }
 0x14d   :  { %1062 = vmatpush1.bf16.msra.mxu1 %v5910_v28  ;;  %1103 = vmatpush1.bf16.msra.mxu0 %v5912_v29  ;;  %v552_v28 = vld [vmem:[%s9313_s3 + $0xe0] sm:$0xff]  ;;  %v553_v29 = vld [vmem:[%s9313_s3 + $0xe8] sm:$0xff] }
 0x14e   :  { %1063 = vmatprep.subr.bf16.mxu1 %v5919_v30  ;;  %1104 = vmatprep.subr.bf16.mxu0 %v5921_v31  ;;  %v5970_v30 = vcombine.low %v540_v19, %v544_v20  ;;  %v5972_v31 = vcombine.low %v541_v21, %v545_v22  ;;  %v5979_v32 = vcombine.high %v548_v27, %v552_v28  ;;  %v542_v21 = vld [vmem:[%s9313_s3 + $0x90] sm:$0xff] }
 0x14f   :  { %v5967_v19 = vcombine.high %v534_v11, %v538_v14  ;;  %v546_v22 = vld [vmem:[%s9313_s3 + $0xb0] sm:$0xff] }
 0x151   :  { %1064 = vmatpush1.bf16.msra.mxu1 %v5918_v36  ;;  %1105 = vmatpush1.bf16.msra.mxu0 %v5920_v37  ;;  %v557_v36 = vld [vmem:[%s9313_s3 + $0x108] sm:$0xff] }
 0x152   :  { %1065 = vmatprep.subr.bf16.mxu1 %v5927_v38  ;;  %1106 = vmatprep.subr.bf16.mxu0 %v5929_v39  ;;  %v561_v37 = vld [vmem:[%s9313_s3 + $0x128] sm:$0xff]  ;;  %v5978_v38 = vcombine.low %v548_v27, %v552_v28  ;;  %v5975_v27 = vcombine.high %v542_v21, %v546_v22 }
 0x153   :  { %v5989_v41 = vcombine.high %v557_v36, %v561_v37 }
 0x155   :  { %1066 = vmatpush1.bf16.msra.mxu1 %v5926_v44  ;;  %1107 = vmatpush1.bf16.msra.mxu0 %v5928_v45  ;;  %v565_v44 = vld [vmem:[%s9313_s3 + $0x148] sm:$0xff] }
 0x156   :  { %1067 = vmatprep.subr.bf16.mxu1 %v5935_v46  ;;  %1108 = vmatprep.subr.bf16.mxu0 %v5937_v48  ;;  %v569_v45 = vld [vmem:[%s9313_s3 + $0x168] sm:$0xff]  ;;  %v5986_v46 = vcombine.low %v556_v34, %v560_v35  ;;  %v5988_v48 = vcombine.low %v557_v36, %v561_v37  ;;  %v558_v36 = vld [vmem:[%s9313_s3 + $0x110] sm:$0xff] }
 0x157   :  { %v5997_v50 = vcombine.high %v565_v44, %v569_v45  ;;  %v562_v37 = vld [vmem:[%s9313_s3 + $0x130] sm:$0xff] }
 0x159   :  { %1068 = vmatpush1.bf16.msra.mxu1 %v5934_v53  ;;  %1109 = vmatpush1.bf16.msra.mxu0 %v5936_v54  ;;  %v573_v53 = vld [vmem:[%s9313_s3 + $0x188] sm:$0xff] }
 0x15a   :  { %1069 = vmatprep.subr.bf16.mxu1 %v5943_v55  ;;  %1110 = vmatprep.subr.bf16.mxu0 %v5945_v56  ;;  %v577_v54 = vld [vmem:[%s9313_s3 + $0x1a8] sm:$0xff]  ;;  %v5994_v55 = vcombine.low %v564_v42, %v568_v43  ;;  %v5996_v56 = vcombine.low %v565_v44, %v569_v45  ;;  %v5991_v42 = vcombine.high %v558_v36, %v562_v37  ;;  %v566_v44 = vld [vmem:[%s9313_s3 + $0x150] sm:$0xff] }
 0x15b   :  { %v6005_v58 = vcombine.high %v573_v53, %v577_v54  ;;  %v570_v45 = vld [vmem:[%s9313_s3 + $0x170] sm:$0xff] }
 0x15d   :  { %1070 = vmatpush1.bf16.msra.mxu1 %v5942_v61  ;;  %1111 = vmatpush1.bf16.msra.mxu0 %v5944_v62  ;;  %v581_v61 = vld [vmem:[%s9313_s3 + $0x1c8] sm:$0xff] }
 0x15e   :  { %1071 = vmatprep.subr.bf16.mxu1 %v5951_v63  ;;  %1112 = vmatprep.subr.bf16.mxu0 %v5953_v0  ;;  %v585_v62 = vld [vmem:[%s9313_s3 + $0x1e8] sm:$0xff]  ;;  %v6002_v63 = vcombine.low %v572_v51, %v576_v52  ;;  %v6004_v0 = vcombine.low %v573_v53, %v577_v54  ;;  %v5999_v51 = vcombine.high %v566_v44, %v570_v45  ;;  %v574_v53 = vld [vmem:[%s9313_s3 + $0x190] sm:$0xff] }
 0x15f   :  { %v6013_v2 = vcombine.high %v581_v61, %v585_v62  ;;  %v578_v54 = vld [vmem:[%s9313_s3 + $0x1b0] sm:$0xff] }
 0x161   :  { %1072 = vmatpush1.bf16.msra.mxu1 %v5950_v5  ;;  %1113 = vmatpush1.bf16.msra.mxu0 %v5952_v6  ;;  %v527_v5 = vld [vmem:[%s9313_s3 + $0x18] sm:$0xff] }
 0x162   :  { %1459 = vmatprep.subr.bf16.mxu1 %v5955_v7  ;;  %1500 = vmatprep.subr.bf16.mxu0 %v5957_v8  ;;  %v531_v6 = vld [vmem:[%s9313_s3 + $0x38] sm:$0xff]  ;;  %v6010_v7 = vcombine.low %v580_v59, %v584_v60  ;;  %v6012_v8 = vcombine.low %v581_v61, %v585_v62  ;;  %v6007_v59 = vcombine.high %v574_v53, %v578_v54  ;;  %v582_v61 = vld [vmem:[%s9313_s3 + $0x1d0] sm:$0xff] }
 0x163   :  { %v5961_v10 = vcombine.high %v527_v5, %v531_v6  ;;  %v586_v62 = vld [vmem:[%s9313_s3 + $0x1f0] sm:$0xff] }
 0x164   :  { %1090 = vmatmul.mubr.bf16.vlgmr.msra.gmra.mrb[8].mxu1 %v7519_v13  ;;  %1131 = vmatmul.mubr.bf16.vlgmr.msra.gmra.mrb[12].mxu0 %v7519_v13  ;;  %v549_v13 = vld [vmem:[%s9313_s3 + $0xc8] sm:$0xff] }
 0x165   :  { %1460 = vmatpush1.bf16.msra.mxu1 %v5954_v15  ;;  %1501 = vmatpush1.bf16.msra.mxu0 %v5956_v16  ;;  %v5981_v33 = vcombine.high %v549_v13, %v553_v29  ;;  %v5980_v39 = vcombine.low %v549_v13, %v553_v29  ;;  %v535_v15 = vld [vmem:[%s9313_s3 + $0x58] sm:$0xff]  ;;  %v550_v13 = vld [vmem:[%s9313_s3 + $0xd0] sm:$0xff] }
 0x166   :  { %1461 = vmatprep.subr.bf16.mxu1 %v5963_v17  ;;  %1502 = vmatprep.subr.bf16.mxu0 %v5965_v18  ;;  %v539_v16 = vld [vmem:[%s9313_s3 + $0x78] sm:$0xff]  ;;  %v5958_v17 = vcombine.low %v526_v3, %v530_v4  ;;  %v5960_v18 = vcombine.low %v527_v5, %v531_v6  ;;  %v554_v29 = vld [vmem:[%s9313_s3 + $0xf0] sm:$0xff]  ;;  %v6015_v3 = vcombine.high %v582_v61, %v586_v62  ;;  %v1623_v5 = vld [vmem:[%s9313_s3 + $0x400] sm:$0xff] }
 0x167   :  { %1491 = vmatprep.mubr.bf16.mxu1 %v7264_v47  ;;  %1532 = vmatprep.mubr.bf16.mxu0 %v7264_v47  ;;  %v5969_v20 = vcombine.high %v535_v15, %v539_v16  ;;  %v5983_v34 = vcombine.high %v550_v13, %v554_v29  ;;  %v1627_v6 = vld [vmem:[%s9313_s3 + $0x420] sm:$0xff] }
 0x169   :  { %1462 = vmatpush1.bf16.msra.mxu1 %v5962_v23  ;;  %1503 = vmatpush1.bf16.msra.mxu0 %v5964_v24  ;;  %v543_v23 = vld [vmem:[%s9313_s3 + $0x98] sm:$0xff] }
 0x16a   :  { %1463 = vmatprep.subr.bf16.mxu1 %v5971_v25  ;;  %1504 = vmatprep.subr.bf16.mxu0 %v5973_v26  ;;  %v547_v24 = vld [vmem:[%s9313_s3 + $0xb8] sm:$0xff]  ;;  %v5966_v25 = vcombine.low %v534_v11, %v538_v14  ;;  %v5968_v26 = vcombine.low %v535_v15, %v539_v16  ;;  %v6019_v11 = vcombine.high %v1623_v5, %v1627_v6  ;;  %v1631_v15 = vld [vmem:[%s9313_s3 + $0x440] sm:$0xff] }
 0x16b   :  { %v5977_v28 = vcombine.high %v543_v23, %v547_v24  ;;  %v1635_v16 = vld [vmem:[%s9313_s3 + $0x460] sm:$0xff] }
 0x16d   :  { %1464 = vmatpush1.bf16.msra.mxu1 %v5970_v30  ;;  %1505 = vmatpush1.bf16.msra.mxu0 %v5972_v31  ;;  %v551_v30 = vld [vmem:[%s9313_s3 + $0xd8] sm:$0xff] }
 0x16e   :  { %1465 = vmatprep.subr.bf16.mxu1 %v5979_v32  ;;  %1506 = vmatprep.subr.bf16.mxu0 %v5981_v33  ;;  %v555_v31 = vld [vmem:[%s9313_s3 + $0xf8] sm:$0xff]  ;;  %v5974_v32 = vcombine.low %v542_v21, %v546_v22  ;;  %v5976_v33 = vcombine.low %v543_v23, %v547_v24  ;;  %v6027_v21 = vcombine.high %v1631_v15, %v1635_v16  ;;  %v1639_v23 = vld [vmem:[%s9313_s3 + $0x480] sm:$0xff] }
 0x16f   :  { %v5985_v35 = vcombine.high %v551_v30, %v555_v31  ;;  %v1643_v24 = vld [vmem:[%s9313_s3 + $0x4a0] sm:$0xff] }
 0x171   :  { %1466 = vmatpush1.bf16.msra.mxu1 %v5978_v38  ;;  %1507 = vmatpush1.bf16.msra.mxu0 %v5980_v39  ;;  %v559_v38 = vld [vmem:[%s9313_s3 + $0x118] sm:$0xff] }
 0x172   :  { %1467 = vmatprep.subr.bf16.mxu1 %v5987_v40  ;;  %1508 = vmatprep.subr.bf16.mxu0 %v5989_v41  ;;  %v563_v39 = vld [vmem:[%s9313_s3 + $0x138] sm:$0xff]  ;;  %v5982_v40 = vcombine.low %v550_v13, %v554_v29  ;;  %v5984_v41 = vcombine.low %v551_v30, %v555_v31  ;;  %v6035_v13 = vcombine.high %v1639_v23, %v1643_v24  ;;  %v1647_v30 = vld [vmem:[%s9313_s3 + $0x4c0] sm:$0xff] }
 0x173   :  { %v5993_v43 = vcombine.high %v559_v38, %v563_v39  ;;  %v1651_v31 = vld [vmem:[%s9313_s3 + $0x4e0] sm:$0xff] }
 0x175   :  { %1468 = vmatpush1.bf16.msra.mxu1 %v5986_v46  ;;  %1509 = vmatpush1.bf16.msra.mxu0 %v5988_v48  ;;  %v567_v46 = vld [vmem:[%s9313_s3 + $0x158] sm:$0xff] }
 0x176   :  { %1469 = vmatprep.subr.bf16.mxu1 %v5995_v49  ;;  %1510 = vmatprep.subr.bf16.mxu0 %v5997_v50  ;;  %v571_v48 = vld [vmem:[%s9313_s3 + $0x178] sm:$0xff]  ;;  %v5990_v49 = vcombine.low %v558_v36, %v562_v37  ;;  %v5992_v50 = vcombine.low %v559_v38, %v563_v39  ;;  %v6043_v36 = vcombine.high %v1647_v30, %v1651_v31  ;;  %v1655_v38 = vld [vmem:[%s9313_s3 + $0x500] sm:$0xff] }
 0x177   :  { %v6001_v52 = vcombine.high %v567_v46, %v571_v48  ;;  %v1659_v39 = vld [vmem:[%s9313_s3 + $0x520] sm:$0xff] }
 0x179   :  { %1470 = vmatpush1.bf16.msra.mxu1 %v5994_v55  ;;  %1511 = vmatpush1.bf16.msra.mxu0 %v5996_v56  ;;  %v575_v55 = vld [vmem:[%s9313_s3 + $0x198] sm:$0xff] }
 0x17a   :  { %1471 = vmatprep.subr.bf16.mxu1 %v6003_v57  ;;  %1512 = vmatprep.subr.bf16.mxu0 %v6005_v58  ;;  %v579_v56 = vld [vmem:[%s9313_s3 + $0x1b8] sm:$0xff]  ;;  %v5998_v57 = vcombine.low %v566_v44, %v570_v45  ;;  %v6000_v58 = vcombine.low %v567_v46, %v571_v48  ;;  %v6051_v44 = vcombine.high %v1655_v38, %v1659_v39  ;;  %v1663_v46 = vld [vmem:[%s9313_s3 + $0x540] sm:$0xff] }
 0x17b   :  { %v6009_v60 = vcombine.high %v575_v55, %v579_v56  ;;  %v1667_v48 = vld [vmem:[%s9313_s3 + $0x560] sm:$0xff] }
 0x17d   :  { %1472 = vmatpush1.bf16.msra.mxu1 %v6002_v63  ;;  %1513 = vmatpush1.bf16.msra.mxu0 %v6004_v0  ;;  %v583_v63 = vld [vmem:[%s9313_s3 + $0x1d8] sm:$0xff] }
 0x17e   :  { %1473 = vmatprep.subr.bf16.mxu1 %v6011_v1  ;;  %1514 = vmatprep.subr.bf16.mxu0 %v6013_v2  ;;  %v587_v0 = vld [vmem:[%s9313_s3 + $0x1f8] sm:$0xff]  ;;  %v6006_v1 = vcombine.low %v574_v53, %v578_v54  ;;  %v6008_v2 = vcombine.low %v575_v55, %v579_v56  ;;  %v6059_v53 = vcombine.high %v1663_v46, %v1667_v48  ;;  %v1671_v55 = vld [vmem:[%s9313_s3 + $0x580] sm:$0xff] }
 0x17f   :  { %v6017_v4 = vcombine.high %v583_v63, %v587_v0  ;;  %v1675_v56 = vld [vmem:[%s9313_s3 + $0x5a0] sm:$0xff] }
 0x181   :  { %1474 = vmatpush1.bf16.msra.mxu1 %v6010_v7  ;;  %1515 = vmatpush1.bf16.msra.mxu0 %v6012_v8  ;;  %v1624_v7 = vld [vmem:[%s9313_s3 + $0x408] sm:$0xff] }
 0x182   :  { %1541 = vmatprep.subr.bf16.mxu1 %v5959_v9  ;;  %1582 = vmatprep.subr.bf16.mxu0 %v5961_v10  ;;  %v1628_v8 = vld [vmem:[%s9313_s3 + $0x428] sm:$0xff]  ;;  %v6014_v9 = vcombine.low %v582_v61, %v586_v62  ;;  %v6016_v10 = vcombine.low %v583_v63, %v587_v0  ;;  %v6067_v61 = vcombine.high %v1671_v55, %v1675_v56  ;;  %v1679_v63 = vld [vmem:[%s9313_s3 + $0x5c0] sm:$0xff] }
 0x183   :  { %v6021_v14 = vcombine.high %v1624_v7, %v1628_v8  ;;  %v1683_v0 = vld [vmem:[%s9313_s3 + $0x5e0] sm:$0xff] }
 0x184   :  { %1492 = vmatmul.mubr.bf16.vlgmr.msra.gmra.mrb[12].mxu1 %v7516_v12  ;;  %1533 = vmatmul.mubr.bf16.vlgmr.msra.gmra.mrb[16].mxu0 %v7516_v12 }
 0x185   :  { %1542 = vmatpush1.bf16.msra.mxu1 %v5958_v17  ;;  %1583 = vmatpush1.bf16.msra.mxu0 %v5960_v18  ;;  %v1632_v17 = vld [vmem:[%s9313_s3 + $0x448] sm:$0xff] }
 0x186   :  { %1543 = vmatprep.subr.bf16.mxu1 %v5967_v19  ;;  %1584 = vmatprep.subr.bf16.mxu0 %v5969_v20  ;;  %v1636_v18 = vld [vmem:[%s9313_s3 + $0x468] sm:$0xff]  ;;  %v6018_v19 = vcombine.low %v1623_v5, %v1627_v6  ;;  %v6020_v20 = vcombine.low %v1624_v7, %v1628_v8  ;;  %v6075_v5 = vcombine.high %v1679_v63, %v1683_v0  ;;  %v1625_v7 = vld [vmem:[%s9313_s3 + $0x410] sm:$0xff] }
 0x187   :  { %1573 = vmatprep.mubr.bf16.mxu1 %v7264_v47  ;;  %1614 = vmatprep.mubr.bf16.mxu0 %v7264_v47  ;;  %v6029_v22 = vcombine.high %v1632_v17, %v1636_v18  ;;  %v1629_v8 = vld [vmem:[%s9313_s3 + $0x430] sm:$0xff] }
 0x189   :  { %1544 = vmatpush1.bf16.msra.mxu1 %v5966_v25  ;;  %1585 = vmatpush1.bf16.msra.mxu0 %v5968_v26  ;;  %v1640_v25 = vld [vmem:[%s9313_s3 + $0x488] sm:$0xff] }
 0x18a   :  { %1545 = vmatprep.subr.bf16.mxu1 %v5975_v27  ;;  %1586 = vmatprep.subr.bf16.mxu0 %v5977_v28  ;;  %v1644_v26 = vld [vmem:[%s9313_s3 + $0x4a8] sm:$0xff]  ;;  %v6026_v27 = vcombine.low %v1631_v15, %v1635_v16  ;;  %v6028_v28 = vcombine.low %v1632_v17, %v1636_v18  ;;  %v6023_v15 = vcombine.high %v1625_v7, %v1629_v8  ;;  %v1633_v17 = vld [vmem:[%s9313_s3 + $0x450] sm:$0xff] }
 0x18b   :  { %v6037_v29 = vcombine.high %v1640_v25, %v1644_v26  ;;  %v1637_v18 = vld [vmem:[%s9313_s3 + $0x470] sm:$0xff] }
 0x18d   :  { %1546 = vmatpush1.bf16.msra.mxu1 %v5974_v32  ;;  %1587 = vmatpush1.bf16.msra.mxu0 %v5976_v33  ;;  %v1648_v32 = vld [vmem:[%s9313_s3 + $0x4c8] sm:$0xff] }
 0x18e   :  { %1547 = vmatprep.subr.bf16.mxu1 %v5983_v34  ;;  %1588 = vmatprep.subr.bf16.mxu0 %v5985_v35  ;;  %v1652_v33 = vld [vmem:[%s9313_s3 + $0x4e8] sm:$0xff]  ;;  %v6034_v34 = vcombine.low %v1639_v23, %v1643_v24  ;;  %v6036_v35 = vcombine.low %v1640_v25, %v1644_v26  ;;  %v7922_v23 = vrot.slane %v7516_v12, 2  ;;  %v6031_v24 = vcombine.high %v1633_v17, %v1637_v18  ;;  %v1641_v26 = vld [vmem:[%s9313_s3 + $0x490] sm:$0xff] }
 0x18f   :  { %v6045_v37 = vcombine.high %v1648_v32, %v1652_v33 }
 0x191   :  { %1548 = vmatpush1.bf16.msra.mxu1 %v5982_v40  ;;  %1589 = vmatpush1.bf16.msra.mxu0 %v5984_v41  ;;  %v1656_v40 = vld [vmem:[%s9313_s3 + $0x508] sm:$0xff] }
 0x192   :  { %1549 = vmatprep.subr.bf16.mxu1 %v5991_v42  ;;  %1590 = vmatprep.subr.bf16.mxu0 %v5993_v43  ;;  %v1660_v41 = vld [vmem:[%s9313_s3 + $0x528] sm:$0xff]  ;;  %v6042_v42 = vcombine.low %v1647_v30, %v1651_v31  ;;  %v6044_v43 = vcombine.low %v1648_v32, %v1652_v33  ;;  %v1649_v33 = vld [vmem:[%s9313_s3 + $0x4d0] sm:$0xff] }
 0x193   :  { %v6053_v45 = vcombine.high %v1656_v40, %v1660_v41 }
 0x195   :  { %1550 = vmatpush1.bf16.msra.mxu1 %v5990_v49  ;;  %1591 = vmatpush1.bf16.msra.mxu0 %v5992_v50  ;;  %v1664_v49 = vld [vmem:[%s9313_s3 + $0x548] sm:$0xff] }
 0x196   :  { %1551 = vmatprep.subr.bf16.mxu1 %v5999_v51  ;;  %1592 = vmatprep.subr.bf16.mxu0 %v6001_v52  ;;  %v1668_v50 = vld [vmem:[%s9313_s3 + $0x568] sm:$0xff]  ;;  %v6050_v51 = vcombine.low %v1655_v38, %v1659_v39  ;;  %v6052_v52 = vcombine.low %v1656_v40, %v1660_v41  ;;  %v1657_v41 = vld [vmem:[%s9313_s3 + $0x510] sm:$0xff] }
 0x197   :  { %v6061_v54 = vcombine.high %v1664_v49, %v1668_v50 }
 0x199   :  { %1552 = vmatpush1.bf16.msra.mxu1 %v5998_v57  ;;  %1593 = vmatpush1.bf16.msra.mxu0 %v6000_v58  ;;  %v1672_v57 = vld [vmem:[%s9313_s3 + $0x588] sm:$0xff] }
 0x19a   :  { %1553 = vmatprep.subr.bf16.mxu1 %v6007_v59  ;;  %1594 = vmatprep.subr.bf16.mxu0 %v6009_v60  ;;  %v1676_v58 = vld [vmem:[%s9313_s3 + $0x5a8] sm:$0xff]  ;;  %v6058_v59 = vcombine.low %v1663_v46, %v1667_v48  ;;  %v6060_v60 = vcombine.low %v1664_v49, %v1668_v50  ;;  %v1665_v50 = vld [vmem:[%s9313_s3 + $0x550] sm:$0xff] }
 0x19b   :  { %v6069_v62 = vcombine.high %v1672_v57, %v1676_v58 }
 0x19d   :  { %1554 = vmatpush1.bf16.msra.mxu1 %v6006_v1  ;;  %1595 = vmatpush1.bf16.msra.mxu0 %v6008_v2  ;;  %v1680_v1 = vld [vmem:[%s9313_s3 + $0x5c8] sm:$0xff] }
 0x19e   :  { %1555 = vmatprep.subr.bf16.mxu1 %v6015_v3  ;;  %1596 = vmatprep.subr.bf16.mxu0 %v6017_v4  ;;  %v1684_v2 = vld [vmem:[%s9313_s3 + $0x5e8] sm:$0xff]  ;;  %v6066_v3 = vcombine.low %v1671_v55, %v1675_v56  ;;  %v6068_v4 = vcombine.low %v1672_v57, %v1676_v58  ;;  %v1673_v58 = vld [vmem:[%s9313_s3 + $0x590] sm:$0xff] }
 0x19f   :  { %v6077_v6 = vcombine.high %v1680_v1, %v1684_v2 }
 0x1a1   :  { %1556 = vmatpush1.bf16.msra.mxu1 %v6014_v9  ;;  %1597 = vmatpush1.bf16.msra.mxu0 %v6016_v10  ;;  %v1626_v9 = vld [vmem:[%s9313_s3 + $0x418] sm:$0xff] }
 0x1a2   :  { %2009 = vmatprep.subr.bf16.mxu1 %v6019_v11  ;;  %2050 = vmatprep.subr.bf16.mxu0 %v6021_v14  ;;  %v1630_v10 = vld [vmem:[%s9313_s3 + $0x438] sm:$0xff]  ;;  %v6074_v11 = vcombine.low %v1679_v63, %v1683_v0  ;;  %v6076_v14 = vcombine.low %v1680_v1, %v1684_v2  ;;  %v1681_v2 = vld [vmem:[%s9313_s3 + $0x5d0] sm:$0xff] }
 0x1a3   :  { %v6025_v16 = vcombine.high %v1626_v9, %v1630_v10 }
 0x1a4   :  { %1574 = vmatmul.mubr.bf16.vlgmr.msra.gmra.mrb[16].mxu1 %v7516_v12  ;;  %1615 = vmatmul.mubr.bf16.vlgmr.msra.gmra.mrb[20].mxu0 %v7516_v12 }
 0x1a5   :  { %2010 = vmatpush1.bf16.msra.mxu1 %v6018_v19  ;;  %2051 = vmatpush1.bf16.msra.mxu0 %v6020_v20  ;;  %v1634_v19 = vld [vmem:[%s9313_s3 + $0x458] sm:$0xff] }
 0x1a6   :  { %2011 = vmatprep.subr.bf16.mxu1 %v6027_v21  ;;  %2052 = vmatprep.subr.bf16.mxu0 %v6029_v22  ;;  %v1638_v20 = vld [vmem:[%s9313_s3 + $0x478] sm:$0xff]  ;;  %v6022_v21 = vcombine.low %v1625_v7, %v1629_v8  ;;  %v6024_v22 = vcombine.low %v1626_v9, %v1630_v10  ;;  %v2181_v10 = vld [vmem:[%s9313_s3 + $0x600] sm:$0xff] }
 0x1a7   :  { %2041 = vmatprep.mubr.bf16.mxu1 %v7264_v47  ;;  %2082 = vmatprep.mubr.bf16.mxu0 %v7264_v47  ;;  %v6033_v25 = vcombine.high %v1634_v19, %v1638_v20  ;;  %v6032_v30 = vcombine.low %v1634_v19, %v1638_v20  ;;  %v2189_v20 = vld [vmem:[%s9313_s3 + $0x640] sm:$0xff] }
 0x1a9   :  { %2012 = vmatpush1.bf16.msra.mxu1 %v6026_v27  ;;  %2053 = vmatpush1.bf16.msra.mxu0 %v6028_v28  ;;  %v1645_v27 = vld [vmem:[%s9313_s3 + $0x4b0] sm:$0xff]  ;;  %v1642_v28 = vld [vmem:[%s9313_s3 + $0x498] sm:$0xff] }
 0x1aa   :  { %2013 = vmatprep.subr.bf16.mxu1 %v6035_v13  ;;  %2054 = vmatprep.subr.bf16.mxu0 %v6037_v29  ;;  %v1646_v13 = vld [vmem:[%s9313_s3 + $0x4b8] sm:$0xff]  ;;  %v6030_v29 = vcombine.low %v1633_v17, %v1637_v18  ;;  %v6039_v31 = vcombine.high %v1641_v26, %v1645_v27 }
 0x1ab   :  { %v6041_v32 = vcombine.high %v1642_v28, %v1646_v13  ;;  %v6040_v38 = vcombine.low %v1642_v28, %v1646_v13  ;;  %v2197_v13 = vld [vmem:[%s9313_s3 + $0x680] sm:$0xff] }
 0x1ad   :  { %2014 = vmatpush1.bf16.msra.mxu1 %v6034_v34  ;;  %2055 = vmatpush1.bf16.msra.mxu0 %v6036_v35  ;;  %v1653_v34 = vld [vmem:[%s9313_s3 + $0x4f0] sm:$0xff]  ;;  %v1650_v35 = vld [vmem:[%s9313_s3 + $0x4d8] sm:$0xff] }
 0x1ae   :  { %2015 = vmatprep.subr.bf16.mxu1 %v6043_v36  ;;  %2056 = vmatprep.subr.bf16.mxu0 %v6045_v37  ;;  %v1654_v36 = vld [vmem:[%s9313_s3 + $0x4f8] sm:$0xff]  ;;  %v6038_v37 = vcombine.low %v1641_v26, %v1645_v27  ;;  %v6047_v39 = vcombine.high %v1649_v33, %v1653_v34 }
 0x1af   :  { %v6049_v40 = vcombine.high %v1650_v35, %v1654_v36  ;;  %v6048_v46 = vcombine.low %v1650_v35, %v1654_v36  ;;  %v2205_v36 = vld [vmem:[%s9313_s3 + $0x6c0] sm:$0xff] }
 0x1b1   :  { %2016 = vmatpush1.bf16.msra.mxu1 %v6042_v42  ;;  %2057 = vmatpush1.bf16.msra.mxu0 %v6044_v43  ;;  %v1661_v42 = vld [vmem:[%s9313_s3 + $0x530] sm:$0xff]  ;;  %v1658_v43 = vld [vmem:[%s9313_s3 + $0x518] sm:$0xff] }
 0x1b2   :  { %2017 = vmatprep.subr.bf16.mxu1 %v6051_v44  ;;  %2058 = vmatprep.subr.bf16.mxu0 %v6053_v45  ;;  %v1662_v44 = vld [vmem:[%s9313_s3 + $0x538] sm:$0xff]  ;;  %v6046_v45 = vcombine.low %v1649_v33, %v1653_v34  ;;  %v6055_v48 = vcombine.high %v1657_v41, %v1661_v42 }
 0x1b3   :  { %v6057_v49 = vcombine.high %v1658_v43, %v1662_v44  ;;  %v6056_v55 = vcombine.low %v1658_v43, %v1662_v44  ;;  %v2213_v43 = vld [vmem:[%s9313_s3 + $0x700] sm:$0xff] }
 0x1b4   :  { %v2217_v44 = vld [vmem:[%s9313_s3 + $0x720] sm:$0xff] }
 0x1b5   :  { %2018 = vmatpush1.bf16.msra.mxu1 %v6050_v51  ;;  %2059 = vmatpush1.bf16.msra.mxu0 %v6052_v52  ;;  %v1669_v51 = vld [vmem:[%s9313_s3 + $0x570] sm:$0xff]  ;;  %v1666_v52 = vld [vmem:[%s9313_s3 + $0x558] sm:$0xff] }
 0x1b6   :  { %2019 = vmatprep.subr.bf16.mxu1 %v6059_v53  ;;  %2060 = vmatprep.subr.bf16.mxu0 %v6061_v54  ;;  %v1670_v53 = vld [vmem:[%s9313_s3 + $0x578] sm:$0xff]  ;;  %v6054_v54 = vcombine.low %v1657_v41, %v1661_v42  ;;  %v6063_v56 = vcombine.high %v1665_v50, %v1669_v51 }
 0x1b7   :  { %v6065_v57 = vcombine.high %v1666_v52, %v1670_v53  ;;  %v6064_v63 = vcombine.low %v1666_v52, %v1670_v53  ;;  %v2221_v52 = vld [vmem:[%s9313_s3 + $0x740] sm:$0xff] }
 0x1b8   :  { %v2225_v53 = vld [vmem:[%s9313_s3 + $0x760] sm:$0xff] }
 0x1b9   :  { %2020 = vmatpush1.bf16.msra.mxu1 %v6058_v59  ;;  %2061 = vmatpush1.bf16.msra.mxu0 %v6060_v60  ;;  %v1677_v59 = vld [vmem:[%s9313_s3 + $0x5b0] sm:$0xff]  ;;  %v1674_v60 = vld [vmem:[%s9313_s3 + $0x598] sm:$0xff] }
 0x1ba   :  { %2021 = vmatprep.subr.bf16.mxu1 %v6067_v61  ;;  %2062 = vmatprep.subr.bf16.mxu0 %v6069_v62  ;;  %v1678_v61 = vld [vmem:[%s9313_s3 + $0x5b8] sm:$0xff]  ;;  %v6062_v62 = vcombine.low %v1665_v50, %v1669_v51  ;;  %v6071_v0 = vcombine.high %v1673_v58, %v1677_v59  ;;  %v6115_v50 = vcombine.high %v2213_v43, %v2217_v44 }
 0x1bb   :  { %v6073_v1 = vcombine.high %v1674_v60, %v1678_v61  ;;  %v6072_v7 = vcombine.low %v1674_v60, %v1678_v61  ;;  %v2229_v60 = vld [vmem:[%s9313_s3 + $0x780] sm:$0xff] }
 0x1bc   :  { %v2233_v61 = vld [vmem:[%s9313_s3 + $0x7a0] sm:$0xff] }
 0x1bd   :  { %2022 = vmatpush1.bf16.msra.mxu1 %v6066_v3  ;;  %2063 = vmatpush1.bf16.msra.mxu0 %v6068_v4  ;;  %v1685_v3 = vld [vmem:[%s9313_s3 + $0x5f0] sm:$0xff]  ;;  %v1682_v4 = vld [vmem:[%s9313_s3 + $0x5d8] sm:$0xff] }
 0x1be   :  { %2023 = vmatprep.subr.bf16.mxu1 %v6075_v5  ;;  %2064 = vmatprep.subr.bf16.mxu0 %v6077_v6  ;;  %v1686_v5 = vld [vmem:[%s9313_s3 + $0x5f8] sm:$0xff]  ;;  %v6070_v6 = vcombine.low %v1673_v58, %v1677_v59  ;;  %v6079_v8 = vcombine.high %v1681_v2, %v1685_v3  ;;  %v6123_v58 = vcombine.high %v2221_v52, %v2225_v53 }
 0x1bf   :  { %v6081_v9 = vcombine.high %v1682_v4, %v1686_v5  ;;  %v6080_v17 = vcombine.low %v1682_v4, %v1686_v5  ;;  %v2237_v4 = vld [vmem:[%s9313_s3 + $0x7c0] sm:$0xff] }
 0x1c0   :  { %v2241_v5 = vld [vmem:[%s9313_s3 + $0x7e0] sm:$0xff] }
 0x1c1   :  { %2024 = vmatpush1.bf16.msra.mxu1 %v6074_v11  ;;  %2065 = vmatpush1.bf16.msra.mxu0 %v6076_v14  ;;  %v2185_v11 = vld [vmem:[%s9313_s3 + $0x620] sm:$0xff]  ;;  %v2182_v14 = vld [vmem:[%s9313_s3 + $0x608] sm:$0xff] }
 0x1c2   :  { %2091 = vmatprep.subr.bf16.mxu1 %v6023_v15  ;;  %2132 = vmatprep.subr.bf16.mxu0 %v6025_v16  ;;  %v2186_v15 = vld [vmem:[%s9313_s3 + $0x628] sm:$0xff]  ;;  %v6078_v16 = vcombine.low %v1681_v2, %v1685_v3  ;;  %v6083_v18 = vcombine.high %v2181_v10, %v2185_v11  ;;  %v6131_v2 = vcombine.high %v2229_v60, %v2233_v61 }
 0x1c3   :  { %v6085_v19 = vcombine.high %v2182_v14, %v2186_v15  ;;  %v6084_v26 = vcombine.low %v2182_v14, %v2186_v15  ;;  %v2183_v14 = vld [vmem:[%s9313_s3 + $0x610] sm:$0xff] }
 0x1c4   :  { %2042 = vmatmul.mubr.bf16.vlgmr.msra.gmra.mrb[20].mxu1 %v7922_v23  ;;  %2083 = vmatmul.mubr.bf16.vlgmr.msra.gmra.mrb[24].mxu0 %v7922_v23  ;;  %v2187_v15 = vld [vmem:[%s9313_s3 + $0x630] sm:$0xff] }
 0x1c5   :  { %2092 = vmatpush1.bf16.msra.mxu1 %v6022_v21  ;;  %2133 = vmatpush1.bf16.msra.mxu0 %v6024_v22  ;;  %v2193_v21 = vld [vmem:[%s9313_s3 + $0x660] sm:$0xff]  ;;  %v2190_v22 = vld [vmem:[%s9313_s3 + $0x648] sm:$0xff] }
 0x1c6   :  { %2093 = vmatprep.subr.bf16.mxu1 %v6031_v24  ;;  %2134 = vmatprep.subr.bf16.mxu0 %v6033_v25  ;;  %v2194_v24 = vld [vmem:[%s9313_s3 + $0x668] sm:$0xff]  ;;  %v6082_v25 = vcombine.low %v2181_v10, %v2185_v11  ;;  %v6091_v27 = vcombine.high %v2189_v20, %v2193_v21  ;;  %v6139_v10 = vcombine.high %v2237_v4, %v2241_v5 }
 0x1c7   :  { %2123 = vmatprep.mubr.bf16.mxu1 %v7264_v47  ;;  %2164 = vmatprep.mubr.bf16.mxu0 %v7264_v47  ;;  %v6093_v28 = vcombine.high %v2190_v22, %v2194_v24  ;;  %v6092_v33 = vcombine.low %v2190_v22, %v2194_v24  ;;  %v2191_v22 = vld [vmem:[%s9313_s3 + $0x650] sm:$0xff] }
 0x1c8   :  { %v2195_v24 = vld [vmem:[%s9313_s3 + $0x670] sm:$0xff] }
 0x1c9   :  { %2094 = vmatpush1.bf16.msra.mxu1 %v6030_v29  ;;  %2135 = vmatpush1.bf16.msra.mxu0 %v6032_v30  ;;  %v2201_v29 = vld [vmem:[%s9313_s3 + $0x6a0] sm:$0xff]  ;;  %v2198_v30 = vld [vmem:[%s9313_s3 + $0x688] sm:$0xff] }
 0x1ca   :  { %2095 = vmatprep.subr.bf16.mxu1 %v6039_v31  ;;  %2136 = vmatprep.subr.bf16.mxu0 %v6041_v32  ;;  %v2202_v31 = vld [vmem:[%s9313_s3 + $0x6a8] sm:$0xff]  ;;  %v6090_v32 = vcombine.low %v2189_v20, %v2193_v21  ;;  %v6099_v34 = vcombine.high %v2197_v13, %v2201_v29  ;;  %v6087_v20 = vcombine.high %v2183_v14, %v2187_v15 }
 0x1cb   :  { %v6101_v35 = vcombine.high %v2198_v30, %v2202_v31 }
 0x1cd   :  { %2096 = vmatpush1.bf16.msra.mxu1 %v6038_v37  ;;  %2137 = vmatpush1.bf16.msra.mxu0 %v6040_v38  ;;  %v2209_v37 = vld [vmem:[%s9313_s3 + $0x6e0] sm:$0xff]  ;;  %v2210_v38 = vld [vmem:[%s9313_s3 + $0x6e8] sm:$0xff] }
 0x1ce   :  { %2097 = vmatprep.subr.bf16.mxu1 %v6047_v39  ;;  %2138 = vmatprep.subr.bf16.mxu0 %v6049_v40  ;;  %v6098_v39 = vcombine.low %v2197_v13, %v2201_v29  ;;  %v6100_v40 = vcombine.low %v2198_v30, %v2202_v31  ;;  %v6107_v41 = vcombine.high %v2205_v36, %v2209_v37  ;;  %v8125_v13 = vrot.slane %v7516_v12, 3  ;;  %v2199_v31 = vld [vmem:[%s9313_s3 + $0x690] sm:$0xff]  ;;  %v2204_v12 = vld [vmem:[%s9313_s3 + $0x6b8] sm:$0xff] }
 0x1cf   :  { %v6095_v29 = vcombine.high %v2191_v22, %v2195_v24 }
 0x1d1   :  { %2098 = vmatpush1.bf16.msra.mxu1 %v6046_v45  ;;  %2139 = vmatpush1.bf16.msra.mxu0 %v6048_v46  ;;  %v2214_v45 = vld [vmem:[%s9313_s3 + $0x708] sm:$0xff] }
 0x1d2   :  { %2099 = vmatprep.subr.bf16.mxu1 %v6055_v48  ;;  %2140 = vmatprep.subr.bf16.mxu0 %v6057_v49  ;;  %v2218_v46 = vld [vmem:[%s9313_s3 + $0x728] sm:$0xff]  ;;  %v6106_v48 = vcombine.low %v2205_v36, %v2209_v37 }
 0x1d3   :  { %v6117_v51 = vcombine.high %v2214_v45, %v2218_v46 }
 0x1d5   :  { %2100 = vmatpush1.bf16.msra.mxu1 %v6054_v54  ;;  %2141 = vmatpush1.bf16.msra.mxu0 %v6056_v55  ;;  %v2222_v54 = vld [vmem:[%s9313_s3 + $0x748] sm:$0xff] }
 0x1d6   :  { %2101 = vmatprep.subr.bf16.mxu1 %v6063_v56  ;;  %2142 = vmatprep.subr.bf16.mxu0 %v6065_v57  ;;  %v2226_v55 = vld [vmem:[%s9313_s3 + $0x768] sm:$0xff]  ;;  %v6114_v56 = vcombine.low %v2213_v43, %v2217_v44  ;;  %v6116_v57 = vcombine.low %v2214_v45, %v2218_v46  ;;  %v2215_v45 = vld [vmem:[%s9313_s3 + $0x710] sm:$0xff] }
 0x1d7   :  { %v6125_v59 = vcombine.high %v2222_v54, %v2226_v55  ;;  %v2219_v46 = vld [vmem:[%s9313_s3 + $0x730] sm:$0xff] }
 0x1d9   :  { %2102 = vmatpush1.bf16.msra.mxu1 %v6062_v62  ;;  %2143 = vmatpush1.bf16.msra.mxu0 %v6064_v63  ;;  %v2230_v62 = vld [vmem:[%s9313_s3 + $0x788] sm:$0xff] }
 0x1da   :  { %2103 = vmatprep.subr.bf16.mxu1 %v6071_v0  ;;  %2144 = vmatprep.subr.bf16.mxu0 %v6073_v1  ;;  %v2234_v63 = vld [vmem:[%s9313_s3 + $0x7a8] sm:$0xff]  ;;  %v6122_v0 = vcombine.low %v2221_v52, %v2225_v53  ;;  %v6124_v1 = vcombine.low %v2222_v54, %v2226_v55  ;;  %v6119_v52 = vcombine.high %v2215_v45, %v2219_v46  ;;  %v2223_v54 = vld [vmem:[%s9313_s3 + $0x750] sm:$0xff] }
 0x1db   :  { %v6133_v3 = vcombine.high %v2230_v62, %v2234_v63  ;;  %v2227_v55 = vld [vmem:[%s9313_s3 + $0x770] sm:$0xff] }
 0x1dd   :  { %2104 = vmatpush1.bf16.msra.mxu1 %v6070_v6  ;;  %2145 = vmatpush1.bf16.msra.mxu0 %v6072_v7  ;;  %v2238_v6 = vld [vmem:[%s9313_s3 + $0x7c8] sm:$0xff] }
 0x1de   :  { %2105 = vmatprep.subr.bf16.mxu1 %v6079_v8  ;;  %2146 = vmatprep.subr.bf16.mxu0 %v6081_v9  ;;  %v2242_v7 = vld [vmem:[%s9313_s3 + $0x7e8] sm:$0xff]  ;;  %v6130_v8 = vcombine.low %v2229_v60, %v2233_v61  ;;  %v6132_v9 = vcombine.low %v2230_v62, %v2234_v63  ;;  %v6127_v60 = vcombine.high %v2223_v54, %v2227_v55  ;;  %v2231_v62 = vld [vmem:[%s9313_s3 + $0x790] sm:$0xff] }
 0x1df   :  { %v6141_v11 = vcombine.high %v2238_v6, %v2242_v7  ;;  %v2235_v63 = vld [vmem:[%s9313_s3 + $0x7b0] sm:$0xff] }
 0x1e1   :  { %2106 = vmatpush1.bf16.msra.mxu1 %v6078_v16  ;;  %2147 = vmatpush1.bf16.msra.mxu0 %v6080_v17  ;;  %v2184_v16 = vld [vmem:[%s9313_s3 + $0x618] sm:$0xff] }
 0x1e2   :  { %2567 = vmatprep.subr.bf16.mxu1 %v6083_v18  ;;  %2608 = vmatprep.subr.bf16.mxu0 %v6085_v19  ;;  %v2188_v17 = vld [vmem:[%s9313_s3 + $0x638] sm:$0xff]  ;;  %v6138_v18 = vcombine.low %v2237_v4, %v2241_v5  ;;  %v6140_v19 = vcombine.low %v2238_v6, %v2242_v7  ;;  %v6135_v4 = vcombine.high %v2231_v62, %v2235_v63  ;;  %v2239_v6 = vld [vmem:[%s9313_s3 + $0x7d0] sm:$0xff] }
 0x1e3   :  { %v6089_v21 = vcombine.high %v2184_v16, %v2188_v17 }
 0x1e4   :  { %2124 = vmatmul.mubr.bf16.vlgmr.msra.gmra.mrb[24].mxu1 %v7922_v23  ;;  %2165 = vmatmul.mubr.bf16.vlgmr.msra.gmra.mrb[28].mxu0 %v7922_v23  ;;  %v2206_v23 = vld [vmem:[%s9313_s3 + $0x6c8] sm:$0xff] }
 0x1e5   :  { %2568 = vmatpush1.bf16.msra.mxu1 %v6082_v25  ;;  %2609 = vmatpush1.bf16.msra.mxu0 %v6084_v26  ;;  %v6109_v42 = vcombine.high %v2206_v23, %v2210_v38  ;;  %v6108_v49 = vcombine.low %v2206_v23, %v2210_v38  ;;  %v2192_v25 = vld [vmem:[%s9313_s3 + $0x658] sm:$0xff]  ;;  %v2207_v23 = vld [vmem:[%s9313_s3 + $0x6d0] sm:$0xff] }
 0x1e6   :  { %2569 = vmatprep.subr.bf16.mxu1 %v6091_v27  ;;  %2610 = vmatprep.subr.bf16.mxu0 %v6093_v28  ;;  %v2196_v26 = vld [vmem:[%s9313_s3 + $0x678] sm:$0xff]  ;;  %v6086_v27 = vcombine.low %v2183_v14, %v2187_v15  ;;  %v6088_v28 = vcombine.low %v2184_v16, %v2188_v17  ;;  %v2211_v38 = vld [vmem:[%s9313_s3 + $0x6f0] sm:$0xff] }
 0x1e7   :  { %2599 = vmatprep.mubr.bf16.mxu1 %v7264_v47  ;;  %2640 = vmatprep.mubr.bf16.mxu0 %v7264_v47  ;;  %v6097_v30 = vcombine.high %v2192_v25, %v2196_v26  ;;  %v6111_v43 = vcombine.high %v2207_v23, %v2211_v38 }
 0x1e9   :  { %2570 = vmatpush1.bf16.msra.mxu1 %v6090_v32  ;;  %2611 = vmatpush1.bf16.msra.mxu0 %v6092_v33  ;;  %v2203_v32 = vld [vmem:[%s9313_s3 + $0x6b0] sm:$0xff]  ;;  %v2200_v33 = vld [vmem:[%s9313_s3 + $0x698] sm:$0xff] }
 0x1ea   :  { %2571 = vmatprep.subr.bf16.mxu1 %v6099_v34  ;;  %2612 = vmatprep.subr.bf16.mxu0 %v6101_v35  ;;  %v6094_v34 = vcombine.low %v2191_v22, %v2195_v24  ;;  %v6096_v35 = vcombine.low %v2192_v25, %v2196_v26  ;;  %v6103_v36 = vcombine.high %v2199_v31, %v2203_v32 }
 0x1eb   :  { %v6105_v37 = vcombine.high %v2200_v33, %v2204_v12 }
 0x1ed   :  { %2572 = vmatpush1.bf16.msra.mxu1 %v6098_v39  ;;  %2613 = vmatpush1.bf16.msra.mxu0 %v6100_v40  ;;  %v2208_v39 = vld [vmem:[%s9313_s3 + $0x6d8] sm:$0xff] }
 0x1ee   :  { %2573 = vmatprep.subr.bf16.mxu1 %v6107_v41  ;;  %2614 = vmatprep.subr.bf16.mxu0 %v6109_v42  ;;  %v2212_v40 = vld [vmem:[%s9313_s3 + $0x6f8] sm:$0xff]  ;;  %v6102_v41 = vcombine.low %v2199_v31, %v2203_v32  ;;  %v6104_v42 = vcombine.low %v2200_v33, %v2204_v12 }
 0x1ef   :  { %v6113_v44 = vcombine.high %v2208_v39, %v2212_v40 }
 0x1f1   :  { %2574 = vmatpush1.bf16.msra.mxu1 %v6106_v48  ;;  %2615 = vmatpush1.bf16.msra.mxu0 %v6108_v49  ;;  %v2216_v48 = vld [vmem:[%s9313_s3 + $0x718] sm:$0xff] }
 0x1f2   :  { %2575 = vmatprep.subr.bf16.mxu1 %v6115_v50  ;;  %2616 = vmatprep.subr.bf16.mxu0 %v6117_v51  ;;  %v2220_v49 = vld [vmem:[%s9313_s3 + $0x738] sm:$0xff]  ;;  %v6110_v50 = vcombine.low %v2207_v23, %v2211_v38  ;;  %v6112_v51 = vcombine.low %v2208_v39, %v2212_v40  ;;  %v6740_v23 = vld [vmem:[%s9315_s5 + $0xc8] sm:$0xff]   ;;  %v6743_v40 = vld [vmem:[%s9315_s5 + $0x50] sm:$0xff]  }
 0x1f3   :  { %v6121_v53 = vcombine.high %v2216_v48, %v2220_v49  ;;  %v6741_v38 = vld [vmem:[%s9315_s5 + $0x8] sm:$0xff]  }
 0x1f4   :  { %v6742_v39 = vld [vmem:[%s9315_s5 + $0x88] sm:$0xff]  }
 0x1f5   :  { %2576 = vmatpush1.bf16.msra.mxu1 %v6114_v56  ;;  %2617 = vmatpush1.bf16.msra.mxu0 %v6116_v57  ;;  %v2224_v56 = vld [vmem:[%s9313_s3 + $0x758] sm:$0xff] }
 0x1f6   :  { %2577 = vmatprep.subr.bf16.mxu1 %v6123_v58  ;;  %2618 = vmatprep.subr.bf16.mxu0 %v6125_v59  ;;  %v2228_v57 = vld [vmem:[%s9313_s3 + $0x778] sm:$0xff]  ;;  %v6118_v58 = vcombine.low %v2215_v45, %v2219_v46  ;;  %v6120_v59 = vcombine.low %v2216_v48, %v2220_v49  ;;  %v6751_v49 = vld [vmem:[%s9315_s5 + $0x60] sm:$0xff]  }
 0x1f7   :  { %v6129_v61 = vcombine.high %v2224_v56, %v2228_v57  ;;  %v6748_v45 = vld [vmem:[%s9315_s5 + $0xd8] sm:$0xff]  }
 0x1f8   :  { %v6749_v46 = vld [vmem:[%s9315_s5 + $0x18] sm:$0xff]  }
 0x1f9   :  { %2578 = vmatpush1.bf16.msra.mxu1 %v6122_v0  ;;  %2619 = vmatpush1.bf16.msra.mxu0 %v6124_v1  ;;  %v2232_v0 = vld [vmem:[%s9313_s3 + $0x798] sm:$0xff] }
 0x1fa   :  { %2579 = vmatprep.subr.bf16.mxu1 %v6131_v2  ;;  %2620 = vmatprep.subr.bf16.mxu0 %v6133_v3  ;;  %v2236_v1 = vld [vmem:[%s9313_s3 + $0x7b8] sm:$0xff]  ;;  %v6126_v2 = vcombine.low %v2223_v54, %v2227_v55  ;;  %v6128_v3 = vcombine.low %v2224_v56, %v2228_v57  ;;  %v6756_v54 = vld [vmem:[%s9315_s5 + $0xe8] sm:$0xff]  }
 0x1fb   :  { %v6137_v5 = vcombine.high %v2232_v0, %v2236_v1  ;;  %v6750_v48 = vld [vmem:[%s9315_s5 + $0x98] sm:$0xff]   ;;  %v6757_v55 = vld [vmem:[%s9315_s5 + $0x28] sm:$0xff]  }
 0x1fc   :  { %v6758_v56 = vld [vmem:[%s9315_s5 + $0xa8] sm:$0xff]  }
 0x1fd   :  { %2580 = vmatpush1.bf16.msra.mxu1 %v6130_v8  ;;  %2621 = vmatpush1.bf16.msra.mxu0 %v6132_v9  ;;  %v2243_v9 = vld [vmem:[%s9313_s3 + $0x7f0] sm:$0xff] }
 0x1fe   :  { %2581 = vmatprep.subr.bf16.mxu1 %v6139_v10  ;;  %2622 = vmatprep.subr.bf16.mxu0 %v6141_v11  ;;  %v2240_v10 = vld [vmem:[%s9313_s3 + $0x7d8] sm:$0xff]  ;;  %v6143_v22 = vcombine.high %v2239_v6, %v2243_v9  ;;  %v6142_v25 = vcombine.low %v2239_v6, %v2243_v9  ;;  %v6762_v6 = vld [vmem:[%s9315_s5 + $0xb0] sm:$0xff]  }
 0x1ff   :  { %v2244_v11 = vld [vmem:[%s9313_s3 + $0x7f8] sm:$0xff] }
 0x200   :  { %v6145_v24 = vcombine.high %v2240_v10, %v2244_v11  ;;  %v6144_v26 = vcombine.low %v2240_v10, %v2244_v11  ;;  %v6763_v9 = vld [vmem:[%s9315_s5 + $0x78] sm:$0xff]  }
 0x201   :  { %2582 = vmatpush1.bf16.msra.mxu1 %v6138_v18  ;;  %2623 = vmatpush1.bf16.msra.mxu0 %v6140_v19  ;;  %v6134_v18 = vcombine.low %v2231_v62, %v2235_v63  ;;  %v6136_v19 = vcombine.low %v2232_v0, %v2236_v1  ;;  %v6759_v63 = vld [vmem:[%s9315_s5 + $0x70] sm:$0xff]   ;;  %v6764_v10 = vld [vmem:[%s9315_s5 + $0xf8] sm:$0xff]  }
 0x202   :  { %2649 = vmatprep.subr.bf16.mxu1 %v6087_v20  ;;  %2690 = vmatprep.subr.bf16.mxu0 %v6089_v21  ;;  %v6760_v0 = vld [vmem:[%s9315_s5 + $0xf0] sm:$0xff]   ;;  %v6765_v11 = vld [vmem:[%s9315_s5 + $0x38] sm:$0xff]  }
 0x204   :  { %2600 = vmatmul.mubr.bf16.vlgmr.msra.gmra.mrb[28].mxu1 %v8125_v13  ;;  %2641 = vmatmul.mubr.bf16.vlgmr.msra.gmra.mrb[32].mxu0 %v8125_v13 }
 0x205   :  { %2650 = vmatpush1.bf16.msra.mxu1 %v6086_v27  ;;  %2691 = vmatpush1.bf16.msra.mxu0 %v6088_v28 }
 0x206   :  { %2651 = vmatprep.subr.bf16.mxu1 %v6095_v29  ;;  %2692 = vmatprep.subr.bf16.mxu0 %v6097_v30 }
 0x207   :  { %2681 = vmatprep.mubr.bf16.mxu1 %v7264_v47  ;;  %2722 = vmatprep.mubr.bf16.mxu0 %v7264_v47 }
 0x209   :  { %2652 = vmatpush1.bf16.msra.mxu1 %v6094_v34  ;;  %2693 = vmatpush1.bf16.msra.mxu0 %v6096_v35  ;;  %v6735_v34 = vld [vmem:[%s9315_s5 + $0x40] sm:$0xff]  }
 0x20a   :  { %2653 = vmatprep.subr.bf16.mxu1 %v6103_v36  ;;  %2694 = vmatprep.subr.bf16.mxu0 %v6105_v37  ;;  %v6737_v35 = vld [vmem:[%s9315_s5] sm:$0xff]   ;;  %v6739_v37 = vld [vmem:[%s9315_s5 + $0x48] sm:$0xff]  }
 0x20b   :  { %v6738_v36 = vld [vmem:[%s9315_s5 + $0x80] sm:$0xff]  }
 0x20d   :  { %2654 = vmatpush1.bf16.msra.mxu1 %v6102_v41  ;;  %2695 = vmatpush1.bf16.msra.mxu0 %v6104_v42  ;;  %v6744_v41 = vld [vmem:[%s9315_s5 + $0xd0] sm:$0xff]  }
 0x20e   :  { %2655 = vmatprep.subr.bf16.mxu1 %v6111_v43  ;;  %2696 = vmatprep.subr.bf16.mxu0 %v6113_v44  ;;  %v6745_v42 = vld [vmem:[%s9315_s5 + $0x10] sm:$0xff]   ;;  %v6747_v44 = vld [vmem:[%s9315_s5 + $0x58] sm:$0xff]  }
 0x20f   :  { %v6746_v43 = vld [vmem:[%s9315_s5 + $0x90] sm:$0xff]  }
 0x211   :  { %2656 = vmatpush1.bf16.msra.mxu1 %v6110_v50  ;;  %2697 = vmatpush1.bf16.msra.mxu0 %v6112_v51  ;;  %v6752_v50 = vld [vmem:[%s9315_s5 + $0xe0] sm:$0xff]  }
 0x212   :  { %2657 = vmatprep.subr.bf16.mxu1 %v6119_v52  ;;  %2698 = vmatprep.subr.bf16.mxu0 %v6121_v53  ;;  %v6753_v51 = vld [vmem:[%s9315_s5 + $0x20] sm:$0xff]   ;;  %v6755_v53 = vld [vmem:[%s9315_s5 + $0x68] sm:$0xff]  }
 0x213   :  { %v6754_v52 = vld [vmem:[%s9315_s5 + $0xa0] sm:$0xff]  }
 0x215   :  { %2658 = vmatpush1.bf16.msra.mxu1 %v6118_v58  ;;  %2699 = vmatpush1.bf16.msra.mxu0 %v6120_v59 }
 0x216   :  { %2659 = vmatprep.subr.bf16.mxu1 %v6127_v60  ;;  %2700 = vmatprep.subr.bf16.mxu0 %v6129_v61 }
 0x217   :  { %v8194_v7 = vpop.f32.mrb[4].mxu1  ;;  %v8196_v8 = vpop.f32.mrb[8].mxu0 }
 0x218   :  { %v8207_v14 = vpop.f32.mrb[5].mxu1  ;;  %v8209_v15 = vpop.f32.mrb[9].mxu0 }
 0x219   :  { %2660 = vmatpush1.bf16.msra.mxu1 %v6126_v2  ;;  %2701 = vmatpush1.bf16.msra.mxu0 %v6128_v3  ;;  %v1013_v16 = vpop.f32.mrb[6].mxu1  ;;  %v1054_v17 = vpop.f32.mrb[10].mxu0 }
 0x21a   :  { %v1014_v20 = vpop.f32.mrb[7].mxu1  ;;  %v1055_v21 = vpop.f32.mrb[11].mxu0  ;;  %2661 = vmatprep.subr.bf16.mxu1 %v6135_v4  ;;  %2702 = vmatprep.subr.bf16.mxu0 %v6137_v5  ;;  %v6761_v5 = vld [vmem:[%s9315_s5 + $0x30] sm:$0xff]   ;;  %v6768_v16 = vld [vmem:[%s9315_s5 + $0x1c0] sm:$0xff]  }
 0x21d   :  { %2662 = vmatpush1.bf16.msra.mxu1 %v6134_v18  ;;  %2703 = vmatpush1.bf16.msra.mxu0 %v6136_v19 }
 0x21e   :  { %2663 = vmatprep.subr.bf16.mxu1 %v6143_v22  ;;  %2704 = vmatprep.subr.bf16.mxu0 %v6145_v24 }
 0x221   :  { %2664 = vmatpush1.bf16.msra.mxu1 %v6142_v25  ;;  %2705 = vmatpush1.bf16.msra.mxu0 %v6144_v26 }
 0x222   :  { %6555 = vmatprep.subr.bf16.mxu1 %v6735_v34 }
 0x224   :  { %2682 = vmatmul.mubr.bf16.vlgmr.msra.gmra.mrb[32].mxu1 %v8125_v13  ;;  %2723 = vmatmul.mubr.bf16.vlgmr.msra.gmra.mrb[36].mxu0 %v8125_v13  ;;  %v6736_v13 = vld [vmem:[%s9315_s5 + $0xc0] sm:$0xff]  }
 0x225   :  { %6577 = vmatprep.subr.bf16.mxu0 %v6736_v13  ;;  %6556 = vmatpush3.bf16.msra.mxu1 %v6737_v35 }
 0x226   :  { %6578 = vmatpush3.bf16.msra.mxu0 %v6738_v36  ;;  %6557 = vmatprep.subr.bf16.mxu1 %v6739_v37 }
 0x227   :  { %6579 = vmatprep.subr.bf16.mxu0 %v6740_v23 }
 0x229   :  { %6558 = vmatpush3.bf16.msra.mxu1 %v6741_v38 }
 0x22a   :  { %6580 = vmatpush3.bf16.msra.mxu0 %v6742_v39  ;;  %6559 = vmatprep.subr.bf16.mxu1 %v6743_v40 }
 0x22b   :  { %6581 = vmatprep.subr.bf16.mxu0 %v6744_v41 }
 0x22d   :  { %6560 = vmatpush3.bf16.msra.mxu1 %v6745_v42 }
 0x22e   :  { %6582 = vmatpush3.bf16.msra.mxu0 %v6746_v43  ;;  %6561 = vmatprep.subr.bf16.mxu1 %v6747_v44 }
 0x22f   :  { %6583 = vmatprep.subr.bf16.mxu0 %v6748_v45 }
 0x231   :  { %6562 = vmatpush3.bf16.msra.mxu1 %v6749_v46 }
 0x232   :  { %6584 = vmatpush3.bf16.msra.mxu0 %v6750_v48  ;;  %6563 = vmatprep.subr.bf16.mxu1 %v6751_v49 }
 0x233   :  { %6585 = vmatprep.subr.bf16.mxu0 %v6752_v50 }
 0x235   :  { %6564 = vmatpush3.bf16.msra.mxu1 %v6753_v51 }
 0x236   :  { %6586 = vmatpush3.bf16.msra.mxu0 %v6754_v52  ;;  %6565 = vmatprep.subr.bf16.mxu1 %v6755_v53  ;;  %v2741_v52 = vlaneseq }
 0x237   :  { %v8213_v27 = vpop.f32.mrb[8].mxu1  ;;  %v8215_v28 = vpop.f32.mrb[12].mxu0  ;;  %6587 = vmatprep.subr.bf16.mxu0 %v6756_v54 }
 0x238   :  { %v8217_v29 = vpop.f32.mrb[9].mxu1  ;;  %v8219_v30 = vpop.f32.mrb[13].mxu0  ;;  %v8339_v53 = vshrl.u32 %v2741_v52, 7 }
 0x239   :  { %v1095_v31 = vpop.f32.mrb[10].mxu1  ;;  %v1136_v32 = vpop.f32.mrb[14].mxu0  ;;  %6566 = vmatpush3.bf16.msra.mxu1 %v6757_v55 }
 0x23a   :  { %v1096_v33 = vpop.f32.mrb[11].mxu1  ;;  %v1137_v12 = vpop.f32.mrb[15].mxu0  ;;  %6588 = vmatpush3.bf16.msra.mxu0 %v6758_v56  ;;  %6567 = vmatprep.subr.bf16.mxu1 %v6759_v63  ;;  %v8342_v54 = vsub.s32 0, %v8339_v53  ;;  %v8345_v55 = vsub.s32 2, %v8339_v53  ;;  %v8350_v56 = vld [vmem:[%s9314_s4] sm:$0xff]  ;;  %v2763_v52 = vsub.s32 5, %v8339_v53 }
 0x23b   :  { %6589 = vmatprep.subr.bf16.mxu0 %v6760_v0 }
 0x23d   :  { %6568 = vmatpush3.bf16.msra.mxu1 %v6761_v5 }
 0x23e   :  { %6590 = vmatpush3.bf16.msra.mxu0 %v6762_v6  ;;  %6569 = vmatprep.subr.bf16.mxu1 %v6763_v9 }
 0x23f   :  { %6591 = vmatprep.subr.bf16.mxu0 %v6764_v10 }
 0x241   :  { %6570 = vmatpush3.bf16.msra.mxu1 %v6765_v11 }
 0x257   :  { %v1493_v57 = vpop.f32.mrb[12].mxu1  ;;  %v1534_v58 = vpop.f32.mrb[16].mxu0 }
 0x258   :  { %v1494_v59 = vadd.f32 %v1493_v57, %v8194_v7  ;;  %v1535_v60 = vadd.f32 %v1534_v58, %v8196_v8  ;;  %v1495_v61 = vpop.f32.mrb[13].mxu1  ;;  %v1536_v62 = vpop.f32.mrb[17].mxu0  ;;  %v8353_v57 = vsub.s32 1, %v8339_v53  ;;  %v8356_v58 = vsub.s32 3, %v8339_v53 }
 0x259   :  { %v1496_v1 = vadd.f32 %v1495_v61, %v8207_v14  ;;  %v1537_v2 = vadd.f32 %v1536_v62, %v8209_v15  ;;  %v1497_v3 = vpop.f32.mrb[14].mxu1  ;;  %v1538_v4 = vpop.f32.mrb[18].mxu0  ;;  %v6766_v14 = vld [vmem:[%s9315_s5 + $0xb8] sm:$0xff]   ;;  %v6767_v15 = vld [vmem:[%s9315_s5 + $0x140] sm:$0xff]  }
 0x25a   :  { %v1498_v7 = vpop.f32.mrb[15].mxu1  ;;  %v1539_v8 = vpop.f32.mrb[19].mxu0  ;;  %6592 = vmatpush3.bf16.msra.mxu0 %v6766_v14  ;;  %6599 = vmatprep.subr.bf16.mxu1 %v6767_v15  ;;  %v2748_v63 = vrot.slane %v8350_v56, %v8353_v57  ;;  %v2756_v0 = vrot.slane %v8350_v56, %v8356_v58 }
 0x25b   :  { %6621 = vmatprep.subr.bf16.mxu0 %v6768_v16 }
 0x277   :  { %v1575_v17 = vpop.f32.mrb[16].mxu1  ;;  %v1616_v18 = vpop.f32.mrb[20].mxu0 }
 0x278   :  { %v1576_v19 = vadd.f32 %v1575_v17, %v8213_v27  ;;  %v1617_v20 = vadd.f32 %v1616_v18, %v8215_v28  ;;  %v1577_v21 = vpop.f32.mrb[17].mxu1  ;;  %v1618_v22 = vpop.f32.mrb[21].mxu0 }
 0x279   :  { %v1578_v24 = vadd.f32 %v1577_v21, %v8217_v29  ;;  %v1619_v25 = vadd.f32 %v1618_v22, %v8219_v30  ;;  %v1579_v26 = vpop.f32.mrb[18].mxu1  ;;  %v1620_v31 = vpop.f32.mrb[22].mxu0 }
 0x27a   :  { %v1580_v32 = vpop.f32.mrb[19].mxu1  ;;  %v1621_v33 = vpop.f32.mrb[23].mxu0 }
 0x27b   :  { %v6771_v32 = vld [vmem:[%s9315_s5 + $0x148] sm:$0xff]  }
 0x27c   :  { %v6772_v33 = vld [vmem:[%s9315_s5 + $0x1c8] sm:$0xff]  }
 0x297   :  { %v2043_v12 = vpop.f32.mrb[20].mxu1  ;;  %v2084_v34 = vpop.f32.mrb[24].mxu0 }
 0x298   :  { %v2173_v13 = vadd.f32 %v2043_v12, %v1494_v59  ;;  %v2175_v35 = vadd.f32 %v2084_v34, %v1535_v60  ;;  %v2045_v36 = vpop.f32.mrb[21].mxu1  ;;  %v2086_v37 = vpop.f32.mrb[25].mxu0  ;;  %v2744_v59 = vrot.slane %v8350_v56, %v8342_v54  ;;  %v2752_v60 = vrot.slane %v8350_v56, %v8345_v55  ;;  %v6773_v12 = vld [vmem:[%s9315_s5 + $0x108] sm:$0xff]  }
 0x299   :  { %v2174_v23 = vadd.f32 %v2045_v36, %v1496_v1  ;;  %v2176_v27 = vadd.f32 %v2086_v37, %v1537_v2  ;;  %v2047_v38 = vpop.f32.mrb[22].mxu1  ;;  %v2088_v28 = vpop.f32.mrb[26].mxu0  ;;  %v6774_v34 = vld [vmem:[%s9315_s5 + $0x188] sm:$0xff]   ;;  %v6777_v36 = vld [vmem:[%s9315_s5 + $0x110] sm:$0xff]  }
 0x29a   :  { %v2048_v39 = vpop.f32.mrb[23].mxu1  ;;  %v2089_v40 = vpop.f32.mrb[27].mxu0  ;;  %v6778_v37 = vld [vmem:[%s9315_s5 + $0x190] sm:$0xff]   ;;  %v6781_v38 = vld [vmem:[%s9315_s5 + $0x118] sm:$0xff]  }
 0x29b   :  { %v6782_v28 = vld [vmem:[%s9315_s5 + $0x198] sm:$0xff]   ;;  %v6783_v39 = vld [vmem:[%s9315_s5 + $0x160] sm:$0xff]  }
 0x29c   :  { %v6784_v40 = vld [vmem:[%s9315_s5 + $0x1e0] sm:$0xff]  }
 0x2b7   :  { %v2125_v41 = vpop.f32.mrb[24].mxu1  ;;  %v2166_v29 = vpop.f32.mrb[28].mxu0 }
 0x2b8   :  { %v8331_v42 = vadd.f32 %v2125_v41, %v1576_v19  ;;  %v8333_v30 = vadd.f32 %v2166_v29, %v1617_v20  ;;  %v2127_v43 = vpop.f32.mrb[25].mxu1  ;;  %v2168_v44 = vpop.f32.mrb[29].mxu0  ;;  %v6785_v41 = vld [vmem:[%s9315_s5 + $0x120] sm:$0xff]  }
 0x2b9   :  { %v8335_v45 = vadd.f32 %v2127_v43, %v1578_v24  ;;  %v8337_v46 = vadd.f32 %v2168_v44, %v1619_v25  ;;  %v2129_v48 = vpop.f32.mrb[26].mxu1  ;;  %v2170_v49 = vpop.f32.mrb[30].mxu0  ;;  %v6769_v24 = vld [vmem:[%s9315_s5 + $0x100] sm:$0xff]   ;;  %v6787_v43 = vld [vmem:[%s9315_s5 + $0x168] sm:$0xff]  }
 0x2ba   :  { %v2130_v50 = vpop.f32.mrb[27].mxu1  ;;  %v2171_v51 = vpop.f32.mrb[31].mxu0  ;;  %v6770_v25 = vld [vmem:[%s9315_s5 + $0x180] sm:$0xff]   ;;  %v6788_v44 = vld [vmem:[%s9315_s5 + $0x1e8] sm:$0xff]   ;;  %v2759_v48 = vsub.s32 4, %v8339_v53  ;;  %v2767_v49 = vsub.s32 6, %v8339_v53 }
 0x2bb   :  { %v6786_v29 = vld [vmem:[%s9315_s5 + $0x1a0] sm:$0xff]   ;;  %v6789_v50 = vld [vmem:[%s9315_s5 + $0x128] sm:$0xff]  }
 0x2bc   :  { %v6790_v51 = vld [vmem:[%s9315_s5 + $0x1a8] sm:$0xff]  }
 0x2d7   :  { %v2601_v61 = vpop.f32.mrb[28].mxu1  ;;  %v2642_v62 = vpop.f32.mrb[32].mxu0 }
 0x2d8   :  { %v2731_v1 = vadd.f32 %v2601_v61, %v2173_v13  ;;  %v2733_v2 = vadd.f32 %v2642_v62, %v2175_v35  ;;  %v2603_v3 = vpop.f32.mrb[29].mxu1  ;;  %v2644_v4 = vpop.f32.mrb[33].mxu0  ;;  %v6775_v13 = vld [vmem:[%s9315_s5 + $0x150] sm:$0xff]   ;;  %v2760_v62 = vrot.slane %v8350_v56, %v2759_v48 }
 0x2d9   :  { %v2732_v5 = vadd.f32 %v2603_v3, %v2174_v23  ;;  %v2734_v6 = vadd.f32 %v2644_v4, %v2176_v27  ;;  %v2605_v7 = vpop.f32.mrb[30].mxu1  ;;  %v2646_v8 = vpop.f32.mrb[34].mxu0  ;;  %v6776_v35 = vld [vmem:[%s9315_s5 + $0x1d0] sm:$0xff]   ;;  %v6779_v23 = vld [vmem:[%s9315_s5 + $0x158] sm:$0xff]  }
 0x2da   :  { %v2781_v9 = vadd.f32 %v2744_v59, %v2731_v1  ;;  %v2783_v10 = vadd.f32 %v2752_v60, %v2733_v2  ;;  %v2606_v11 = vpop.f32.mrb[31].mxu1  ;;  %v2647_v14 = vpop.f32.mrb[35].mxu0  ;;  %v6780_v27 = vld [vmem:[%s9315_s5 + $0x1d8] sm:$0xff]   ;;  %v2771_v59 = vsub.s32 7, %v8339_v53  ;;  %v6791_v60 = vld [vmem:[%s9315_s5 + $0x170] sm:$0xff]   ;;  %v2764_v2 = vrot.slane %v8350_v56, %v2763_v52 }
 0x2db   :  { %v2782_v15 = vadd.f32 %v2748_v63, %v2732_v5  ;;  %v2784_v16 = vadd.f32 %v2756_v0, %v2734_v6  ;;  %v6792_v61 = vld [vmem:[%s9315_s5 + $0x1f0] sm:$0xff]   ;;  %v2768_v63 = vrot.slane %v8350_v56, %v2767_v49 }
 0x2dc   :  { %v2789_v17 = vmax.f32 %v2781_v9, 0.0  ;;  %v2791_v18 = vmax.f32 %v2783_v10, 0.0  ;;  %v2772_v3 = vrot.slane %v8350_v56, %v2771_v59  ;;  %v6793_v4 = vld [vmem:[%s9315_s5 + $0x130] sm:$0xff]   ;;  %v6795_v56 = vld [vmem:[%s9315_s5 + $0x178] sm:$0xff]  }
 0x2dd   :  { %v2790_v19 = vmax.f32 %v2782_v15, 0.0  ;;  %v2792_v20 = vmax.f32 %v2784_v16, 0.0  ;;  %v6794_v5 = vld [vmem:[%s9315_s5 + $0x1b0] sm:$0xff]   ;;  %v6796_v10 = vld [vmem:[%s9315_s5 + $0x1f8] sm:$0xff]  }
 0x2de   :  { %v2797_v26 = vpack.c.bf16 %v2789_v17, %v2789_v17  ;;  %v2799_v31 = vpack.c.bf16 %v2791_v18, %v2791_v18 }
 0x2df   :  { %v2798_v21 = vpack.c.bf16 %v2790_v19, %v2790_v19  ;;  %v2800_v22 = vpack.c.bf16 %v2792_v20, %v2792_v20 }
 0x2e1   :  { %3356 = vmatprep.mubr.bf16.mxu1 %v2798_v21  ;;  %3396 = vmatprep.mubr.bf16.mxu0 %v2800_v22  ;;  %v6797_v21 = vld [vmem:[%s9315_s5 + $0x138] sm:$0xff]  }
 0x2e2   :  { %3357 = vmatmul.mubr.bf16.vlgmr.msra.gmra.mrb[36].mxu1 %v2797_v26  ;;  %3397 = vmatmul.mubr.bf16.vlgmr.msra.gmra.mrb[40].mxu0 %v2799_v31 }
 0x2e3   :  { %6600 = vmatpush3.bf16.msra.mxu1 %v6769_v24  ;;  %6622 = vmatpush3.bf16.msra.mxu0 %v6770_v25 }
 0x2e4   :  { %6601 = vmatprep.subr.bf16.mxu1 %v6771_v32  ;;  %6623 = vmatprep.subr.bf16.mxu0 %v6772_v33 }
 0x2e7   :  { %6602 = vmatpush3.bf16.msra.mxu1 %v6773_v12  ;;  %6624 = vmatpush3.bf16.msra.mxu0 %v6774_v34  ;;  %v3496_v12 = vld [vmem:[#allocation6] sm:$0xff] }
 0x2e8   :  { %6603 = vmatprep.subr.bf16.mxu1 %v6775_v13  ;;  %6625 = vmatprep.subr.bf16.mxu0 %v6776_v35  ;;  %v3500_v34 = vld [vmem:[#allocation6 + $0x20] sm:$0xff]  ;;  %v3497_v13 = vld [vmem:[#allocation6 + $0x8] sm:$0xff] }
 0x2e9   :  { %v6211_v35 = vcombine.low %v3496_v12, %v3500_v34 }
 0x2eb   :  { %6604 = vmatpush3.bf16.msra.mxu1 %v6777_v36  ;;  %6626 = vmatpush3.bf16.msra.mxu0 %v6778_v37  ;;  %v6212_v36 = vcombine.high %v3496_v12, %v3500_v34  ;;  %v3501_v37 = vld [vmem:[#allocation6 + $0x28] sm:$0xff] }
 0x2ec   :  { %6605 = vmatprep.subr.bf16.mxu1 %v6779_v23  ;;  %6627 = vmatprep.subr.bf16.mxu0 %v6780_v27  ;;  %v3504_v23 = vld [vmem:[#allocation6 + $0x40] sm:$0xff]  ;;  %v3525_v12 = vld [vmem:[#allocation6 + $0xe8] sm:$0xff] }
 0x2ed   :  { %v3508_v27 = vld [vmem:[#allocation6 + $0x60] sm:$0xff] }
 0x2ef   :  { %6606 = vmatpush3.bf16.msra.mxu1 %v6781_v38  ;;  %6628 = vmatpush3.bf16.msra.mxu0 %v6782_v28  ;;  %v6213_v38 = vcombine.low %v3497_v13, %v3501_v37  ;;  %v6214_v28 = vcombine.high %v3497_v13, %v3501_v37  ;;  %v3498_v37 = vld [vmem:[#allocation6 + $0x10] sm:$0xff] }
 0x2f0   :  { %6607 = vmatprep.subr.bf16.mxu1 %v6783_v39  ;;  %6629 = vmatprep.subr.bf16.mxu0 %v6784_v40  ;;  %v6220_v39 = vcombine.high %v3504_v23, %v3508_v27  ;;  %v3505_v40 = vld [vmem:[#allocation6 + $0x48] sm:$0xff] }
 0x2f3   :  { %6608 = vmatpush3.bf16.msra.mxu1 %v6785_v41  ;;  %6630 = vmatpush3.bf16.msra.mxu0 %v6786_v29  ;;  %v3509_v41 = vld [vmem:[#allocation6 + $0x68] sm:$0xff]  ;;  %v3512_v29 = vld [vmem:[#allocation6 + $0x80] sm:$0xff] }
 0x2f4   :  { %6609 = vmatprep.subr.bf16.mxu1 %v6787_v43  ;;  %6631 = vmatprep.subr.bf16.mxu0 %v6788_v44  ;;  %v6222_v43 = vcombine.high %v3505_v40, %v3509_v41  ;;  %v3516_v44 = vld [vmem:[#allocation6 + $0xa0] sm:$0xff] }
 0x2f7   :  { %v2683_v0 = vpop.f32.mrb[32].mxu1  ;;  %v2724_v1 = vpop.f32.mrb[36].mxu0  ;;  %6610 = vmatpush3.bf16.msra.mxu1 %v6789_v50  ;;  %6632 = vmatpush3.bf16.msra.mxu0 %v6790_v51  ;;  %v3513_v50 = vld [vmem:[#allocation6 + $0x88] sm:$0xff] }
 0x2f8   :  { %v2735_v6 = vadd.f32 %v2683_v0, %v8331_v42  ;;  %v2737_v7 = vadd.f32 %v2724_v1, %v8333_v30  ;;  %v2685_v8 = vpop.f32.mrb[33].mxu1  ;;  %v2726_v9 = vpop.f32.mrb[37].mxu0  ;;  %6611 = vmatprep.subr.bf16.mxu1 %v6791_v60  ;;  %6633 = vmatprep.subr.bf16.mxu0 %v6792_v61  ;;  %v3517_v51 = vld [vmem:[#allocation6 + $0xa8] sm:$0xff]  ;;  %v6219_v60 = vcombine.low %v3504_v23, %v3508_v27  ;;  %v3502_v23 = vld [vmem:[#allocation6 + $0x30] sm:$0xff]  ;;  %v3499_v27 = vld [vmem:[#allocation6 + $0x18] sm:$0xff] }
 0x2f9   :  { %v2736_v11 = vadd.f32 %v2685_v8, %v8335_v45  ;;  %v2738_v14 = vadd.f32 %v2726_v9, %v8337_v46  ;;  %v2687_v15 = vpop.f32.mrb[34].mxu1  ;;  %v2728_v42 = vpop.f32.mrb[38].mxu0  ;;  %v6798_v45 = vld [vmem:[%s9315_s5 + $0x1b8] sm:$0xff]   ;;  %v6221_v61 = vcombine.low %v3505_v40, %v3509_v41  ;;  %v6227_v0 = vcombine.low %v3512_v29, %v3516_v44 }
 0x2fa   :  { %v2785_v16 = vadd.f32 %v2760_v62, %v2735_v6  ;;  %v2787_v30 = vadd.f32 %v2768_v63, %v2737_v7  ;;  %v2688_v17 = vpop.f32.mrb[35].mxu1  ;;  %v2729_v18 = vpop.f32.mrb[39].mxu0  ;;  %v6228_v62 = vcombine.high %v3512_v29, %v3516_v44  ;;  %v6230_v63 = vcombine.high %v3513_v50, %v3517_v51 }
 0x2fb   :  { %v2786_v19 = vadd.f32 %v2764_v2, %v2736_v11  ;;  %v2788_v20 = vadd.f32 %v2772_v3, %v2738_v14  ;;  %6612 = vmatpush3.bf16.msra.mxu1 %v6793_v4  ;;  %6634 = vmatpush3.bf16.msra.mxu0 %v6794_v5  ;;  %v6229_v1 = vcombine.low %v3513_v50, %v3517_v51  ;;  %v6146_v4 = vld [vmem:[#allocation4] ss:$0 sm:$0xff]  ;;  %v3506_v51 = vld [vmem:[#allocation6 + $0x50] sm:$0xff] }
 0x2fc   :  { %v2793_v22 = vmax.f32 %v2785_v16, 0.0  ;;  %v2795_v46 = vmax.f32 %v2787_v30, 0.0  ;;  %6613 = vmatprep.subr.bf16.mxu1 %v6795_v56  ;;  %6635 = vmatprep.subr.bf16.mxu0 %v6796_v10 }
 0x2fd   :  { %v2794_v24 = vmax.f32 %v2786_v19, 0.0  ;;  %v2796_v25 = vmax.f32 %v2788_v20, 0.0 }
 0x2fe   :  { %v2801_v32 = vpack.c.bf16 %v2793_v22, %v2793_v22  ;;  %v2803_v33 = vpack.c.bf16 %v2795_v46, %v2795_v46 }
 0x2ff   :  { %v2802_v26 = vpack.c.bf16 %v2794_v24, %v2794_v24  ;;  %v2804_v31 = vpack.c.bf16 %v2796_v25, %v2796_v25  ;;  %6614 = vmatpush3.bf16.msra.mxu1 %v6797_v21  ;;  %6636 = vmatpush3.bf16.msra.mxu0 %v6798_v45 }
 0x300   :  { %3733 = vmatprep.subr.bf16.mxu1 %v6212_v36  ;;  %3774 = vmatprep.subr.bf16.mxu0 %v6214_v28  ;;  %v3503_v28 = vld [vmem:[#allocation6 + $0x38] sm:$0xff] }
 0x301   :  { %3436 = vmatprep.mubr.bf16.mxu1 %v2802_v26  ;;  %3476 = vmatprep.mubr.bf16.mxu0 %v2804_v31  ;;  %v3520_v26 = vld [vmem:[#allocation6 + $0xc0] sm:$0xff]  ;;  %v6217_v40 = vcombine.low %v3499_v27, %v3503_v28  ;;  %v6218_v41 = vcombine.high %v3499_v27, %v3503_v28  ;;  %v6834_v28 = vld [vmem:[%s9320_s10 + $0xac] ss:$16 sps:$4 sm:$0xff]  }
 0x302   :  { %3437 = vmatmul.mubr.bf16.vlgmr.msra.gmra.mrb[40].mxu1 %v2801_v32  ;;  %3477 = vmatmul.mubr.bf16.vlgmr.msra.gmra.mrb[44].mxu0 %v2803_v33  ;;  %v3524_v31 = vld [vmem:[#allocation6 + $0xe0] sm:$0xff]  ;;  %v3521_v32 = vld [vmem:[#allocation6 + $0xc8] sm:$0xff] }
 0x303   :  { %3765 = vmatprep.mubr.bf16.mxu1 %v7264_v47  ;;  %3806 = vmatprep.mubr.bf16.mxu0 %v7264_v47  ;;  %v6236_v33 = vcombine.high %v3520_v26, %v3524_v31  ;;  %v6235_v13 = vcombine.low %v3520_v26, %v3524_v31  ;;  %v6238_v36 = vcombine.high %v3521_v32, %v3525_v12  ;;  %v6813_v26 = vld [vmem:[%s9320_s10 + $0x44] ss:$16 sps:$4 sm:$0xff]   ;;  %v6816_v31 = vld [vmem:[%s9320_s10 + $0x4c] ss:$16 sps:$4 sm:$0xff]   ;;  %v6826_v27 = vld [vmem:[%s9320_s10 + $0x88] ss:$16 sps:$4 sm:$0xff]  }
 0x304   :  { %3734 = vmatpush1.bf16.msra.mxu1 %v6211_v35  ;;  %3775 = vmatpush1.bf16.msra.mxu0 %v6213_v38  ;;  %v6237_v35 = vcombine.low %v3521_v32, %v3525_v12  ;;  %v6216_v38 = vcombine.high %v3498_v37, %v3502_v23  ;;  %v6811_v32 = vld [vmem:[%s9320_s10 + $0x40] ss:$16 sps:$4 sm:$0xff]   ;;  %v6819_v12 = vld [vmem:[%s9320_s10 + $0x64] ss:$16 sps:$4 sm:$0xff]  }
 0x305   :  { %3735 = vmatprep.subr.bf16.mxu1 %v6220_v39  ;;  %3776 = vmatprep.subr.bf16.mxu0 %v6222_v43  ;;  %v6215_v39 = vcombine.low %v3498_v37, %v3502_v23  ;;  %v3485_v43 = vld [vmem:[%s9317_s7] sm:$0x3]  ;;  %v6828_v37 = vld [vmem:[%s9320_s10 + $0x8c] ss:$16 sps:$4 sm:$0xff]  }
 0x306   :  { %v6823_v23 = vld [vmem:[%s9320_s10 + $0x80] ss:$16 sps:$4 sm:$0xff]  }
 0x308   :  { %3736 = vmatpush1.bf16.msra.mxu1 %v6219_v60  ;;  %3777 = vmatpush1.bf16.msra.mxu0 %v6221_v61  ;;  %v3510_v60 = vld [vmem:[#allocation6 + $0x70] sm:$0xff]  ;;  %v3507_v61 = vld [vmem:[#allocation6 + $0x58] sm:$0xff] }
 0x309   :  { %3737 = vmatprep.subr.bf16.mxu1 %v6228_v62  ;;  %3778 = vmatprep.subr.bf16.mxu0 %v6230_v63  ;;  %v3511_v62 = vld [vmem:[#allocation6 + $0x78] sm:$0xff] }
 0x30c   :  { %3738 = vmatpush1.bf16.msra.mxu1 %v6227_v0  ;;  %3779 = vmatpush1.bf16.msra.mxu0 %v6229_v1  ;;  %v6224_v1 = vcombine.high %v3506_v51, %v3510_v60 }
 0x30d   :  { %3739 = vmatprep.subr.bf16.mxu1 %v6236_v33  ;;  %3780 = vmatprep.subr.bf16.mxu0 %v6238_v36  ;;  %v6814_v33 = vld [vmem:[%s9320_s10 + $0x48] ss:$16 sps:$4 sm:$0xff]   ;;  %v6825_v36 = vld [vmem:[%s9320_s10 + $0x84] ss:$16 sps:$4 sm:$0xff]  }
 0x310   :  { %3740 = vmatpush1.bf16.msra.mxu1 %v6235_v13  ;;  %3781 = vmatpush1.bf16.msra.mxu0 %v6237_v35  ;;  %v6817_v13 = vld [vmem:[%s9320_s10 + $0x60] ss:$16 sps:$4 sm:$0xff]   ;;  %v6820_v35 = vld [vmem:[%s9320_s10 + $0x68] ss:$16 sps:$4 sm:$0xff]  }
 0x311   :  { %3815 = vmatprep.subr.bf16.mxu1 %v6216_v38  ;;  %3856 = vmatprep.subr.bf16.mxu0 %v6218_v41  ;;  %v6831_v38 = vld [vmem:[%s9320_s10 + $0xa4] ss:$16 sps:$4 sm:$0xff]  }
 0x312   :  { %v6837_v41 = vld [vmem:[%s9320_s10 + $0xc4] ss:$16 sps:$4 sm:$0xff]  }
 0x3b5   :  { %v6571_v2 = vpop.f32.mrb[36].mxu1  ;;  %v6593_v3 = vpop.f32.mrb[40].mxu0 }
 0x3b6   :  { %v6572_v5 = vpop.f32.mrb[37].mxu1  ;;  %v6594_v6 = vpop.f32.mrb[41].mxu0 }
 0x3b7   :  { %v6573_v7 = vadd.f32 %v6572_v5, %v6571_v2  ;;  %v6595_v8 = vadd.f32 %v6594_v6, %v6593_v3  ;;  %v6574_v9 = vpop.f32.mrb[38].mxu1  ;;  %v6596_v56 = vpop.f32.mrb[42].mxu0  ;;  %v6226_v2 = vcombine.high %v3507_v61, %v3511_v62  ;;  %v3514_v3 = vld [vmem:[#allocation6 + $0x90] sm:$0xff]  ;;  %v3515_v5 = vld [vmem:[#allocation6 + $0x98] sm:$0xff] }
 0x3b8   :  { %v6575_v10 = vpop.f32.mrb[39].mxu1  ;;  %v6597_v11 = vpop.f32.mrb[43].mxu0  ;;  %v3519_v6 = vld [vmem:[#allocation6 + $0xb8] sm:$0xff] }
 0x3b9   :  { %v3359_v14 = vadd.f32 %v6573_v7, %v6146_v4  ;;  %v3518_v4 = vld [vmem:[#allocation6 + $0xb0] sm:$0xff]  ;;  %v6223_v7 = vcombine.low %v3506_v51, %v3510_v60  ;;  %v6234_v56 = vcombine.high %v3515_v5, %v3519_v6  ;;  %v6846_v51 = vld [vmem:[%s9320_s10 + $0xec] ss:$16 sps:$4 sm:$0xff]  }
 0x3ba   :  { %v6232_v9 = vcombine.high %v3514_v3, %v3518_v4  ;;  %v3522_v10 = vld [vmem:[#allocation6 + $0xd0] sm:$0xff] }
 0x3bb   :  { %v3399_v15 = vadd.f32 %v6595_v8, %v3359_v14  ;;  %v6225_v8 = vcombine.low %v3507_v61, %v3511_v62  ;;  %v3526_v11 = vld [vmem:[#allocation6 + $0xf0] sm:$0xff]  ;;  %v3523_v14 = vld [vmem:[#allocation6 + $0xd8] sm:$0xff] }
 0x3bc   :  { %v6841_v60 = vld [vmem:[%s9320_s10 + $0xe0] ss:$16 sps:$4 sm:$0xff]   ;;  %v6844_v61 = vld [vmem:[%s9320_s10 + $0xe8] ss:$16 sps:$4 sm:$0xff]   ;;  %v6849_v62 = vld [vmem:[%s9320_s10 + $0x104] ss:$16 sps:$4 sm:$0xff]  }
 0x3d5   :  { %v6615_v42 = vpop.f32.mrb[40].mxu1  ;;  %v6637_v16 = vpop.f32.mrb[44].mxu0 }
 0x3d6   :  { %v6616_v30 = vpop.f32.mrb[41].mxu1  ;;  %v6638_v17 = vpop.f32.mrb[45].mxu0 }
 0x3d7   :  { %v6617_v18 = vadd.f32 %v6616_v30, %v6615_v42  ;;  %v6639_v19 = vadd.f32 %v6638_v17, %v6637_v16  ;;  %v6618_v20 = vpop.f32.mrb[42].mxu1  ;;  %v6640_v21 = vpop.f32.mrb[46].mxu0  ;;  %v6231_v42 = vcombine.low %v3514_v3, %v3518_v4  ;;  %v6233_v16 = vcombine.low %v3515_v5, %v3519_v6  ;;  %v6858_v3 = vld [vmem:[%s9320_s10 + $0x12c] ss:$16 sps:$4 sm:$0xff]   ;;  %v6853_v4 = vld [vmem:[%s9320_s10 + $0x120] ss:$16 sps:$4 sm:$0xff]  }
 0x3d8   :  { %v6619_v45 = vpop.f32.mrb[43].mxu1  ;;  %v6641_v22 = vpop.f32.mrb[47].mxu0  ;;  %v6240_v30 = vcombine.high %v3522_v10, %v3526_v11  ;;  %v6801_v20 = vld [vmem:[%s9320_s10 + $0x4] ss:$16 sps:$4 sm:$0xff]   ;;  %v6799_v21 = vld [vmem:[%s9320_s10] ss:$16 sps:$4 sm:$0xff]  }
 0x3d9   :  { %v3439_v46 = vadd.f32 %v6617_v18, %v3399_v15  ;;  %v3527_v15 = vld [vmem:[#allocation6 + $0xf8] sm:$0xff]  ;;  %v6239_v18 = vcombine.low %v3522_v10, %v3526_v11  ;;  %v6807_v22 = vld [vmem:[%s9320_s10 + $0x24] ss:$16 sps:$4 sm:$0xff]  }
 0x3da   :  { %v6242_v17 = vcombine.high %v3523_v14, %v3527_v15  ;;  %v6802_v45 = vld [vmem:[%s9320_s10 + $0x8] ss:$16 sps:$4 sm:$0xff]   ;;  %v6861_v6 = vld [vmem:[%s9320_s10 + $0x144] ss:$16 sps:$4 sm:$0xff]   ;;  %v6870_v10 = vld [vmem:[%s9320_s10 + $0x16c] ss:$16 sps:$4 sm:$0xff]  }
 0x3db   :  { %v3479_v24 = vadd.f32 %v6639_v19, %v3439_v46  ;;  %v6241_v19 = vcombine.low %v3523_v14, %v3527_v15  ;;  %v6810_v46 = vld [vmem:[%s9320_s10 + $0x2c] ss:$16 sps:$4 sm:$0xff]   ;;  %v6856_v5 = vld [vmem:[%s9320_s10 + $0x128] ss:$16 sps:$4 sm:$0xff]   ;;  %v6865_v11 = vld [vmem:[%s9320_s10 + $0x160] ss:$16 sps:$4 sm:$0xff]  }
 0x3dc   :  { %v6868_v14 = vld [vmem:[%s9320_s10 + $0x168] ss:$16 sps:$4 sm:$0xff]   ;;  %v6873_v15 = vld [vmem:[%s9320_s10 + $0x184] ss:$16 sps:$4 sm:$0xff]  }
 0x3dd   :  { %3484 = vst [vmem:[%s9322_s12] sm:$0x3] %v3479_v24  ;;  %v3486_v25 = vmul.f32 0.5, %v3479_v24 }
 0x3df   :  { %v3487_v34 = vmul.f32 1.442695, %v3486_v25  ;;  %v6808_v25 = vld [vmem:[%s9320_s10 + $0x28] ss:$16 sps:$4 sm:$0xff]  }
 0x3e1   :  { %7183 = vpow2.f32 %v3487_v34  ;;  %v6822_v34 = vld [vmem:[%s9320_s10 + $0x6c] ss:$16 sps:$4 sm:$0xff]  }
 0x3eb   :  { %v7184_v29 = vpop.eup %7183 }
 0x3ec   :  { %3490 = vrot.lane.b32.xlu0 %v7184_v29, %s7257_s6  ;;  %v6840_v29 = vld [vmem:[%s9320_s10 + $0xcc] ss:$16 sps:$4 sm:$0xff]  }
 0x45e   :  { %v3491_v44 = vpop.permute.xlu0 %3490 }
 0x45f   :  { %v3493_v50 = vmul.f32 %v3491_v44, %v3485_v43  ;;  %v6835_v43 = vld [vmem:[%s9320_s10 + $0xc0] ss:$16 sps:$4 sm:$0xff]   ;;  %v6838_v44 = vld [vmem:[%s9320_s10 + $0xc8] ss:$16 sps:$4 sm:$0xff]  }
 0x461   :  { %v3494_v63 = vadd.f32 %v3493_v50, %v3479_v24  ;;  %v6805_v24 = vld [vmem:[%s9320_s10 + $0x20] ss:$16 sps:$4 sm:$0xff]   ;;  %v6843_v50 = vld [vmem:[%s9320_s10 + $0xe4] ss:$16 sps:$4 sm:$0xff]  }
 0x463   :  { %v3495_v0 = vpack.c.bf16 %v3494_v63, %v3494_v63  ;;  %v6852_v63 = vld [vmem:[%s9320_s10 + $0x10c] ss:$16 sps:$4 sm:$0xff]  }
 0x465   :  { %6243 = vmatmul.mubr.msk.bf16.vlgmr.msra.gmra.mrb[44].mxu1 %vm398_vm1, %v3495_v0  ;;  %6244 = vmatmul.mubr.msk.bf16.vlgmr.msra.gmra.mrb[48].mxu0 %vm398_vm1, %v3495_v0 }
 0x466   :  { %3816 = vmatpush1.bf16.msra.mxu1 %v6215_v39  ;;  %3857 = vmatpush1.bf16.msra.mxu0 %v6217_v40  ;;  %v6829_v39 = vld [vmem:[%s9320_s10 + $0xa0] ss:$16 sps:$4 sm:$0xff]   ;;  %v6832_v40 = vld [vmem:[%s9320_s10 + $0xa8] ss:$16 sps:$4 sm:$0xff]  }
 0x467   :  { %3817 = vmatprep.subr.bf16.mxu1 %v6224_v1  ;;  %3858 = vmatprep.subr.bf16.mxu0 %v6226_v2  ;;  %v6850_v1 = vld [vmem:[%s9320_s10 + $0x108] ss:$16 sps:$4 sm:$0xff]   ;;  %v6855_v2 = vld [vmem:[%s9320_s10 + $0x124] ss:$16 sps:$4 sm:$0xff]  }
 0x468   :  { %3847 = vmatprep.mubr.bf16.mxu1 %v7264_v47  ;;  %3888 = vmatprep.mubr.bf16.mxu0 %v7264_v47  ;;  %v6804_v47 = vld [vmem:[%s9320_s10 + $0xc] ss:$16 sps:$4 sm:$0xff]  }
 0x46a   :  { %3818 = vmatpush1.bf16.msra.mxu1 %v6223_v7  ;;  %3859 = vmatpush1.bf16.msra.mxu0 %v6225_v8  ;;  %v6864_v7 = vld [vmem:[%s9320_s10 + $0x14c] ss:$16 sps:$4 sm:$0xff]   ;;  %v6859_v8 = vld [vmem:[%s9320_s10 + $0x140] ss:$16 sps:$4 sm:$0xff]  }
 0x46b   :  { %3819 = vmatprep.subr.bf16.mxu1 %v6232_v9  ;;  %3860 = vmatprep.subr.bf16.mxu0 %v6234_v56  ;;  %v6862_v9 = vld [vmem:[%s9320_s10 + $0x148] ss:$16 sps:$4 sm:$0xff]   ;;  %v6867_v56 = vld [vmem:[%s9320_s10 + $0x164] ss:$16 sps:$4 sm:$0xff]  }
 0x46e   :  { %3820 = vmatpush1.bf16.msra.mxu1 %v6231_v42  ;;  %3861 = vmatpush1.bf16.msra.mxu0 %v6233_v16  ;;  %v6876_v42 = vld [vmem:[%s9320_s10 + $0x18c] ss:$16 sps:$4 sm:$0xff]   ;;  %v6871_v16 = vld [vmem:[%s9320_s10 + $0x180] ss:$16 sps:$4 sm:$0xff]  }
 0x46f   :  { %3821 = vmatprep.subr.bf16.mxu1 %v6240_v30  ;;  %3862 = vmatprep.subr.bf16.mxu0 %v6242_v17  ;;  %v6874_v30 = vld [vmem:[%s9320_s10 + $0x188] ss:$16 sps:$4 sm:$0xff]   ;;  %v6879_v17 = vld [vmem:[%s9320_s10 + $0x1a4] ss:$16 sps:$4 sm:$0xff]  }
 0x472   :  { %3822 = vmatpush1.bf16.msra.mxu1 %v6239_v18  ;;  %3863 = vmatpush1.bf16.msra.mxu0 %v6241_v19  ;;  %v6882_v18 = vld [vmem:[%s9320_s10 + $0x1ac] ss:$16 sps:$4 sm:$0xff]   ;;  %v6877_v19 = vld [vmem:[%s9320_s10 + $0x1a0] ss:$16 sps:$4 sm:$0xff]  }
 0x473   :  { %5471 = vmatprep.subr.bf16.mxu1 %v6801_v20  ;;  %5635 = vmatprep.subr.bf16.mxu0 %v6804_v47  ;;  %v6880_v20 = vld [vmem:[%s9320_s10 + $0x1a8] ss:$16 sps:$4 sm:$0xff]   ;;  %v6885_v47 = vld [vmem:[%s9320_s10 + $0x1c4] ss:$16 sps:$4 sm:$0xff]  }
 0x475   :  { %6245 = vmatmul.mubr.msk.bf16.vlgmr.msra.gmra.mrb[48].mxu1 %vm398_vm1, %v3495_v0  ;;  %6246 = vmatmul.mubr.msk.bf16.vlgmr.msra.gmra.mrb[52].mxu0 %vm398_vm1, %v3495_v0  ;;  %v6847_v0 = vld [vmem:[%s9320_s10 + $0x100] ss:$16 sps:$4 sm:$0xff]  }
 0x476   :  { %5472 = vmatpush1.bf16.msra.mxu1 %v6799_v21  ;;  %5636 = vmatpush1.bf16.msra.mxu0 %v6802_v45  ;;  %v6888_v21 = vld [vmem:[%s9320_s10 + $0x1cc] ss:$16 sps:$4 sm:$0xff]   ;;  %v6883_v45 = vld [vmem:[%s9320_s10 + $0x1c0] ss:$16 sps:$4 sm:$0xff]  }
 0x477   :  { %5473 = vmatprep.subr.bf16.mxu1 %v6807_v22  ;;  %5637 = vmatprep.subr.bf16.mxu0 %v6810_v46  ;;  %v6886_v22 = vld [vmem:[%s9320_s10 + $0x1c8] ss:$16 sps:$4 sm:$0xff]   ;;  %v6891_v46 = vld [vmem:[%s9320_s10 + $0x1e4] ss:$16 sps:$4 sm:$0xff]  }
 0x47a   :  { %5474 = vmatpush1.bf16.msra.mxu1 %v6805_v24  ;;  %5638 = vmatpush1.bf16.msra.mxu0 %v6808_v25  ;;  %v6894_v24 = vld [vmem:[%s9320_s10 + $0x1ec] ss:$16 sps:$4 sm:$0xff]   ;;  %v6889_v25 = vld [vmem:[%s9320_s10 + $0x1e0] ss:$16 sps:$4 sm:$0xff]  }
 0x47b   :  { %5475 = vmatprep.subr.bf16.mxu1 %v6813_v26  ;;  %5639 = vmatprep.subr.bf16.mxu0 %v6816_v31  ;;  %v6892_v26 = vld [vmem:[%s9320_s10 + $0x1e8] ss:$16 sps:$4 sm:$0xff]   ;;  %v6897_v31 = vld [vmem:[%s9320_s10 + $0x204] ss:$16 sps:$4 sm:$0xff]  }
 0x47e   :  { %5476 = vmatpush1.bf16.msra.mxu1 %v6811_v32  ;;  %5640 = vmatpush1.bf16.msra.mxu0 %v6814_v33  ;;  %v6900_v32 = vld [vmem:[%s9320_s10 + $0x20c] ss:$16 sps:$4 sm:$0xff]   ;;  %v8692_v33 = vld [vmem:[%s9319_s9] sm:$0xff] }
 0x47f   :  { %5477 = vmatprep.subr.bf16.mxu1 %v6819_v12  ;;  %5641 = vmatprep.subr.bf16.mxu0 %v6822_v34  ;;  %v3533_v12 = vrot.slane %v8692_v33, %v8342_v54  ;;  %v3537_v34 = vrot.slane %v8692_v33, %v8353_v57 }
 0x482   :  { %5478 = vmatpush1.bf16.msra.mxu1 %v6817_v13  ;;  %5642 = vmatpush1.bf16.msra.mxu0 %v6820_v35  ;;  %v3545_v13 = vrot.slane %v8692_v33, %v8356_v58 }
 0x483   :  { %5479 = vmatprep.subr.bf16.mxu1 %v6825_v36  ;;  %5643 = vmatprep.subr.bf16.mxu0 %v6828_v37 }
 0x486   :  { %5480 = vmatpush1.bf16.msra.mxu1 %v6823_v23  ;;  %5644 = vmatpush1.bf16.msra.mxu0 %v6826_v27 }
 0x487   :  { %5481 = vmatprep.subr.bf16.mxu1 %v6831_v38  ;;  %5645 = vmatprep.subr.bf16.mxu0 %v6834_v28 }
 0x48a   :  { %5482 = vmatpush1.bf16.msra.mxu1 %v6829_v39  ;;  %5646 = vmatpush1.bf16.msra.mxu0 %v6832_v40 }
 0x48b   :  { %5483 = vmatprep.subr.bf16.mxu1 %v6837_v41  ;;  %5647 = vmatprep.subr.bf16.mxu0 %v6840_v29 }
 0x48e   :  { %5484 = vmatpush1.bf16.msra.mxu1 %v6835_v43  ;;  %5648 = vmatpush1.bf16.msra.mxu0 %v6838_v44 }
 0x48f   :  { %5485 = vmatprep.subr.bf16.mxu1 %v6843_v50  ;;  %5649 = vmatprep.subr.bf16.mxu0 %v6846_v51 }
 0x492   :  { %5486 = vmatpush1.bf16.msra.mxu1 %v6841_v60  ;;  %5650 = vmatpush1.bf16.msra.mxu0 %v6844_v61  ;;  %v6895_v60 = vld [vmem:[%s9320_s10 + $0x200] ss:$16 sps:$4 sm:$0xff]   ;;  %v6898_v61 = vld [vmem:[%s9320_s10 + $0x208] ss:$16 sps:$4 sm:$0xff]  }
 0x493   :  { %5487 = vmatprep.subr.bf16.mxu1 %v6849_v62  ;;  %5651 = vmatprep.subr.bf16.mxu0 %v6852_v63  ;;  %v6903_v63 = vld [vmem:[%s9320_s10 + $0x224] ss:$16 sps:$4 sm:$0xff]  }
 0x496   :  { %5488 = vmatpush1.bf16.msra.mxu1 %v6847_v0  ;;  %5652 = vmatpush1.bf16.msra.mxu0 %v6850_v1  ;;  %v6906_v0 = vld [vmem:[%s9320_s10 + $0x22c] ss:$16 sps:$4 sm:$0xff]  }
 0x497   :  { %5489 = vmatprep.subr.bf16.mxu1 %v6855_v2  ;;  %5653 = vmatprep.subr.bf16.mxu0 %v6858_v3  ;;  %v6901_v2 = vld [vmem:[%s9320_s10 + $0x220] ss:$16 sps:$4 sm:$0xff]   ;;  %v6904_v3 = vld [vmem:[%s9320_s10 + $0x228] ss:$16 sps:$4 sm:$0xff]  }
 0x49a   :  { %5490 = vmatpush1.bf16.msra.mxu1 %v6853_v4  ;;  %5654 = vmatpush1.bf16.msra.mxu0 %v6856_v5  ;;  %v6909_v4 = vld [vmem:[%s9320_s10 + $0x244] ss:$16 sps:$4 sm:$0xff]   ;;  %v6912_v5 = vld [vmem:[%s9320_s10 + $0x24c] ss:$16 sps:$4 sm:$0xff]  }
 0x49b   :  { %5491 = vmatprep.subr.bf16.mxu1 %v6861_v6  ;;  %5655 = vmatprep.subr.bf16.mxu0 %v6864_v7  ;;  %v6907_v6 = vld [vmem:[%s9320_s10 + $0x240] ss:$16 sps:$4 sm:$0xff]   ;;  %v6910_v7 = vld [vmem:[%s9320_s10 + $0x248] ss:$16 sps:$4 sm:$0xff]  }
 0x49e   :  { %5492 = vmatpush1.bf16.msra.mxu1 %v6859_v8  ;;  %5656 = vmatpush1.bf16.msra.mxu0 %v6862_v9  ;;  %v6915_v8 = vld [vmem:[%s9320_s10 + $0x264] ss:$16 sps:$4 sm:$0xff]   ;;  %v6918_v9 = vld [vmem:[%s9320_s10 + $0x26c] ss:$16 sps:$4 sm:$0xff]  }
 0x49f   :  { %5493 = vmatprep.subr.bf16.mxu1 %v6867_v56  ;;  %5657 = vmatprep.subr.bf16.mxu0 %v6870_v10 }
 0x4a2   :  { %5494 = vmatpush1.bf16.msra.mxu1 %v6865_v11  ;;  %5658 = vmatpush1.bf16.msra.mxu0 %v6868_v14 }
 0x4a3   :  { %5495 = vmatprep.subr.bf16.mxu1 %v6873_v15  ;;  %5659 = vmatprep.subr.bf16.mxu0 %v6876_v42 }
 0x4a6   :  { %5496 = vmatpush1.bf16.msra.mxu1 %v6871_v16  ;;  %5660 = vmatpush1.bf16.msra.mxu0 %v6874_v30  ;;  %v6913_v16 = vld [vmem:[%s9320_s10 + $0x260] ss:$16 sps:$4 sm:$0xff]   ;;  %v6916_v30 = vld [vmem:[%s9320_s10 + $0x268] ss:$16 sps:$4 sm:$0xff]  }
 0x4a7   :  { %5497 = vmatprep.subr.bf16.mxu1 %v6879_v17  ;;  %5661 = vmatprep.subr.bf16.mxu0 %v6882_v18 }
 0x4aa   :  { %5498 = vmatpush1.bf16.msra.mxu1 %v6877_v19  ;;  %5662 = vmatpush1.bf16.msra.mxu0 %v6880_v20  ;;  %v6921_v19 = vld [vmem:[%s9320_s10 + $0x284] ss:$16 sps:$4 sm:$0xff]   ;;  %v6924_v20 = vld [vmem:[%s9320_s10 + $0x28c] ss:$16 sps:$4 sm:$0xff]  }
 0x4ab   :  { %5499 = vmatprep.subr.bf16.mxu1 %v6885_v47  ;;  %5663 = vmatprep.subr.bf16.mxu0 %v6888_v21  ;;  %v6919_v47 = vld [vmem:[%s9320_s10 + $0x280] ss:$16 sps:$4 sm:$0xff]   ;;  %v6922_v21 = vld [vmem:[%s9320_s10 + $0x288] ss:$16 sps:$4 sm:$0xff]  }
 0x4ae   :  { %5500 = vmatpush1.bf16.msra.mxu1 %v6883_v45  ;;  %5664 = vmatpush1.bf16.msra.mxu0 %v6886_v22  ;;  %v6927_v45 = vld [vmem:[%s9320_s10 + $0x2a4] ss:$16 sps:$4 sm:$0xff]   ;;  %v6930_v22 = vld [vmem:[%s9320_s10 + $0x2ac] ss:$16 sps:$4 sm:$0xff]  }
 0x4af   :  { %5501 = vmatprep.subr.bf16.mxu1 %v6891_v46  ;;  %5665 = vmatprep.subr.bf16.mxu0 %v6894_v24  ;;  %v6925_v46 = vld [vmem:[%s9320_s10 + $0x2a0] ss:$16 sps:$4 sm:$0xff]   ;;  %v6928_v24 = vld [vmem:[%s9320_s10 + $0x2a8] ss:$16 sps:$4 sm:$0xff]  }
 0x4b2   :  { %5502 = vmatpush1.bf16.msra.mxu1 %v6889_v25  ;;  %5666 = vmatpush1.bf16.msra.mxu0 %v6892_v26  ;;  %v6933_v25 = vld [vmem:[%s9320_s10 + $0x2c4] ss:$16 sps:$4 sm:$0xff]   ;;  %v6936_v26 = vld [vmem:[%s9320_s10 + $0x2cc] ss:$16 sps:$4 sm:$0xff]  }
 0x4b3   :  { %5512 = vmatprep.subr.bf16.mxu1 %v6897_v31  ;;  %5676 = vmatprep.subr.bf16.mxu0 %v6900_v32  ;;  %v6931_v31 = vld [vmem:[%s9320_s10 + $0x2c0] ss:$16 sps:$4 sm:$0xff]   ;;  %v6934_v32 = vld [vmem:[%s9320_s10 + $0x2c8] ss:$16 sps:$4 sm:$0xff]  }
 0x538   :  { %v3767_v35 = vpop.f32.mrb[44].mxu1  ;;  %v8700_v36 = vpop.f32.mrb[48].mxu0 }
 0x539   :  { %v3768_v37 = vadd.f32 %v3767_v35, %v3533_v12  ;;  %v3769_v23 = vpop.f32.mrb[45].mxu1  ;;  %v3810_v27 = vpop.f32.mrb[49].mxu0  ;;  %v6939_v12 = vld [vmem:[%s9320_s10 + $0x2e4] ss:$16 sps:$4 sm:$0xff]   ;;  %v6940_v35 = vld [vmem:[%s9320_s10 + $0x2e8] ss:$16 sps:$4 sm:$0xff]  }
 0x53a   :  { %v3770_v38 = vadd.f32 %v3769_v23, %v3537_v34  ;;  %v3811_v28 = vadd.f32 %v3810_v27, %v3545_v13  ;;  %v3771_v39 = vpop.f32.mrb[46].mxu1  ;;  %v3812_v40 = vpop.f32.mrb[50].mxu0  ;;  %v6942_v34 = vld [vmem:[%s9320_s10 + $0x2ec] ss:$16 sps:$4 sm:$0xff]   ;;  %v6937_v13 = vld [vmem:[%s9320_s10 + $0x2e0] ss:$16 sps:$4 sm:$0xff]  }
 0x53b   :  { %v3897_v41 = vmax.f32 %v3768_v37, 0.0  ;;  %v3772_v29 = vpop.f32.mrb[47].mxu1  ;;  %v3813_v43 = vpop.f32.mrb[51].mxu0  ;;  %v6945_v37 = vld [vmem:[%s9320_s10 + $0x304] ss:$16 sps:$4 sm:$0xff]  }
 0x53c   :  { %v3898_v44 = vmax.f32 %v3770_v38, 0.0  ;;  %v3900_v50 = vmax.f32 %v3811_v28, 0.0  ;;  %v6948_v23 = vld [vmem:[%s9320_s10 + $0x30c] ss:$16 sps:$4 sm:$0xff]   ;;  %v6943_v27 = vld [vmem:[%s9320_s10 + $0x300] ss:$16 sps:$4 sm:$0xff]  }
 0x53d   :  { %v3905_v62 = vpack.c.bf16 %v3897_v41, %v3897_v41  ;;  %v6946_v38 = vld [vmem:[%s9320_s10 + $0x308] ss:$16 sps:$4 sm:$0xff]   ;;  %v6951_v28 = vld [vmem:[%s9320_s10 + $0x324] ss:$16 sps:$4 sm:$0xff]   ;;  %v6954_v39 = vld [vmem:[%s9320_s10 + $0x32c] ss:$16 sps:$4 sm:$0xff]  }
 0x53e   :  { %v3906_v51 = vpack.c.bf16 %v3898_v44, %v3898_v44  ;;  %v3908_v1 = vpack.c.bf16 %v3900_v50, %v3900_v50  ;;  %v6949_v40 = vld [vmem:[%s9320_s10 + $0x320] ss:$16 sps:$4 sm:$0xff]   ;;  %v6952_v41 = vld [vmem:[%s9320_s10 + $0x328] ss:$16 sps:$4 sm:$0xff]   ;;  %v6957_v29 = vld [vmem:[%s9320_s10 + $0x344] ss:$16 sps:$4 sm:$0xff]  }
 0x53f   :  { %v6960_v43 = vld [vmem:[%s9320_s10 + $0x34c] ss:$16 sps:$4 sm:$0xff]   ;;  %v6955_v44 = vld [vmem:[%s9320_s10 + $0x340] ss:$16 sps:$4 sm:$0xff]   ;;  %v6958_v50 = vld [vmem:[%s9320_s10 + $0x348] ss:$16 sps:$4 sm:$0xff]  }
 0x540   :  { %5503 = vmatprep.mubr.bf16.mxu1 %v3906_v51  ;;  %5667 = vmatprep.mubr.bf16.mxu0 %v3906_v51  ;;  %v6963_v51 = vld [vmem:[%s9320_s10 + $0x364] ss:$16 sps:$4 sm:$0xff]  }
 0x541   :  { %5504 = vmatmul.mubr.bf16.vlgmr.msra.gmra.mrb[52].mxu1 %v3905_v62  ;;  %5668 = vmatmul.mubr.bf16.vlgmr.msra.gmra.mrb[56].mxu0 %v3905_v62  ;;  %v6964_v62 = vld [vmem:[%s9320_s10 + $0x368] ss:$16 sps:$4 sm:$0xff]  }
 0x542   :  { %5513 = vmatpush1.bf16.msra.mxu1 %v6895_v60  ;;  %5677 = vmatpush1.bf16.msra.mxu0 %v6898_v61  ;;  %v6966_v60 = vld [vmem:[%s9320_s10 + $0x36c] ss:$16 sps:$4 sm:$0xff]   ;;  %v6961_v61 = vld [vmem:[%s9320_s10 + $0x360] ss:$16 sps:$4 sm:$0xff]  }
 0x543   :  { %5544 = vmatprep.mubr.bf16.mxu1 %v3908_v1  ;;  %5708 = vmatprep.mubr.bf16.mxu0 %v3908_v1  ;;  %v6967_v1 = vld [vmem:[%s9320_s10 + $0x380] ss:$16 sps:$4 sm:$0xff]  }
 0x544   :  { %5514 = vmatprep.subr.bf16.mxu1 %v6903_v63  ;;  %5678 = vmatprep.subr.bf16.mxu0 %v6906_v0  ;;  %v6969_v63 = vld [vmem:[%s9320_s10 + $0x384] ss:$16 sps:$4 sm:$0xff]   ;;  %v6972_v0 = vld [vmem:[%s9320_s10 + $0x38c] ss:$16 sps:$4 sm:$0xff]  }
 0x546   :  { %5515 = vmatpush1.bf16.msra.mxu1 %v6901_v2  ;;  %5679 = vmatpush1.bf16.msra.mxu0 %v6904_v3  ;;  %v6970_v2 = vld [vmem:[%s9320_s10 + $0x388] ss:$16 sps:$4 sm:$0xff]   ;;  %v6975_v3 = vld [vmem:[%s9320_s10 + $0x3a4] ss:$16 sps:$4 sm:$0xff]  }
 0x547   :  { %5516 = vmatprep.subr.bf16.mxu1 %v6909_v4  ;;  %5680 = vmatprep.subr.bf16.mxu0 %v6912_v5  ;;  %v6978_v4 = vld [vmem:[%s9320_s10 + $0x3ac] ss:$16 sps:$4 sm:$0xff]   ;;  %v6973_v5 = vld [vmem:[%s9320_s10 + $0x3a0] ss:$16 sps:$4 sm:$0xff]  }
 0x548   :  { %v8738_v56 = vpop.f32.mrb[48].mxu1  ;;  %v8740_v10 = vpop.f32.mrb[52].mxu0 }
 0x549   :  { %v8742_v11 = vpop.f32.mrb[49].mxu1  ;;  %v8744_v14 = vpop.f32.mrb[53].mxu0 }
 0x54a   :  { %v3853_v15 = vpop.f32.mrb[50].mxu1  ;;  %v3894_v42 = vpop.f32.mrb[54].mxu0  ;;  %5517 = vmatpush1.bf16.msra.mxu1 %v6907_v6  ;;  %5681 = vmatpush1.bf16.msra.mxu0 %v6910_v7  ;;  %v6976_v6 = vld [vmem:[%s9320_s10 + $0x3a8] ss:$16 sps:$4 sm:$0xff]   ;;  %v3541_v7 = vrot.slane %v8692_v33, %v8345_v55 }
 0x54b   :  { %v3854_v17 = vpop.f32.mrb[51].mxu1  ;;  %v3895_v18 = vpop.f32.mrb[55].mxu0  ;;  %5518 = vmatprep.subr.bf16.mxu1 %v6915_v8  ;;  %5682 = vmatprep.subr.bf16.mxu0 %v6918_v9  ;;  %v6981_v8 = vld [vmem:[%s9320_s10 + $0x3c4] ss:$16 sps:$4 sm:$0xff]   ;;  %v6984_v9 = vld [vmem:[%s9320_s10 + $0x3cc] ss:$16 sps:$4 sm:$0xff]   ;;  %v3553_v15 = vrot.slane %v8692_v33, %v2763_v52 }
 0x54c   :  { %v6979_v42 = vld [vmem:[%s9320_s10 + $0x3c0] ss:$16 sps:$4 sm:$0xff]   ;;  %v6987_v17 = vld [vmem:[%s9320_s10 + $0x3e4] ss:$16 sps:$4 sm:$0xff]   ;;  %v6990_v52 = vld [vmem:[%s9320_s10 + $0x3ec] ss:$16 sps:$4 sm:$0xff]  }
 0x54d   :  { %v3852_v18 = vadd.f32 %v8742_v11, %v3553_v15  ;;  %v6996_v11 = vld [vmem:[%s9320_s10 + $0x40c] ss:$16 sps:$4 sm:$0xff]   ;;  %v7048_v15 = vld [vmem:[%s9320_s10 + $0x528] ss:$16 sps:$4 sm:$0xff]  }
 0x54e   :  { %5519 = vmatpush1.bf16.msra.mxu1 %v6913_v16  ;;  %5683 = vmatpush1.bf16.msra.mxu0 %v6916_v30  ;;  %v6982_v16 = vld [vmem:[%s9320_s10 + $0x3c8] ss:$16 sps:$4 sm:$0xff]   ;;  %v3809_v30 = vadd.f32 %v8700_v36, %v3541_v7  ;;  %v7047_v7 = vld [vmem:[%s9320_s10 + $0x524] ss:$16 sps:$4 sm:$0xff]  }
 0x54f   :  { %5520 = vmatprep.subr.bf16.mxu1 %v6921_v19  ;;  %5684 = vmatprep.subr.bf16.mxu0 %v6924_v20  ;;  %v6985_v19 = vld [vmem:[%s9320_s10 + $0x3e0] ss:$16 sps:$4 sm:$0xff]   ;;  %v6988_v36 = vld [vmem:[%s9320_s10 + $0x3e8] ss:$16 sps:$4 sm:$0xff]  }
 0x550   :  { %v3899_v20 = vmax.f32 %v3809_v30, 0.0  ;;  %v7051_v30 = vld [vmem:[%s9320_s10 + $0x540] ss:$16 sps:$4 sm:$0xff]  }
 0x552   :  { %5521 = vmatpush1.bf16.msra.mxu1 %v6919_v47  ;;  %5685 = vmatpush1.bf16.msra.mxu0 %v6922_v21  ;;  %v6993_v47 = vld [vmem:[%s9320_s10 + $0x404] ss:$16 sps:$4 sm:$0xff]   ;;  %v3902_v21 = vmax.f32 %v3852_v18, 0.0  ;;  %v7062_v18 = vld [vmem:[%s9320_s10 + $0x56c] ss:$16 sps:$4 sm:$0xff]  }
 0x553   :  { %5522 = vmatprep.subr.bf16.mxu1 %v6927_v45  ;;  %5686 = vmatprep.subr.bf16.mxu0 %v6930_v22  ;;  %v6991_v45 = vld [vmem:[%s9320_s10 + $0x400] ss:$16 sps:$4 sm:$0xff]   ;;  %v3907_v22 = vpack.c.bf16 %v3899_v20, %v3899_v20  ;;  %v7065_v20 = vld [vmem:[%s9320_s10 + $0x584] ss:$16 sps:$4 sm:$0xff]  }
 0x556   :  { %5523 = vmatpush1.bf16.msra.mxu1 %v6925_v46  ;;  %5687 = vmatpush1.bf16.msra.mxu0 %v6928_v24  ;;  %v6994_v46 = vld [vmem:[%s9320_s10 + $0x408] ss:$16 sps:$4 sm:$0xff]   ;;  %v3910_v24 = vpack.c.bf16 %v3902_v21, %v3902_v21 }
 0x557   :  { %5524 = vmatprep.subr.bf16.mxu1 %v6933_v25  ;;  %5688 = vmatprep.subr.bf16.mxu0 %v6936_v26  ;;  %v6999_v25 = vld [vmem:[%s9320_s10 + $0x424] ss:$16 sps:$4 sm:$0xff]   ;;  %v7002_v26 = vld [vmem:[%s9320_s10 + $0x42c] ss:$16 sps:$4 sm:$0xff]   ;;  %v7066_v21 = vld [vmem:[%s9320_s10 + $0x588] ss:$16 sps:$4 sm:$0xff]  }
 0x55a   :  { %5525 = vmatpush1.bf16.msra.mxu1 %v6931_v31  ;;  %5689 = vmatpush1.bf16.msra.mxu0 %v6934_v32  ;;  %v6997_v31 = vld [vmem:[%s9320_s10 + $0x420] ss:$16 sps:$4 sm:$0xff]   ;;  %v7000_v32 = vld [vmem:[%s9320_s10 + $0x428] ss:$16 sps:$4 sm:$0xff]  }
 0x55b   :  { %5526 = vmatprep.subr.bf16.mxu1 %v6939_v12  ;;  %5690 = vmatprep.subr.bf16.mxu0 %v6942_v34  ;;  %v7005_v12 = vld [vmem:[%s9320_s10 + $0x444] ss:$16 sps:$4 sm:$0xff]   ;;  %v7008_v34 = vld [vmem:[%s9320_s10 + $0x44c] ss:$16 sps:$4 sm:$0xff]  }
 0x55e   :  { %5527 = vmatpush1.bf16.msra.mxu1 %v6937_v13  ;;  %5691 = vmatpush1.bf16.msra.mxu0 %v6940_v35  ;;  %v7003_v13 = vld [vmem:[%s9320_s10 + $0x440] ss:$16 sps:$4 sm:$0xff]   ;;  %v7006_v35 = vld [vmem:[%s9320_s10 + $0x448] ss:$16 sps:$4 sm:$0xff]  }
 0x55f   :  { %5528 = vmatprep.subr.bf16.mxu1 %v6945_v37  ;;  %5692 = vmatprep.subr.bf16.mxu0 %v6948_v23  ;;  %v7011_v37 = vld [vmem:[%s9320_s10 + $0x464] ss:$16 sps:$4 sm:$0xff]   ;;  %v7014_v23 = vld [vmem:[%s9320_s10 + $0x46c] ss:$16 sps:$4 sm:$0xff]  }
 0x562   :  { %5529 = vmatpush1.bf16.msra.mxu1 %v6943_v27  ;;  %5693 = vmatpush1.bf16.msra.mxu0 %v6946_v38  ;;  %v7009_v27 = vld [vmem:[%s9320_s10 + $0x460] ss:$16 sps:$4 sm:$0xff]   ;;  %v7012_v38 = vld [vmem:[%s9320_s10 + $0x468] ss:$16 sps:$4 sm:$0xff]  }
 0x563   :  { %5530 = vmatprep.subr.bf16.mxu1 %v6951_v28  ;;  %5694 = vmatprep.subr.bf16.mxu0 %v6954_v39  ;;  %v7017_v28 = vld [vmem:[%s9320_s10 + $0x484] ss:$16 sps:$4 sm:$0xff]   ;;  %v7020_v39 = vld [vmem:[%s9320_s10 + $0x48c] ss:$16 sps:$4 sm:$0xff]  }
 0x566   :  { %5531 = vmatpush1.bf16.msra.mxu1 %v6949_v40  ;;  %5695 = vmatpush1.bf16.msra.mxu0 %v6952_v41  ;;  %v7015_v40 = vld [vmem:[%s9320_s10 + $0x480] ss:$16 sps:$4 sm:$0xff]   ;;  %v7018_v41 = vld [vmem:[%s9320_s10 + $0x488] ss:$16 sps:$4 sm:$0xff]  }
 0x567   :  { %5532 = vmatprep.subr.bf16.mxu1 %v6957_v29  ;;  %5696 = vmatprep.subr.bf16.mxu0 %v6960_v43  ;;  %v7023_v29 = vld [vmem:[%s9320_s10 + $0x4a4] ss:$16 sps:$4 sm:$0xff]   ;;  %v7026_v43 = vld [vmem:[%s9320_s10 + $0x4ac] ss:$16 sps:$4 sm:$0xff]  }
 0x56a   :  { %5533 = vmatpush1.bf16.msra.mxu1 %v6955_v44  ;;  %5697 = vmatpush1.bf16.msra.mxu0 %v6958_v50  ;;  %v7021_v44 = vld [vmem:[%s9320_s10 + $0x4a0] ss:$16 sps:$4 sm:$0xff]   ;;  %v7024_v50 = vld [vmem:[%s9320_s10 + $0x4a8] ss:$16 sps:$4 sm:$0xff]  }
 0x56b   :  { %5534 = vmatprep.subr.bf16.mxu1 %v6963_v51  ;;  %5698 = vmatprep.subr.bf16.mxu0 %v6966_v60  ;;  %v7029_v51 = vld [vmem:[%s9320_s10 + $0x4c4] ss:$16 sps:$4 sm:$0xff]   ;;  %v7032_v60 = vld [vmem:[%s9320_s10 + $0x4cc] ss:$16 sps:$4 sm:$0xff]  }
 0x56e   :  { %5535 = vmatpush1.bf16.msra.mxu1 %v6961_v61  ;;  %5699 = vmatpush1.bf16.msra.mxu0 %v6964_v62  ;;  %v7027_v61 = vld [vmem:[%s9320_s10 + $0x4c0] ss:$16 sps:$4 sm:$0xff]   ;;  %v7030_v62 = vld [vmem:[%s9320_s10 + $0x4c8] ss:$16 sps:$4 sm:$0xff]  }
 0x56f   :  { %5536 = vmatprep.subr.bf16.mxu1 %v6969_v63  ;;  %5700 = vmatprep.subr.bf16.mxu0 %v6972_v0  ;;  %v7035_v63 = vld [vmem:[%s9320_s10 + $0x4e4] ss:$16 sps:$4 sm:$0xff]   ;;  %v7038_v0 = vld [vmem:[%s9320_s10 + $0x4ec] ss:$16 sps:$4 sm:$0xff]  }
 0x572   :  { %5537 = vmatpush1.bf16.msra.mxu1 %v6967_v1  ;;  %5701 = vmatpush1.bf16.msra.mxu0 %v6970_v2  ;;  %v7033_v1 = vld [vmem:[%s9320_s10 + $0x4e0] ss:$16 sps:$4 sm:$0xff]   ;;  %v7036_v2 = vld [vmem:[%s9320_s10 + $0x4e8] ss:$16 sps:$4 sm:$0xff]  }
 0x573   :  { %5538 = vmatprep.subr.bf16.mxu1 %v6975_v3  ;;  %5702 = vmatprep.subr.bf16.mxu0 %v6978_v4  ;;  %v7041_v3 = vld [vmem:[%s9320_s10 + $0x504] ss:$16 sps:$4 sm:$0xff]   ;;  %v7044_v4 = vld [vmem:[%s9320_s10 + $0x50c] ss:$16 sps:$4 sm:$0xff]  }
 0x576   :  { %5539 = vmatpush1.bf16.msra.mxu1 %v6973_v5  ;;  %5703 = vmatpush1.bf16.msra.mxu0 %v6976_v6  ;;  %v7039_v5 = vld [vmem:[%s9320_s10 + $0x500] ss:$16 sps:$4 sm:$0xff]   ;;  %v7042_v6 = vld [vmem:[%s9320_s10 + $0x508] ss:$16 sps:$4 sm:$0xff]  }
 0x577   :  { %5540 = vmatprep.subr.bf16.mxu1 %v6981_v8  ;;  %5704 = vmatprep.subr.bf16.mxu0 %v6984_v9  ;;  %v7050_v8 = vld [vmem:[%s9320_s10 + $0x52c] ss:$16 sps:$4 sm:$0xff]   ;;  %v7045_v9 = vld [vmem:[%s9320_s10 + $0x520] ss:$16 sps:$4 sm:$0xff]  }
 0x57a   :  { %5541 = vmatpush1.bf16.msra.mxu1 %v6979_v42  ;;  %5705 = vmatpush1.bf16.msra.mxu0 %v6982_v16  ;;  %v7053_v42 = vld [vmem:[%s9320_s10 + $0x544] ss:$16 sps:$4 sm:$0xff]   ;;  %v7056_v16 = vld [vmem:[%s9320_s10 + $0x54c] ss:$16 sps:$4 sm:$0xff]  }
 0x57b   :  { %5542 = vmatprep.subr.bf16.mxu1 %v6987_v17  ;;  %5706 = vmatprep.subr.bf16.mxu0 %v6990_v52  ;;  %v7054_v17 = vld [vmem:[%s9320_s10 + $0x548] ss:$16 sps:$4 sm:$0xff]   ;;  %v7059_v52 = vld [vmem:[%s9320_s10 + $0x564] ss:$16 sps:$4 sm:$0xff]  }
 0x57e   :  { %5543 = vmatpush1.bf16.msra.mxu1 %v6985_v19  ;;  %5707 = vmatpush1.bf16.msra.mxu0 %v6988_v36  ;;  %v7057_v19 = vld [vmem:[%s9320_s10 + $0x560] ss:$16 sps:$4 sm:$0xff]   ;;  %v7060_v36 = vld [vmem:[%s9320_s10 + $0x568] ss:$16 sps:$4 sm:$0xff]  }
 0x57f   :  { %5553 = vmatprep.subr.bf16.mxu1 %v6993_v47  ;;  %5717 = vmatprep.subr.bf16.mxu0 %v6996_v11  ;;  %v7068_v47 = vld [vmem:[%s9320_s10 + $0x58c] ss:$16 sps:$4 sm:$0xff]   ;;  %v7063_v11 = vld [vmem:[%s9320_s10 + $0x580] ss:$16 sps:$4 sm:$0xff]  }
 0x581   :  { %5545 = vmatmul.mubr.bf16.vlgmr.msra.gmra.mrb[52].mxu1 %v3907_v22  ;;  %5709 = vmatmul.mubr.bf16.vlgmr.msra.gmra.mrb[56].mxu0 %v3907_v22  ;;  %v7074_v22 = vld [vmem:[%s9320_s10 + $0x5ac] ss:$16 sps:$4 sm:$0xff]  }
 0x582   :  { %5554 = vmatpush1.bf16.msra.mxu1 %v6991_v45  ;;  %5585 = vmatprep.mubr.bf16.mxu1 %v3910_v24  ;;  %v7071_v45 = vld [vmem:[%s9320_s10 + $0x5a4] ss:$16 sps:$4 sm:$0xff]  }
 0x583   :  { %5718 = vmatpush1.bf16.msra.mxu0 %v6994_v46  ;;  %5749 = vmatprep.mubr.bf16.mxu0 %v3910_v24  ;;  %v7069_v46 = vld [vmem:[%s9320_s10 + $0x5a0] ss:$16 sps:$4 sm:$0xff]   ;;  %v3549_v24 = vrot.slane %v8692_v33, %v2759_v48 }
 0x584   :  { %5555 = vmatprep.subr.bf16.mxu1 %v6999_v25  ;;  %5719 = vmatprep.subr.bf16.mxu0 %v7002_v26  ;;  %v7072_v25 = vld [vmem:[%s9320_s10 + $0x5a8] ss:$16 sps:$4 sm:$0xff]   ;;  %v7077_v26 = vld [vmem:[%s9320_s10 + $0x5c4] ss:$16 sps:$4 sm:$0xff]   ;;  %v7075_v48 = vld [vmem:[%s9320_s10 + $0x5c0] ss:$16 sps:$4 sm:$0xff]  }
 0x586   :  { %5556 = vmatpush1.bf16.msra.mxu1 %v6997_v31  ;;  %v7080_v31 = vld [vmem:[%s9320_s10 + $0x5cc] ss:$16 sps:$4 sm:$0xff]  }
 0x587   :  { %5720 = vmatpush1.bf16.msra.mxu0 %v7000_v32  ;;  %5557 = vmatprep.subr.bf16.mxu1 %v7005_v12  ;;  %v3561_v32 = vrot.slane %v8692_v33, %v2771_v59  ;;  %v3850_v12 = vadd.f32 %v8738_v56, %v3549_v24  ;;  %v7086_v59 = vld [vmem:[%s9320_s10 + $0x5ec] ss:$16 sps:$4 sm:$0xff]   ;;  %v7081_v56 = vld [vmem:[%s9320_s10 + $0x5e0] ss:$16 sps:$4 sm:$0xff]   ;;  %v7144_v24 = vld [vmem:[%s9320_s10 + $0x728] ss:$16 sps:$4 sm:$0xff]  }
 0x588   :  { %5721 = vmatprep.subr.bf16.mxu0 %v7008_v34  ;;  %v7078_v34 = vld [vmem:[%s9320_s10 + $0x5c8] ss:$16 sps:$4 sm:$0xff]  }
 0x58a   :  { %5558 = vmatpush1.bf16.msra.mxu1 %v7003_v13  ;;  %v7083_v13 = vld [vmem:[%s9320_s10 + $0x5e4] ss:$16 sps:$4 sm:$0xff]  }
 0x58b   :  { %5722 = vmatpush1.bf16.msra.mxu0 %v7006_v35  ;;  %5559 = vmatprep.subr.bf16.mxu1 %v7011_v37  ;;  %v3893_v35 = vadd.f32 %v8744_v14, %v3561_v32  ;;  %v3901_v37 = vmax.f32 %v3850_v12, 0.0  ;;  %v7092_v14 = vld [vmem:[%s9320_s10 + $0x60c] ss:$16 sps:$4 sm:$0xff]   ;;  %v7150_v32 = vld [vmem:[%s9320_s10 + $0x748] ss:$16 sps:$4 sm:$0xff]  }
 0x58c   :  { %5723 = vmatprep.subr.bf16.mxu0 %v7014_v23  ;;  %v7084_v23 = vld [vmem:[%s9320_s10 + $0x5e8] ss:$16 sps:$4 sm:$0xff]   ;;  %v7158_v12 = vld [vmem:[%s9320_s10 + $0x76c] ss:$16 sps:$4 sm:$0xff]  }
 0x58e   :  { %5560 = vmatpush1.bf16.msra.mxu1 %v7009_v27  ;;  %v7089_v27 = vld [vmem:[%s9320_s10 + $0x604] ss:$16 sps:$4 sm:$0xff]  }
 0x58f   :  { %5724 = vmatpush1.bf16.msra.mxu0 %v7012_v38  ;;  %5561 = vmatprep.subr.bf16.mxu1 %v7017_v28  ;;  %v3904_v38 = vmax.f32 %v3893_v35, 0.0  ;;  %v7087_v28 = vld [vmem:[%s9320_s10 + $0x600] ss:$16 sps:$4 sm:$0xff]   ;;  %v7164_v35 = vld [vmem:[%s9320_s10 + $0x78c] ss:$16 sps:$4 sm:$0xff]  }
 0x590   :  { %5725 = vmatprep.subr.bf16.mxu0 %v7020_v39  ;;  %v3909_v39 = vpack.c.bf16 %v3901_v37, %v3901_v37  ;;  %v7162_v37 = vld [vmem:[%s9320_s10 + $0x788] ss:$16 sps:$4 sm:$0xff]  }
 0x592   :  { %5562 = vmatpush1.bf16.msra.mxu1 %v7015_v40  ;;  %v7090_v40 = vld [vmem:[%s9320_s10 + $0x608] ss:$16 sps:$4 sm:$0xff]  }
 0x593   :  { %5726 = vmatpush1.bf16.msra.mxu0 %v7018_v41  ;;  %5563 = vmatprep.subr.bf16.mxu1 %v7023_v29  ;;  %v7095_v41 = vld [vmem:[%s9320_s10 + $0x624] ss:$16 sps:$4 sm:$0xff]   ;;  %v3912_v29 = vpack.c.bf16 %v3904_v38, %v3904_v38  ;;  %v3557_v38 = vrot.slane %v8692_v33, %v2767_v49  ;;  %v7171_v49 = vld [vmem:[%s9320_s10 + $0x7c0] ss:$16 sps:$4 sm:$0xff]  }
 0x594   :  { %5727 = vmatprep.subr.bf16.mxu0 %v7026_v43  ;;  %v7098_v43 = vld [vmem:[%s9320_s10 + $0x62c] ss:$16 sps:$4 sm:$0xff]  }
 0x595   :  { %v3891_v33 = vadd.f32 %v8740_v10, %v3557_v38  ;;  %v7177_v10 = vld [vmem:[%s9320_s10 + $0x7e0] ss:$16 sps:$4 sm:$0xff]  }
 0x596   :  { %5564 = vmatpush1.bf16.msra.mxu1 %v7021_v44  ;;  %v7093_v44 = vld [vmem:[%s9320_s10 + $0x620] ss:$16 sps:$4 sm:$0xff]  }
 0x597   :  { %5728 = vmatpush1.bf16.msra.mxu0 %v7024_v50  ;;  %5565 = vmatprep.subr.bf16.mxu1 %v7029_v51  ;;  %v7096_v50 = vld [vmem:[%s9320_s10 + $0x628] ss:$16 sps:$4 sm:$0xff]   ;;  %v7101_v51 = vld [vmem:[%s9320_s10 + $0x644] ss:$16 sps:$4 sm:$0xff]  }
 0x598   :  { %5729 = vmatprep.subr.bf16.mxu0 %v7032_v60  ;;  %v7104_v60 = vld [vmem:[%s9320_s10 + $0x64c] ss:$16 sps:$4 sm:$0xff]  }
 0x59a   :  { %5566 = vmatpush1.bf16.msra.mxu1 %v7027_v61  ;;  %v7099_v61 = vld [vmem:[%s9320_s10 + $0x640] ss:$16 sps:$4 sm:$0xff]  }
 0x59b   :  { %5730 = vmatpush1.bf16.msra.mxu0 %v7030_v62  ;;  %5567 = vmatprep.subr.bf16.mxu1 %v7035_v63  ;;  %v7102_v62 = vld [vmem:[%s9320_s10 + $0x648] ss:$16 sps:$4 sm:$0xff]   ;;  %v7107_v63 = vld [vmem:[%s9320_s10 + $0x664] ss:$16 sps:$4 sm:$0xff]  }
 0x59c   :  { %5731 = vmatprep.subr.bf16.mxu0 %v7038_v0  ;;  %v7110_v0 = vld [vmem:[%s9320_s10 + $0x66c] ss:$16 sps:$4 sm:$0xff]  }
 0x59e   :  { %5568 = vmatpush1.bf16.msra.mxu1 %v7033_v1  ;;  %v7105_v1 = vld [vmem:[%s9320_s10 + $0x660] ss:$16 sps:$4 sm:$0xff]  }
 0x59f   :  { %5732 = vmatpush1.bf16.msra.mxu0 %v7036_v2  ;;  %5569 = vmatprep.subr.bf16.mxu1 %v7041_v3  ;;  %v7108_v2 = vld [vmem:[%s9320_s10 + $0x668] ss:$16 sps:$4 sm:$0xff]   ;;  %v7113_v3 = vld [vmem:[%s9320_s10 + $0x684] ss:$16 sps:$4 sm:$0xff]  }
 0x5a0   :  { %5733 = vmatprep.subr.bf16.mxu0 %v7044_v4  ;;  %v7116_v4 = vld [vmem:[%s9320_s10 + $0x68c] ss:$16 sps:$4 sm:$0xff]  }
 0x5a2   :  { %5570 = vmatpush1.bf16.msra.mxu1 %v7039_v5  ;;  %v7111_v5 = vld [vmem:[%s9320_s10 + $0x680] ss:$16 sps:$4 sm:$0xff]  }
 0x5a3   :  { %5734 = vmatpush1.bf16.msra.mxu0 %v7042_v6  ;;  %5571 = vmatprep.subr.bf16.mxu1 %v7047_v7  ;;  %v7114_v6 = vld [vmem:[%s9320_s10 + $0x688] ss:$16 sps:$4 sm:$0xff]   ;;  %v7119_v7 = vld [vmem:[%s9320_s10 + $0x6a4] ss:$16 sps:$4 sm:$0xff]  }
 0x5a4   :  { %5735 = vmatprep.subr.bf16.mxu0 %v7050_v8  ;;  %v7122_v8 = vld [vmem:[%s9320_s10 + $0x6ac] ss:$16 sps:$4 sm:$0xff]  }
 0x5a6   :  { %5572 = vmatpush1.bf16.msra.mxu1 %v7045_v9  ;;  %v7117_v9 = vld [vmem:[%s9320_s10 + $0x6a0] ss:$16 sps:$4 sm:$0xff]  }
 0x5a7   :  { %5736 = vmatpush1.bf16.msra.mxu0 %v7048_v15  ;;  %5573 = vmatprep.subr.bf16.mxu1 %v7053_v42  ;;  %v7120_v15 = vld [vmem:[%s9320_s10 + $0x6a8] ss:$16 sps:$4 sm:$0xff]   ;;  %v7125_v42 = vld [vmem:[%s9320_s10 + $0x6c4] ss:$16 sps:$4 sm:$0xff]  }
 0x5a8   :  { %5737 = vmatprep.subr.bf16.mxu0 %v7056_v16  ;;  %v7128_v16 = vld [vmem:[%s9320_s10 + $0x6cc] ss:$16 sps:$4 sm:$0xff]  }
 0x5aa   :  { %5574 = vmatpush1.bf16.msra.mxu1 %v7051_v30  ;;  %v7123_v30 = vld [vmem:[%s9320_s10 + $0x6c0] ss:$16 sps:$4 sm:$0xff]  }
 0x5ab   :  { %5738 = vmatpush1.bf16.msra.mxu0 %v7054_v17  ;;  %5575 = vmatprep.subr.bf16.mxu1 %v7059_v52  ;;  %v7126_v17 = vld [vmem:[%s9320_s10 + $0x6c8] ss:$16 sps:$4 sm:$0xff]   ;;  %v7131_v52 = vld [vmem:[%s9320_s10 + $0x6e4] ss:$16 sps:$4 sm:$0xff]  }
 0x5ac   :  { %5739 = vmatprep.subr.bf16.mxu0 %v7062_v18  ;;  %v7134_v18 = vld [vmem:[%s9320_s10 + $0x6ec] ss:$16 sps:$4 sm:$0xff]  }
 0x5ae   :  { %5576 = vmatpush1.bf16.msra.mxu1 %v7057_v19  ;;  %v7129_v19 = vld [vmem:[%s9320_s10 + $0x6e0] ss:$16 sps:$4 sm:$0xff]  }
 0x5af   :  { %5740 = vmatpush1.bf16.msra.mxu0 %v7060_v36  ;;  %5577 = vmatprep.subr.bf16.mxu1 %v7065_v20  ;;  %v7132_v36 = vld [vmem:[%s9320_s10 + $0x6e8] ss:$16 sps:$4 sm:$0xff]   ;;  %v7137_v20 = vld [vmem:[%s9320_s10 + $0x704] ss:$16 sps:$4 sm:$0xff]  }
 0x5b0   :  { %5741 = vmatprep.subr.bf16.mxu0 %v7068_v47  ;;  %v7140_v47 = vld [vmem:[%s9320_s10 + $0x70c] ss:$16 sps:$4 sm:$0xff]  }
 0x5b2   :  { %5578 = vmatpush1.bf16.msra.mxu1 %v7063_v11  ;;  %v7135_v11 = vld [vmem:[%s9320_s10 + $0x700] ss:$16 sps:$4 sm:$0xff]  }
 0x5b3   :  { %5742 = vmatpush1.bf16.msra.mxu0 %v7066_v21  ;;  %5579 = vmatprep.subr.bf16.mxu1 %v7071_v45  ;;  %v7138_v21 = vld [vmem:[%s9320_s10 + $0x708] ss:$16 sps:$4 sm:$0xff]   ;;  %v7143_v45 = vld [vmem:[%s9320_s10 + $0x724] ss:$16 sps:$4 sm:$0xff]  }
 0x5b4   :  { %5743 = vmatprep.subr.bf16.mxu0 %v7074_v22  ;;  %v7146_v22 = vld [vmem:[%s9320_s10 + $0x72c] ss:$16 sps:$4 sm:$0xff]  }
 0x5b6   :  { %5580 = vmatpush1.bf16.msra.mxu1 %v7069_v46  ;;  %v7141_v46 = vld [vmem:[%s9320_s10 + $0x720] ss:$16 sps:$4 sm:$0xff]  }
 0x5b7   :  { %5744 = vmatpush1.bf16.msra.mxu0 %v7072_v25  ;;  %5581 = vmatprep.subr.bf16.mxu1 %v7077_v26  ;;  %v7149_v25 = vld [vmem:[%s9320_s10 + $0x744] ss:$16 sps:$4 sm:$0xff]   ;;  %v7152_v26 = vld [vmem:[%s9320_s10 + $0x74c] ss:$16 sps:$4 sm:$0xff]  }
 0x5b8   :  { %5745 = vmatprep.subr.bf16.mxu0 %v7080_v31  ;;  %v7147_v31 = vld [vmem:[%s9320_s10 + $0x740] ss:$16 sps:$4 sm:$0xff]  }
 0x5ba   :  { %5582 = vmatpush1.bf16.msra.mxu1 %v7075_v48  ;;  %v7155_v48 = vld [vmem:[%s9320_s10 + $0x764] ss:$16 sps:$4 sm:$0xff]  }
 0x5bb   :  { %5746 = vmatpush1.bf16.msra.mxu0 %v7078_v34  ;;  %5583 = vmatprep.subr.bf16.mxu1 %v7083_v13  ;;  %v7153_v34 = vld [vmem:[%s9320_s10 + $0x760] ss:$16 sps:$4 sm:$0xff]   ;;  %v7156_v13 = vld [vmem:[%s9320_s10 + $0x768] ss:$16 sps:$4 sm:$0xff]  }
 0x5bc   :  { %5747 = vmatprep.subr.bf16.mxu0 %v7086_v59  ;;  %v7161_v59 = vld [vmem:[%s9320_s10 + $0x784] ss:$16 sps:$4 sm:$0xff]  }
 0x5be   :  { %5584 = vmatpush1.bf16.msra.mxu1 %v7081_v56  ;;  %v7159_v56 = vld [vmem:[%s9320_s10 + $0x780] ss:$16 sps:$4 sm:$0xff]  }
 0x5bf   :  { %5748 = vmatpush1.bf16.msra.mxu0 %v7084_v23  ;;  %5594 = vmatprep.subr.bf16.mxu1 %v7089_v27  ;;  %v7167_v23 = vld [vmem:[%s9320_s10 + $0x7a4] ss:$16 sps:$4 sm:$0xff]   ;;  %v7170_v27 = vld [vmem:[%s9320_s10 + $0x7ac] ss:$16 sps:$4 sm:$0xff]  }
 0x5c0   :  { %5758 = vmatprep.subr.bf16.mxu0 %v7092_v14  ;;  %v7165_v14 = vld [vmem:[%s9320_s10 + $0x7a0] ss:$16 sps:$4 sm:$0xff]  }
 0x5c1   :  { %5586 = vmatmul.mubr.bf16.vlgmr.msra.gmra.mrb[52].mxu1 %v3909_v39 }
 0x5c2   :  { %5750 = vmatmul.mubr.bf16.vlgmr.msra.gmra.mrb[56].mxu0 %v3909_v39  ;;  %5595 = vmatpush1.bf16.msra.mxu1 %v7087_v28  ;;  %v7168_v28 = vld [vmem:[%s9320_s10 + $0x7a8] ss:$16 sps:$4 sm:$0xff]   ;;  %v7173_v39 = vld [vmem:[%s9320_s10 + $0x7c4] ss:$16 sps:$4 sm:$0xff]  }
 0x5c3   :  { %5626 = vmatprep.mubr.bf16.mxu1 %v3912_v29  ;;  %5759 = vmatpush1.bf16.msra.mxu0 %v7090_v40  ;;  %v7176_v40 = vld [vmem:[%s9320_s10 + $0x7cc] ss:$16 sps:$4 sm:$0xff]  }
 0x5c4   :  { %5790 = vmatprep.mubr.bf16.mxu0 %v3912_v29  ;;  %5596 = vmatprep.subr.bf16.mxu1 %v7095_v41  ;;  %v7174_v41 = vld [vmem:[%s9320_s10 + $0x7c8] ss:$16 sps:$4 sm:$0xff]   ;;  %v7179_v29 = vld [vmem:[%s9320_s10 + $0x7e4] ss:$16 sps:$4 sm:$0xff]  }
 0x5c5   :  { %5760 = vmatprep.subr.bf16.mxu0 %v7098_v43  ;;  %v7182_v43 = vld [vmem:[%s9320_s10 + $0x7ec] ss:$16 sps:$4 sm:$0xff]  }
 0x5c6   :  { %5597 = vmatpush1.bf16.msra.mxu1 %v7093_v44  ;;  %v3903_v44 = vmax.f32 %v3891_v33, 0.0 }
 0x5c7   :  { %5761 = vmatpush1.bf16.msra.mxu0 %v7096_v50  ;;  %5598 = vmatprep.subr.bf16.mxu1 %v7101_v51  ;;  %v7180_v50 = vld [vmem:[%s9320_s10 + $0x7e8] ss:$16 sps:$4 sm:$0xff]  }
 0x5c8   :  { %5762 = vmatprep.subr.bf16.mxu0 %v7104_v60  ;;  %v3911_v51 = vpack.c.bf16 %v3903_v44, %v3903_v44  ;;  %v4169_v60 = vld [vmem:[%s9321_s11] sm:$0xf] }
 0x5ca   :  { %5599 = vmatpush1.bf16.msra.mxu1 %v7099_v61  ;;  %v7265_v61 = vmov 1966171168  }
 0x5cb   :  { %5763 = vmatpush1.bf16.msra.mxu0 %v7102_v62  ;;  %5600 = vmatprep.subr.bf16.mxu1 %v7107_v63  ;;  %v5814_v62 = vunpack.c.l.s4 %v7265_v61  ;;  %v4174_v63 = vrot.slane %v4169_v60, %v8342_v54 }
 0x5cc   :  { %5764 = vmatprep.subr.bf16.mxu0 %v7110_v0  ;;  %v4182_v0 = vrot.slane %v4169_v60, %v8345_v55 }
 0x5ce   :  { %5601 = vmatpush1.bf16.msra.mxu1 %v7105_v1  ;;  %v4178_v1 = vrot.slane %v4169_v60, %v8353_v57 }
 0x5cf   :  { %5765 = vmatpush1.bf16.msra.mxu0 %v7108_v2  ;;  %5602 = vmatprep.subr.bf16.mxu1 %v7113_v3  ;;  %v4186_v2 = vrot.slane %v4169_v60, %v8356_v58 }
 0x5d0   :  { %5766 = vmatprep.subr.bf16.mxu0 %v7116_v4  ;;  %v5815_v4 = vunpack.c.0.s8 %v5814_v62 }
 0x5d2   :  { %5603 = vmatpush1.bf16.msra.mxu1 %v7111_v5  ;;  %v5818_v55 = vsub.s32 %v5815_v4, %v8339_v53 }
 0x5d3   :  { %5767 = vmatpush1.bf16.msra.mxu0 %v7114_v6  ;;  %5604 = vmatprep.subr.bf16.mxu1 %v7119_v7 }
 0x5d4   :  { %5768 = vmatprep.subr.bf16.mxu0 %v7122_v8 }
 0x5d6   :  { %5605 = vmatpush1.bf16.msra.mxu1 %v7117_v9 }
 0x5d7   :  { %5769 = vmatpush1.bf16.msra.mxu0 %v7120_v15  ;;  %5606 = vmatprep.subr.bf16.mxu1 %v7125_v42 }
 0x5d8   :  { %5770 = vmatprep.subr.bf16.mxu0 %v7128_v16 }
 0x5da   :  { %5607 = vmatpush1.bf16.msra.mxu1 %v7123_v30 }
 0x5db   :  { %5771 = vmatpush1.bf16.msra.mxu0 %v7126_v17  ;;  %5608 = vmatprep.subr.bf16.mxu1 %v7131_v52 }
 0x5dc   :  { %5772 = vmatprep.subr.bf16.mxu0 %v7134_v18 }
 0x5de   :  { %5609 = vmatpush1.bf16.msra.mxu1 %v7129_v19 }
 0x5df   :  { %5773 = vmatpush1.bf16.msra.mxu0 %v7132_v36  ;;  %5610 = vmatprep.subr.bf16.mxu1 %v7137_v20 }
 0x5e0   :  { %5774 = vmatprep.subr.bf16.mxu0 %v7140_v47 }
 0x5e2   :  { %5611 = vmatpush1.bf16.msra.mxu1 %v7135_v11 }
 0x5e3   :  { %5775 = vmatpush1.bf16.msra.mxu0 %v7138_v21  ;;  %5612 = vmatprep.subr.bf16.mxu1 %v7143_v45 }
 0x5e4   :  { %5776 = vmatprep.subr.bf16.mxu0 %v7146_v22 }
 0x5e6   :  { %5613 = vmatpush1.bf16.msra.mxu1 %v7141_v46 }
 0x5e7   :  { %5777 = vmatpush1.bf16.msra.mxu0 %v7144_v24  ;;  %5614 = vmatprep.subr.bf16.mxu1 %v7149_v25 }
 0x5e8   :  { %5778 = vmatprep.subr.bf16.mxu0 %v7152_v26 }
 0x5ea   :  { %5615 = vmatpush1.bf16.msra.mxu1 %v7147_v31 }
 0x5eb   :  { %5779 = vmatpush1.bf16.msra.mxu0 %v7150_v32  ;;  %5616 = vmatprep.subr.bf16.mxu1 %v7155_v48 }
 0x5ec   :  { %5780 = vmatprep.subr.bf16.mxu0 %v7158_v12 }
 0x5ee   :  { %5617 = vmatpush1.bf16.msra.mxu1 %v7153_v34 }
 0x5ef   :  { %5781 = vmatpush1.bf16.msra.mxu0 %v7156_v13  ;;  %5618 = vmatprep.subr.bf16.mxu1 %v7161_v59 }
 0x5f0   :  { %5782 = vmatprep.subr.bf16.mxu0 %v7164_v35 }
 0x5f2   :  { %5619 = vmatpush1.bf16.msra.mxu1 %v7159_v56 }
 0x5f3   :  { %5783 = vmatpush1.bf16.msra.mxu0 %v7162_v37  ;;  %5620 = vmatprep.subr.bf16.mxu1 %v7167_v23 }
 0x5f4   :  { %5784 = vmatprep.subr.bf16.mxu0 %v7170_v27 }
 0x5f6   :  { %5621 = vmatpush1.bf16.msra.mxu1 %v7165_v14 }
 0x5f7   :  { %5785 = vmatpush1.bf16.msra.mxu0 %v7168_v28  ;;  %5622 = vmatprep.subr.bf16.mxu1 %v7173_v39 }
 0x5f8   :  { %5786 = vmatprep.subr.bf16.mxu0 %v7176_v40 }
 0x5fa   :  { %5623 = vmatpush1.bf16.msra.mxu1 %v7171_v49 }
 0x5fb   :  { %5787 = vmatpush1.bf16.msra.mxu0 %v7174_v41  ;;  %5624 = vmatprep.subr.bf16.mxu1 %v7179_v29 }
 0x5fc   :  { %5788 = vmatprep.subr.bf16.mxu0 %v7182_v43 }
 0x5fe   :  { %5625 = vmatpush1.bf16.msra.mxu1 %v7177_v10 }
 0x5ff   :  { %5789 = vmatpush1.bf16.msra.mxu0 %v7180_v50 }
 0x601   :  { %5627 = vmatmul.mubr.bf16.vlgmr.msra.gmra.mrb[52].mxu1 %v3911_v51 }
 0x602   :  { %5791 = vmatmul.mubr.bf16.vlgmr.msra.gmra.mrb[56].mxu0 %v3911_v51 }
 0x6d4   :  { %v5628_v3 = vpop.f32.mrb[52].mxu1 }
 0x6d5   :  { %v6655_v5 = vadd.f32 %v5628_v3, %v4174_v63  ;;  %v5792_v6 = vpop.f32.mrb[56].mxu0  ;;  %v5630_v7 = vpop.f32.mrb[53].mxu1 }
 0x6d6   :  { %v6657_v8 = vadd.f32 %v5792_v6, %v4182_v0  ;;  %v6656_v9 = vadd.f32 %v5630_v7, %v4178_v1  ;;  %v5794_v15 = vpop.f32.mrb[57].mxu0  ;;  %v5632_v42 = vpop.f32.mrb[54].mxu1 }
 0x6d7   :  { %v5799_v16 = vmax.f32 %v6655_v5, 0.0  ;;  %v6658_v30 = vadd.f32 %v5794_v15, %v4186_v2  ;;  %v5796_v17 = vpop.f32.mrb[58].mxu0  ;;  %v5633_v52 = vpop.f32.mrb[55].mxu1 }
 0x6d8   :  { %v5801_v54 = vmax.f32 %v6657_v8, 0.0  ;;  %v5800_v18 = vmax.f32 %v6656_v9, 0.0  ;;  %v5797_v57 = vpop.f32.mrb[59].mxu0 }
 0x6d9   :  { %v5802_v19 = vmax.f32 %v6658_v30, 0.0 }
 0x6da   :  { %v6503_v58 = vpack.c.bf16 %v5800_v18, %v5799_v16 }
 0x6db   :  { %v6504_v36 = vpack.c.bf16 %v5802_v19, %v5801_v54 }
 0x6dc   :  { %v5819_v20 = vrot.slane %v6503_v58, %v5818_v55 }
 0x6dd   :  { %v5826_v47 = vrot.slane %v6504_v36, %v5818_v55 }
 0x6df   :  { %v5827_v11 = vcombine.low %v5819_v20, %v5826_v47 }
 0x6e1   :  { %6505 = vst.sshfl [vmem:[%s9323_s13] sm:$0x55 pattern:$0x73625140] %v5827_v11 }
 0x6e2   :  { %5845 = vsyncpa [#allocation3], 1 }
 0x6e3   :  { %5846 = vsyncpa [#allocation5], 1 }

</bundles_post_ra>
